<compile_context>
chip_gen: v7x
topology: tpu7x:2x2x1
jax: 0.10.0
libtpu: 0.0.40
codegen_flags: <defaults>
</compile_context>

<pallas_src>
import jax
import jax.numpy as jnp
from jax.experimental import pallas as pl
from jax.experimental.pallas import tpu as pltpu


def _round_up(x, m):
    return (x + m - 1) // m * m


def _default_vmem_limit():
    """Per-generation VMEM request: ~3/4 of physical, capped at 96 MiB.
    v5e/v6e (128 MiB) -> 96 MiB; v7x (64 MiB) -> 48 MiB; unknown -> 48 MiB."""
    try:
        cap = pltpu.get_tpu_info().vmem_capacity_bytes
    except Exception:
        cap = 64 * 1024 * 1024
    return min(int(cap * 3 // 4), 96 * 1024 * 1024)


def _pick_block_b(B, N, D, H, feat_itemsize, vmem_limit_bytes):
    """Pick molecules-per-grid-step from a padded-VMEM budget (double-buffered
    input/output tiles + f32 intermediates), keeping >= 2 grid steps when the
    batch allows so both v7x TensorCores get work."""
    lane = 128
    feat_tile = N * _round_up(D, lane) * feat_itemsize           # features block
    aux_tile = _round_up(N + 1, lane) * 4                        # mask|target block
    out_tile = _round_up(4, lane) * 4                            # output block
    h_tile = N * _round_up(H, lane) * 4 * 2                      # h + h*w2 temporaries (f32)
    per_mol = 2 * (feat_tile + aux_tile + out_tile) + h_tile     # inputs/outputs double-buffered
    budget = int(vmem_limit_bytes * 0.6)                         # headroom: weights + compiler scratch
    cap = max(8, budget // max(per_mol, 1))
    if B >= 16:
        cap = min(cap, B // 2)                                   # >= 2 grid steps for megacore
    bb = min(cap, B)
    bb = max(8, (bb // 8) * 8)                                   # sublane alignment
    while B % bb:
        bb -= 8
    return max(bb, 8)


# ----------------------------------------------------------------------------
# Fused kernel: predictor + target normalisation + per-molecule abs errors.
# grid = (B // block_b,), one block of block_b molecules per step.
# ----------------------------------------------------------------------------
def fused_predictor_loss_kernel(scalars_ref, x_ref, aux_ref, w1_ref, b1_ref,
                                w2_ref, out_ref):
    TB = aux_ref.shape[0]
    N = aux_ref.shape[1] - 1
    H = w1_ref.shape[1]

    b2 = scalars_ref[0]
    median = scalars_ref[1]
    mad = scalars_ref[2]          # NOTE: mirrors PyTorch -- no guard on mad == 0

    # ---- predictor: one large lane-dense MXU matmul for the whole block ----
    x = x_ref[...]                                                    # (TB*N, D) bf16
    h = jnp.dot(x, w1_ref[...], preferred_element_type=jnp.float32)   # (TB*N, H) f32
    h = jnp.maximum(h + b1_ref[...], 0.0)

    # Scalar head (H -> 1) applied BEFORE pooling (identical math) as a VPU
    # multiply + lane reduce -- no degenerate 1-column MXU matmul.  Splitting
    # the row dim back into (molecule, atom) keeps the minor dim untouched.
    z = jnp.sum(h.reshape(TB, N, H) * w2_ref[...], axis=-1)           # (TB, N) f32

    m = aux_ref[:, :N]                                                # (TB, N) mask
    tgt = aux_ref[:, N:N + 1]                                         # (TB, 1) target

    num = jnp.sum(z * m, axis=-1, keepdims=True)                      # (TB, 1)
    denom = jnp.maximum(jnp.sum(m, axis=-1, keepdims=True), 1.0)
    pred = num * pl.reciprocal(denom, approx=True) + b2               # (TB, 1)

    tgt_norm = (tgt - median) / mad
    pred_actual = pred * mad + median

    # Direct column stores (no concatenate along a 1-wide lane axis):
    #   0: pred, 1: pred_actual, 2: |pred - tgt_norm|, 3: |pred_actual - tgt|
    out_ref[:, 0:1] = pred
    out_ref[:, 1:2] = pred_actual
    out_ref[:, 2:3] = jnp.abs(pred - tgt_norm)
    out_ref[:, 3:4] = jnp.abs(pred_actual - tgt)


def run_fused(features, mask, target, w1, b1, w2, b2, median, mad,
              block_b=None, feature_dtype=jnp.bfloat16, vmem_limit_bytes=None):
    B, N, D = features.shape
    H = w1.shape[-1]
    assert B % 8 == 0, "batch must be a multiple of 8 (sublane alignment)"

    # Wrapper-side layout plumbing (free reshapes + tiny concat, done by XLA):
    #  * features flattened to (B*N, D) and cast to bf16 (halves HBM bytes);
    #  * mask + target packed into one (B, N+1) array -> no trailing-dim-1
    #    tiles that pad 128x in VMEM and DMA as narrow strided transfers.
    feats = features.reshape(B * N, D).astype(feature_dtype)
    aux = jnp.concatenate(
        [mask.reshape(B, N).astype(jnp.float32),
         target.reshape(B, 1).astype(jnp.float32)], axis=-1)          # (B, N+1)
    w1c = jnp.asarray(w1).astype(feature_dtype)
    b1r = jnp.asarray(b1, jnp.float32).reshape(1, H)
    w2r = jnp.asarray(w2, jnp.float32).reshape(1, H)

    scalars = jnp.stack([
        jnp.asarray(b2, jnp.float32).reshape(()),
        jnp.asarray(median, jnp.float32).reshape(()),
        jnp.asarray(mad, jnp.float32).reshape(()),
    ])

    if vmem_limit_bytes is None:
        vmem_limit_bytes = _default_vmem_limit()
    if block_b is None:
        block_b = _pick_block_b(B, N, D, H, feats.dtype.itemsize, vmem_limit_bytes)
    assert B % block_b == 0 and block_b % 8 == 0
    num_blocks = B // block_b

    cost = pl.CostEstimate(
        flops=2 * B * N * D * H + 4 * B * N * H,
        transcendentals=B,
        bytes_accessed=(feats.size * feats.dtype.itemsize
                        + aux.size * 4 + B * 4 * 4
                        + w1c.size * w1c.dtype.itemsize
                        + (b1r.size + w2r.size + 3) * 4),
    )

    return pl.pallas_call(
        fused_predictor_loss_kernel,
        out_shape=jax.ShapeDtypeStruct((B, 4), jnp.float32),
        grid=(num_blocks,),
        in_specs=[
            pl.BlockSpec(memory_space=pltpu.MemorySpace.SMEM),         # b2, median, mad
            pl.BlockSpec((block_b * N, D), lambda b: (b, 0)),          # features (flat, bf16)
            pl.BlockSpec((block_b, N + 1), lambda b: (b, 0)),          # mask | target
            pl.BlockSpec((D, H), lambda b: (0, 0)),                    # w1 (resident)
            pl.BlockSpec((1, H), lambda b: (0, 0)),                    # b1 (resident)
            pl.BlockSpec((1, H), lambda b: (0, 0)),                    # w2 row (resident)
        ],
        # each grid step owns its output tile -> blocks can run in parallel
        out_specs=pl.BlockSpec((block_b, 4), lambda b: (b, 0)),
        compiler_params=pltpu.CompilerParams(
            dimension_semantics=("parallel",),
            vmem_limit_bytes=vmem_limit_bytes,
        ),
        cost_estimate=cost,
    )(scalars, feats, aux, w1c, b1r, w2r)


# ----------------------------------------------------------------------------
# MoleculePredictor.forward equivalent
# ----------------------------------------------------------------------------
def molecule_predictor_forward(inpt, params, task, ds_stats=None, block_b=None,
                               feature_dtype=jnp.bfloat16):
    """Mirrors MoleculePredictor.forward (both ds_stats branches)."""
    if ds_stats is not None:
        median, mad = ds_stats
    else:
        median, mad = 0.0, 1.0      # identity normalisation -> loss == mae

    packed = run_fused(inpt["features"], inpt["mask"], inpt[task],
                       params["w1"], params["b1"], params["w2"], params["b2"],
                       median, mad, block_b=block_b, feature_dtype=feature_dtype)

    prediction = packed[:, 0:1]
    prediction_actual = packed[:, 1:2]
    # final mean over B scalars kept in plain JAX (trivial; keeps the grid parallel)
    loss = jnp.mean(packed[:, 2])
    mae = jnp.mean(packed[:, 3])

    out = {"prediction": prediction, "loss": loss, "mae": mae}
    if ds_stats is not None:
        out["prediction_actual"] = prediction_actual
    out["reports"] = {"loss": loss, "mae": mae}
    return out


if __name__ == "__main__":
    B, N, D, H = 256, 8, 16, 32     # small demo shapes; block_b auto-derived (-> grid of 2)

    key = jax.random.PRNGKey(0)
    k_feat, k_tgt, k_w1, k_b1, k_w2 = jax.random.split(key, 5)

    features = jax.random.normal(k_feat, (B, N, D), dtype=jnp.float32)
    mask = jnp.concatenate(
        [jnp.ones((B, N - 2, 1), jnp.float32),
         jnp.zeros((B, 2, 1), jnp.float32)], axis=1)       # last 2 atoms padded out
    target = jax.random.normal(k_tgt, (B, 1), dtype=jnp.float32)

    inpt = {"features": features, "mask": mask, "homo": target}

    params = {
        "w1": jax.random.normal(k_w1, (D, H), dtype=jnp.float32) * 0.1,
        "b1": jax.random.normal(k_b1, (1, H), dtype=jnp.float32) * 0.1,
        "w2": jax.random.normal(k_w2, (H, 1), dtype=jnp.float32) * 0.1,
        "b2": jnp.full((1, 1), 0.05, dtype=jnp.float32),
    }

    ds_stats = (0.5, 2.0)                   # (median, mad)

    out = molecule_predictor_forward(inpt, params, task="homo", ds_stats=ds_stats)
    jax.block_until_ready(out["loss"])
    jax.block_until_ready(out["mae"])
    jax.block_until_ready(out["prediction"])
    jax.block_until_ready(out["prediction_actual"])

    # ---- pure-JAX reference of the full forward (same bf16 inputs, f32 acc) ----
    f_bf = features.astype(jnp.bfloat16)
    w1_bf = params["w1"].astype(jnp.bfloat16)
    h = jnp.maximum(
        jnp.einsum("bnd,dh->bnh", f_bf, w1_bf,
                   preferred_element_type=jnp.float32) + params["b1"][0], 0.0)
    pooled = jnp.sum(h * mask, axis=1) / jnp.maximum(jnp.sum(mask, axis=1), 1.0)
    pred_ref = pooled @ params["w2"] + params["b2"]
    median, mad = ds_stats
    tgt_norm = (target - median) / mad
    pred_act_ref = pred_ref * mad + median
    loss_ref = jnp.mean(jnp.abs(pred_ref - tgt_norm))
    mae_ref = jnp.mean(jnp.abs(pred_act_ref - target))

    assert jnp.allclose(out["prediction"], pred_ref, atol=2e-3)
    assert jnp.allclose(out["prediction_actual"], pred_act_ref, atol=2e-3)
    assert jnp.allclose(out["loss"], loss_ref, atol=2e-3)
    assert jnp.allclose(out["mae"], mae_ref, atol=2e-3)

    # ---- ds_stats=None branch: loss == mae == mean|pred - target| ----
    out_none = molecule_predictor_forward(inpt, params, task="homo", ds_stats=None)
    jax.block_until_ready(out_none["loss"])
    loss_none_ref = jnp.mean(jnp.abs(pred_ref - target))
    assert jnp.allclose(out_none["loss"], loss_none_ref, atol=2e-3)
    assert jnp.allclose(out_none["mae"], out_none["loss"], atol=1e-6)

    print("KERNEL_OK")
</pallas_src>

<mosaic_0001>
module attributes {stable_mosaic.version = 11 : i64} {
  func.func @fused_predictor_loss_kernel(%arg0: i32, %arg1: memref<3xf32, #tpu.memory_space<smem>>, %arg2: memref<1024x16xbf16, #tpu.memory_space<vmem>>, %arg3: memref<128x9xf32, #tpu.memory_space<vmem>>, %arg4: memref<16x32xbf16, #tpu.memory_space<vmem>>, %arg5: memref<1x32xf32, #tpu.memory_space<vmem>>, %arg6: memref<1x32xf32, #tpu.memory_space<vmem>>, %arg7: memref<128x4xf32, #tpu.memory_space<vmem>>) attributes {dimension_semantics = [#tpu.dimension_semantics<parallel>], iteration_bounds = array<i64: 2>, scalar_prefetch = 0 : i64, scratch_operands = 0 : i64, tpu.core_type = #tpu.core_type<tc>, window_params = [{transform_indices = @transform_0, window_bounds = array<i64: 3>}, {transform_indices = @transform_1, window_bounds = array<i64: 1024, 16>}, {transform_indices = @transform_2, window_bounds = array<i64: 128, 9>}, {pipeline_mode = #tpu.pipeline_mode<synchronous>, transform_indices = @transform_3, window_bounds = array<i64: 16, 32>}, {pipeline_mode = #tpu.pipeline_mode<synchronous>, transform_indices = @transform_4, window_bounds = array<i64: 1, 32>}, {pipeline_mode = #tpu.pipeline_mode<synchronous>, transform_indices = @transform_5, window_bounds = array<i64: 1, 32>}, {transform_indices = @transform_6, window_bounds = array<i64: 128, 4>}]} {
    %c0 = arith.constant 0 : index
    %0 = memref.load %arg1[%c0] : memref<3xf32, #tpu.memory_space<smem>>
    %c1 = arith.constant 1 : index
    %1 = memref.load %arg1[%c1] : memref<3xf32, #tpu.memory_space<smem>>
    %c2 = arith.constant 2 : index
    %2 = memref.load %arg1[%c2] : memref<3xf32, #tpu.memory_space<smem>>
    %c0_0 = arith.constant 0 : index
    %c0_1 = arith.constant 0 : index
    %3 = vector.load %arg2[%c0_0, %c0_1] : memref<1024x16xbf16, #tpu.memory_space<vmem>>, vector<1024x16xbf16>
    %c0_2 = arith.constant 0 : index
    %c0_3 = arith.constant 0 : index
    %4 = vector.load %arg4[%c0_2, %c0_3] : memref<16x32xbf16, #tpu.memory_space<vmem>>, vector<16x32xbf16>
    %cst = arith.constant dense<0.000000e+00> : vector<1024x32xf32>
    %5 = tpu.matmul %3, %4, %cst {dimension_numbers = #tpu.dot_dimension_numbers<[1], [0], [0], [1], [0, 0, 1, 1], [], []>} : vector<1024x16xbf16>, vector<16x32xbf16>, vector<1024x32xf32> -> vector<1024x32xf32>
    %c0_4 = arith.constant 0 : index
    %c0_5 = arith.constant 0 : index
    %6 = vector.load %arg5[%c0_4, %c0_5] : memref<1x32xf32, #tpu.memory_space<vmem>>, vector<1x32xf32>
    %7 = vector.broadcast %6 : vector<1x32xf32> to vector<1024x32xf32>
    %8 = arith.addf %5, %7 : vector<1024x32xf32>
    %cst_6 = arith.constant 0.000000e+00 : f32
    %9 = vector.broadcast %cst_6 : f32 to vector<1024x32xf32>
    %10 = arith.maximumf %8, %9 : vector<1024x32xf32>
    %11 = vector.shape_cast %10 : vector<1024x32xf32> to vector<128x8x32xf32>
    %c0_7 = arith.constant 0 : index
    %c0_8 = arith.constant 0 : index
    %12 = vector.load %arg6[%c0_7, %c0_8] : memref<1x32xf32, #tpu.memory_space<vmem>>, vector<1x32xf32>
    %13 = vector.shape_cast %12 : vector<1x32xf32> to vector<1x1x32xf32>
    %14 = vector.broadcast %13 : vector<1x1x32xf32> to vector<128x8x32xf32>
    %15 = arith.mulf %11, %14 : vector<128x8x32xf32>
    %cst_9 = arith.constant dense<0.000000e+00> : vector<128x8xf32>
    %16 = vector.multi_reduction <add>, %15, %cst_9 [2] : vector<128x8x32xf32> to vector<128x8xf32>
    %c0_10 = arith.constant 0 : index
    %c0_11 = arith.constant 0 : index
    %17 = vector.load %arg3[%c0_10, %c0_11] : memref<128x9xf32, #tpu.memory_space<vmem>>, vector<128x8xf32>
    %c0_12 = arith.constant 0 : index
    %c8 = arith.constant 8 : index
    %18 = vector.load %arg3[%c0_12, %c8] : memref<128x9xf32, #tpu.memory_space<vmem>>, vector<128x1xf32>
    %19 = arith.mulf %16, %17 : vector<128x8xf32>
    %cst_13 = arith.constant dense<0.000000e+00> : vector<128xf32>
    %20 = vector.multi_reduction <add>, %19, %cst_13 [1] : vector<128x8xf32> to vector<128xf32>
    %21 = vector.shape_cast %20 : vector<128xf32> to vector<128x1xf32>
    %cst_14 = arith.constant dense<0.000000e+00> : vector<128xf32>
    %22 = vector.multi_reduction <add>, %17, %cst_14 [1] : vector<128x8xf32> to vector<128xf32>
    %23 = vector.shape_cast %22 : vector<128xf32> to vector<128x1xf32>
    %cst_15 = arith.constant 1.000000e+00 : f32
    %24 = vector.broadcast %cst_15 : f32 to vector<128x1xf32>
    %25 = arith.maximumf %23, %24 : vector<128x1xf32>
    %26 = tpu.reciprocal %25 {approx = true} : vector<128x1xf32> -> vector<128x1xf32>
    %27 = arith.mulf %21, %26 : vector<128x1xf32>
    %28 = vector.broadcast %0 : f32 to vector<128x1xf32>
    %29 = arith.addf %27, %28 : vector<128x1xf32>
    %30 = vector.broadcast %1 : f32 to vector<128x1xf32>
    %31 = arith.subf %18, %30 : vector<128x1xf32>
    %32 = vector.broadcast %2 : f32 to vector<128x1xf32>
    %33 = arith.divf %31, %32 : vector<128x1xf32>
    %34 = vector.broadcast %2 : f32 to vector<128x1xf32>
    %35 = arith.mulf %29, %34 : vector<128x1xf32>
    %36 = vector.broadcast %1 : f32 to vector<128x1xf32>
    %37 = arith.addf %35, %36 : vector<128x1xf32>
    %c0_16 = arith.constant 0 : index
    %c0_17 = arith.constant 0 : index
    %38 = vector.load %arg7[%c0_16, %c0_17] : memref<128x4xf32, #tpu.memory_space<vmem>>, vector<128x1xf32>
    tpu.vector_store %arg7[%c0_16, %c0_17], %29 {strides = array<i32>} : memref<128x4xf32, #tpu.memory_space<vmem>>, vector<128x1xf32>,
    %c0_18 = arith.constant 0 : index
    %c1_19 = arith.constant 1 : index
    %39 = vector.load %arg7[%c0_18, %c1_19] : memref<128x4xf32, #tpu.memory_space<vmem>>, vector<128x1xf32>
    tpu.vector_store %arg7[%c0_18, %c1_19], %37 {strides = array<i32>} : memref<128x4xf32, #tpu.memory_space<vmem>>, vector<128x1xf32>,
    %40 = arith.subf %29, %33 : vector<128x1xf32>
    %41 = math.absf %40 : vector<128x1xf32>
    %c0_20 = arith.constant 0 : index
    %c2_21 = arith.constant 2 : index
    %42 = vector.load %arg7[%c0_20, %c2_21] : memref<128x4xf32, #tpu.memory_space<vmem>>, vector<128x1xf32>
    tpu.vector_store %arg7[%c0_20, %c2_21], %41 {strides = array<i32>} : memref<128x4xf32, #tpu.memory_space<vmem>>, vector<128x1xf32>,
    %43 = arith.subf %37, %18 : vector<128x1xf32>
    %44 = math.absf %43 : vector<128x1xf32>
    %c0_22 = arith.constant 0 : index
    %c3 = arith.constant 3 : index
    %45 = vector.load %arg7[%c0_22, %c3] : memref<128x4xf32, #tpu.memory_space<vmem>>, vector<128x1xf32>
    tpu.vector_store %arg7[%c0_22, %c3], %44 {strides = array<i32>} : memref<128x4xf32, #tpu.memory_space<vmem>>, vector<128x1xf32>,
    return
  }
  func.func @transform_0(%arg0: i32) -> i32 {
    %c0_i32 = arith.constant 0 : i32
    %c0_i32_0 = arith.constant 0 : i32
    return %c0_i32 : i32
  }
  func.func @transform_1(%arg0: i32) -> (i32, i32) {
    %c0_i32 = arith.constant 0 : i32
    %c0_i32_0 = arith.constant 0 : i32
    return %arg0, %c0_i32 : i32, i32
  }
  func.func @transform_2(%arg0: i32) -> (i32, i32) {
    %c0_i32 = arith.constant 0 : i32
    %c0_i32_0 = arith.constant 0 : i32
    return %arg0, %c0_i32 : i32, i32
  }
  func.func @transform_3(%arg0: i32) -> (i32, i32) {
    %c0_i32 = arith.constant 0 : i32
    %c0_i32_0 = arith.constant 0 : i32
    %c0_i32_1 = arith.constant 0 : i32
    return %c0_i32, %c0_i32_0 : i32, i32
  }
  func.func @transform_4(%arg0: i32) -> (i32, i32) {
    %c0_i32 = arith.constant 0 : i32
    %c0_i32_0 = arith.constant 0 : i32
    %c0_i32_1 = arith.constant 0 : i32
    return %c0_i32, %c0_i32_0 : i32, i32
  }
  func.func @transform_5(%arg0: i32) -> (i32, i32) {
    %c0_i32 = arith.constant 0 : i32
    %c0_i32_0 = arith.constant 0 : i32
    %c0_i32_1 = arith.constant 0 : i32
    return %c0_i32, %c0_i32_0 : i32, i32
  }
  func.func @transform_6(%arg0: i32) -> (i32, i32) {
    %c0_i32 = arith.constant 0 : i32
    %c0_i32_0 = arith.constant 0 : i32
    return %arg0, %c0_i32 : i32, i32
  }
}

</mosaic_0001>

<bundles_post_ra>
// kernel: tpu_custom_call.1
= control target key start
LH: loop header
LB: loop body
LE: loop exit
PB: predicated region body
PF: predicated region fallthrough
CT: control target
= control target key end

     0   :  { %11 = vsyncpa [#allocation3], 0  ;;  %s5627_s21 = smov 0   ;;  %s8490_s0 = inlined_call_operand.vmem [shape: f32[3], index: 0, kind: input, shape index: {}]   ;;  %s8491_s1 = inlined_call_operand.vmem [shape: bf16[2048,16], index: 1, kind: input, shape index: {}]   ;;  %s8492_s2 = inlined_call_operand.vmem [shape: f32[256,9], index: 2, kind: input, shape index: {}]   ;;  %s8493_s3 = inlined_call_operand.vmem [shape: bf16[16,32], index: 3, kind: input, shape index: {}]   ;;  %s8494_s4 = inlined_call_operand.vmem [shape: f32[1,32], index: 4, kind: input, shape index: {}]   ;;  %s8495_s5 = inlined_call_operand.vmem [shape: f32[1,32], index: 5, kind: input, shape index: {}]   ;;  %s8496_s6 = inlined_call_operand.vmem [shape: f32[256,4], index: 6, kind: output, shape index: {}]  }
   0x1 LB: > { %s5633_s22 = sadd.s32 4294967295, %s5586_s21   ;;  %p5060_p0 = scmp.ge.s32.totalorder %s5586_s21, 1  ;;  %s5586_s21 = sphi %s5627_s21, %s17_s21  }
   0x2   : > { %p184_p1 = scmp.lt.s32.totalorder %s5586_s21, 3  ;;  %s197_s25 = sshll.u32 %s8490_s0, 4  ;;  %s198_s25 = int_to_ptr.vmem [resolvable:$true] %s197_s25 }
   0x3   : > { %p5411_p3 = scmp.eq.s32.totalorder %s5633_s22, 0  ;;  %s5561_s27 = scalar_lea.vmem %s198_s25, 16 }
   0x4   : > { %p5640_p2 = pnand %p5060_p0, %p184_p1  ;;  %p5562_p6 = scmp.ne.s32.totalorder %s198_s25, %s5561_s27 }
   0x5   : > { %p5569_p10 = scmp.lt.s32.totalorder %s198_s25, %s198_s25  ;;  %p5570_p11 = scmp.lt.s32.totalorder %s5561_s27, %s5561_s27 }
   0x6   : > { %p5407_p4 = pneg %p5640_p2 }
   0x7   : > { %p5571_p12 = por %p5570_p11, %p5569_p10 }
   0x8   : > { %p5408_p5 = pnand %p5411_p3, %p5407_p4 }
   0xa   : > { %p5563_p7 = pneg %p5408_p5 }
   0xc   : > { %p5564_p8 = pnand %p5563_p7, %p5562_p6 }
   0xe   : > { %p5565_p9 = pneg %p5564_p8 }
  0x10   : > { %p5572_p13 = pnand %p5571_p12, %p5565_p9 }
  0x12   : > { %5575 = shalt.err (!%p5572_p13)
}
  0x13   : > { %s5588_s28 = smov [#allocation2]   ;;  %237 = sbr.rel (%p5640_p2) target bundleno = 1385 (0x569), region = 44 }
  0x14   : > { %5410 = dma.vmem_to_smem (!%p5408_p5), %s198_s25, 16, %s5588_s28, [#allocation3]  }
  0x1a   : > { %5581 = dma.done.wait (%p5411_p3), [#allocation3], 16  }
  0x1b   : > { %5583 = vsyncadd (%p5411_p3), [#allocation3], 4294967280 }
  0x1c   : > { %243 = sfence }
  0x1d   : > { %v5427_v0 = vld [vmem:[%s8493_s3] sm:$0xff]   ;;  %s5065_s7 = sshll.u32 %s5633_s22, 7  ;;  %v2176_v1 = vlaneseq  ;;  %vm758_vm0 = vcmask 130048   ;;  %s5067_s12 = sshll.u32 %s5633_s22, 4  ;;  %vm1759_vm1 = vcmask 261120   ;;  %vm4354_vm2 = vcmask 1041409  }
  0x1e   : > { %p274_p0 = scmp.lt.s32.totalorder %s5065_s7, 255  ;;  %5271 = vmatprep.subr.bf16.mxu0 %v5427_v0  ;;  %5401 = vmatprep.subr.bf16.mxu1 %v5427_v0  ;;  %p280_p1 = scmp.lt.s32.totalorder %s5067_s12, 31  ;;  %vm4356_vm3 = vcmask 1042434   ;;  %vm4358_vm4 = vcmask 1043459   ;;  %vm4360_vm5 = vcmask 1044484   ;;  %vm4362_vm6 = vcmask 1045509  }
  0x1f   : > { %v5659_v2 = vshrl.u32 %v2176_v1, 7  ;;  %v3841_v3 = vand.u32 127, %v2176_v1  ;;  %5272 = vmatpush3.bf16.msra.mxu0 %v5427_v0  ;;  %5402 = vmatpush3.bf16.msra.mxu1 %v5427_v0  ;;  %vm4489_vm7 = vcmask 64512   ;;  %vm4364_vm8 = vcmask 1046534   ;;  %s5072_s26 = sld [smem:[#allocation2 + $0x2]]  ;;  %s5071_s27 = sld [smem:[#allocation2 + $0x1]] }
  0x20   : > { %s8941_s7 = smov (!%p274_p0, %s5065_s7), 255  ;;  %s8943_s12 = smov (!%p280_p1, %s5067_s12), 31  ;;  %vm4366_vm9 = vcmask 1047559   ;;  %vm4718_vm10 = vcmask 7168   ;;  %vm4735_vm11 = vcmask 15368   ;;  %vm4848_vm12 = vcmask 23568  }
  0x21   : > { %v5662_v4 = vsub.s32 %v3841_v3, %v5659_v2  ;;  %s5066_s8 = sshll.u32 %s8941_s7, 2  ;;  %s5068_s13 = sshll.u32 %s8943_s12, 3  ;;  %v5712_v22 = vsub.s32 1, %v5659_v2  ;;  %v5716_v24 = vsub.s32 0, %v5659_v2  ;;  %v5719_v25 = vsub.s32 2, %v5659_v2 }
  0x22   : > { %s5667_s11 = scalar_lea.vmem %s8491_s1, %s5066_s8  ;;  %s5709_s16 = scalar_lea.vmem %s8492_s2, %s5068_s13  ;;  %v5724_v27 = vsub.s32 4, %v5659_v2  ;;  %v5733_v31 = vsub.s32 3, %v5659_v2  ;;  %v5739_v35 = vsub.s32 6, %v5659_v2  ;;  %v5745_v39 = vsub.s32 5, %v5659_v2 }
  0x23   : > { %8524 = vst [vmem:[#allocation5_spill] sm:$0xff] %v5662_v4  ;;  %v5428_v5 = vld [vmem:[%s5667_s11] sm:$0xff]   ;;  %v5430_v7 = vld [vmem:[%s5667_s11 + $0x8] sm:$0xff]   ;;  %v5432_v9 = vld [vmem:[%s5667_s11 + $0x10] sm:$0xff]   ;;  %v5754_v42 = vsub.s32 7, %v5659_v2  ;;  %s292_s28 = sld [smem:[#allocation2]]  ;;  %s8132_s7 = scalar_lea.vmem %s8496_s6, %s5068_s13 }
  0x24   : > { %v5429_v6 = vld [vmem:[%s5667_s11 + $0x100] sm:$0xff]   ;;  %5273 = vmatprep.mubr.msk.bf16.mxu0 %vm758_vm0, %v5428_v5  ;;  %v5431_v8 = vld [vmem:[%s5667_s11 + $0x108] sm:$0xff]   ;;  %v5434_v10 = vld [vmem:[%s5667_s11 + $0x110] sm:$0xff]   ;;  %8525 = vst [vmem:[#allocation6_spill] sm:$0xff] %v5712_v22  ;;  %s5590_s8 = smov 122   ;;  %s5591_s9 = smov 123  }
  0x25   : > { %5337 = vmatprep.mubr.msk.bf16.mxu1 %vm758_vm0, %v5429_v6  ;;  %5274 = vmatmul.mubr.msk.bf16.vlgmr.msra.gmra.mrb[0].mxu0 %vm758_vm0, %v5430_v7  ;;  %v5433_v11 = vld [vmem:[%s5667_s11 + $0x18] sm:$0xff]   ;;  %v5436_v13 = vld [vmem:[%s5667_s11 + $0x20] sm:$0xff]   ;;  %v5437_v15 = vld [vmem:[%s5667_s11 + $0x28] sm:$0xff]   ;;  %8526 = vst [vmem:[#allocation7_spill] sm:$0xff] %v5716_v24  ;;  %vm4961_vm13 = vcmask 31768  }
  0x26   : > { %5338 = vmatmul.mubr.msk.bf16.vlgmr.msra.gmra.mrb[0].mxu1 %vm758_vm0, %v5431_v8  ;;  %5277 = vmatprep.mubr.msk.bf16.mxu0 %vm758_vm0, %v5432_v9  ;;  %v5435_v12 = vld [vmem:[%s5667_s11 + $0x118] sm:$0xff]   ;;  %v5438_v14 = vld [vmem:[%s5667_s11 + $0x120] sm:$0xff]   ;;  %v5439_v16 = vld [vmem:[%s5667_s11 + $0x128] sm:$0xff]   ;;  %8527 = vst [vmem:[#allocation8_spill] sm:$0xff] %v5719_v25 }
  0x27   : > { %5341 = vmatprep.mubr.msk.bf16.mxu1 %vm758_vm0, %v5434_v10  ;;  %v5440_v17 = vld [vmem:[%s5667_s11 + $0x30] sm:$0xff]   ;;  %v5441_v19 = vld [vmem:[%s5667_s11 + $0x38] sm:$0xff]   ;;  %v5444_v21 = vld [vmem:[%s5667_s11 + $0x40] sm:$0xff]   ;;  %8528 = vst [vmem:[#allocation9_spill] sm:$0xff] %v5724_v27 }
  0x28   : > { %v5442_v18 = vld [vmem:[%s5667_s11 + $0x130] sm:$0xff]   ;;  %v5443_v20 = vld [vmem:[%s5667_s11 + $0x138] sm:$0xff]   ;;  %v5446_v23 = vld [vmem:[%s5667_s11 + $0x140] sm:$0xff]   ;;  %8529 = vst [vmem:[#allocation10_spill] sm:$0xff] %v5733_v31 }
  0x29   : > { %v2144_v26 = vld [vmem:[%s5709_s16] sm:$0xff]  ;;  %v5445_v32 = vld [vmem:[%s5667_s11 + $0x48] sm:$0xff]   ;;  %8530 = vst [vmem:[#allocation11_spill] sm:$0xff] %v5739_v35  ;;  %v5448_v36 = vld [vmem:[%s5667_s11 + $0x50] sm:$0xff]  }
  0x2a   : > { %v2186_v28 = vrot.slane %v2144_v26, %v5712_v22  ;;  %v2179_v29 = vrot.slane %v2144_v26, %v5716_v24  ;;  %v2193_v30 = vrot.slane %v2144_v26, %v5719_v25  ;;  %v5447_v33 = vld [vmem:[%s5667_s11 + $0x148] sm:$0xff]   ;;  %v2207_v34 = vrot.slane %v2144_v26, %v5724_v27  ;;  %v5450_v37 = vld [vmem:[%s5667_s11 + $0x150] sm:$0xff]   ;;  %8531 = vst [vmem:[#allocation12_spill] sm:$0xff] %v5745_v39  ;;  %v5449_v41 = vld [vmem:[%s5667_s11 + $0x58] sm:$0xff]  }
  0x2b   : > { %v2200_v38 = vrot.slane %v2144_v26, %v5733_v31  ;;  %v2221_v40 = vrot.slane %v2144_v26, %v5739_v35  ;;  %8532 = vst [vmem:[#allocation13_spill] sm:$0xff] %v5754_v42  ;;  %v2214_v43 = vrot.slane %v2144_v26, %v5745_v39  ;;  %v2145_v44 = vld [vmem:[%s5709_s16 + $0x8] sm:$0xff]  ;;  %v5451_v45 = vld [vmem:[%s5667_s11 + $0x158] sm:$0xff]   ;;  %v5452_v47 = vld [vmem:[%s5667_s11 + $0x60] sm:$0xff]   ;;  %v2228_v49 = vrot.slane %v2144_v26, %v5754_v42 }
  0x2c   : > { %2188 = vbcast.lane.b32.xlu1 %v2186_v28, 256  ;;  %2181 = vbcast.lane.b32.xlu0 %v2179_v29, 256  ;;  %v2235_v46 = vrot.slane %v2145_v44, %v5716_v24  ;;  %v5454_v48 = vld [vmem:[%s5667_s11 + $0x160] sm:$0xff]   ;;  %v2249_v50 = vrot.slane %v2145_v44, %v5719_v25  ;;  %v2242_v51 = vrot.slane %v2145_v44, %v5712_v22  ;;  %v5453_v52 = vld [vmem:[%s5667_s11 + $0x68] sm:$0xff]   ;;  %v5456_v55 = vld [vmem:[%s5667_s11 + $0x70] sm:$0xff]  }
  0x2d   : > { %5278 = vmatmul.mubr.msk.bf16.gmra.mrb[4].mxu0 %vm758_vm0, %v5433_v11  ;;  %v2263_v53 = vrot.slane %v2145_v44, %v5724_v27  ;;  %v5455_v54 = vld [vmem:[%s5667_s11 + $0x168] sm:$0xff]   ;;  %v5458_v56 = vld [vmem:[%s5667_s11 + $0x170] sm:$0xff]   ;;  %v2256_v57 = vrot.slane %v2145_v44, %v5733_v31  ;;  %v2277_v58 = vrot.slane %v2145_v44, %v5739_v35  ;;  %v5457_v59 = vld [vmem:[%s5667_s11 + $0x78] sm:$0xff]   ;;  %v2270_v61 = vrot.slane %v2145_v44, %v5745_v39 }
  0x2e   : > { %5342 = vmatmul.mubr.msk.bf16.gmra.mrb[4].mxu1 %vm758_vm0, %v5435_v12  ;;  %5281 = vmatprep.mubr.msk.bf16.mxu0 %vm758_vm0, %v5436_v13  ;;  %v5459_v60 = vld [vmem:[%s5667_s11 + $0x178] sm:$0xff]   ;;  %v2146_v62 = vld [vmem:[%s5709_s16 + $0x10] sm:$0xff]  ;;  %v5460_v63 = vld [vmem:[%s5667_s11 + $0x80] sm:$0xff]   ;;  %v2284_v2 = vrot.slane %v2145_v44, %v5754_v42 }
  0x2f   : > { %5345 = vmatprep.mubr.msk.bf16.mxu1 %vm758_vm0, %v5438_v14  ;;  %v2291_v0 = vrot.slane %v2146_v62, %v5716_v24  ;;  %v5462_v1 = vld [vmem:[%s5667_s11 + $0x180] sm:$0xff]   ;;  %v2305_v3 = vrot.slane %v2146_v62, %v5719_v25  ;;  %v2298_v5 = vrot.slane %v2146_v62, %v5712_v22  ;;  %v5461_v6 = vld [vmem:[%s5667_s11 + $0x88] sm:$0xff]   ;;  %v2319_v7 = vrot.slane %v2146_v62, %v5724_v27  ;;  %v5464_v9 = vld [vmem:[%s5667_s11 + $0x90] sm:$0xff]  }
  0x30   : > { %2195 = vbcast.lane.b32.xlu1 %v2193_v30, 256  ;;  %2209 = vbcast.lane.b32.xlu0 %v2207_v34, 256  ;;  %v5463_v8 = vld [vmem:[%s5667_s11 + $0x188] sm:$0xff]   ;;  %v5466_v10 = vld [vmem:[%s5667_s11 + $0x190] sm:$0xff]   ;;  %v2312_v11 = vrot.slane %v2146_v62, %v5733_v31  ;;  %v2333_v12 = vrot.slane %v2146_v62, %v5739_v35  ;;  %v2326_v13 = vrot.slane %v2146_v62, %v5745_v39  ;;  %v2147_v14 = vld [vmem:[%s5709_s16 + $0x18] sm:$0xff] }
  0x31   : > { %v5469_v26 = vld [vmem:[%s5667_s11 + $0xa8] sm:$0xff]   ;;  %v2375_v28 = vrot.slane %v2147_v14, %v5724_v27  ;;  %v5472_v30 = vld [vmem:[%s5667_s11 + $0xb0] sm:$0xff]   ;;  %v2389_v34 = vrot.slane %v2147_v14, %v5739_v35  ;;  %v5478_v44 = vld [vmem:[%s5667_s11 + $0x1c0] sm:$0xff]  }
  0x32   : > { %v5471_v29 = vld [vmem:[%s5667_s11 + $0x1a8] sm:$0xff]  }
  0x34   : > { %2202 = vbcast.lane.b32.xlu1 %v2200_v38, 256  ;;  %2223 = vbcast.lane.b32.xlu0 %v2221_v40, 256  ;;  %v5473_v40 = vld [vmem:[%s5667_s11 + $0xb8] sm:$0xff]  }
  0x35   : > { %5282 = vmatmul.mubr.msk.bf16.gmra.mrb[8].mxu0 %vm758_vm0, %v5437_v15  ;;  %v5465_v15 = vld [vmem:[%s5667_s11 + $0x98] sm:$0xff]  }
  0x36   : > { %5346 = vmatmul.mubr.msk.bf16.gmra.mrb[8].mxu1 %vm758_vm0, %v5439_v16  ;;  %5285 = vmatprep.mubr.msk.bf16.mxu0 %vm758_vm0, %v5440_v17  ;;  %v2347_v16 = vrot.slane %v2147_v14, %v5716_v24  ;;  %v5467_v17 = vld [vmem:[%s5667_s11 + $0x198] sm:$0xff]  }
  0x37   : > { %5349 = vmatprep.mubr.msk.bf16.mxu1 %vm758_vm0, %v5442_v18  ;;  %v5468_v18 = vld [vmem:[%s5667_s11 + $0xa0] sm:$0xff]  }
  0x38   : > { %2216 = vbcast.lane.b32.xlu1 %v2214_v43, 256  ;;  %2237 = vbcast.lane.b32.xlu0 %v2235_v46, 256  ;;  %v5476_v43 = vld [vmem:[%s5667_s11 + $0xc0] sm:$0xff]  }
  0x3c   : > { %2230 = vbcast.lane.b32.xlu1 %v2228_v49, 256  ;;  %2251 = vbcast.lane.b32.xlu0 %v2249_v50, 256  ;;  %v5477_v49 = vld [vmem:[%s5667_s11 + $0xc8] sm:$0xff]  }
  0x3d   : > { %5286 = vmatmul.mubr.msk.bf16.gmra.mrb[12].mxu0 %vm758_vm0, %v5441_v19  ;;  %v5470_v19 = vld [vmem:[%s5667_s11 + $0x1a0] sm:$0xff]   ;;  %v5479_v50 = vld [vmem:[%s5667_s11 + $0x1c8] sm:$0xff]  }
  0x3e   : > { %5350 = vmatmul.mubr.msk.bf16.gmra.mrb[12].mxu1 %vm758_vm0, %v5443_v20  ;;  %5289 = vmatprep.mubr.msk.bf16.mxu0 %vm758_vm0, %v5444_v21  ;;  %v2340_v20 = vrot.slane %v2146_v62, %v5754_v42  ;;  %v2361_v21 = vrot.slane %v2147_v14, %v5719_v25 }
  0x3f   : > { %5353 = vmatprep.mubr.msk.bf16.mxu1 %vm758_vm0, %v5446_v23  ;;  %v2354_v23 = vrot.slane %v2147_v14, %v5712_v22 }
  0x40   : > { %2244 = vbcast.lane.b32.xlu1 %v2242_v51, 256  ;;  %2265 = vbcast.lane.b32.xlu0 %v2263_v53, 256  ;;  %v5480_v51 = vld [vmem:[%s5667_s11 + $0xd0] sm:$0xff]  }
  0x44   : > { %2258 = vbcast.lane.b32.xlu1 %v2256_v57, 256  ;;  %2279 = vbcast.lane.b32.xlu0 %v2277_v58, 256  ;;  %v5481_v58 = vld [vmem:[%s5667_s11 + $0xd8] sm:$0xff]  }
  0x45   : > { %5290 = vmatmul.mubr.msk.bf16.gmra.mrb[16].mxu0 %vm758_vm0, %v5445_v32  ;;  %v5474_v32 = vld [vmem:[%s5667_s11 + $0x1b0] sm:$0xff]  }
  0x46   : > { %5354 = vmatmul.mubr.msk.bf16.gmra.mrb[16].mxu1 %vm758_vm0, %v5447_v33  ;;  %5293 = vmatprep.mubr.msk.bf16.mxu0 %vm758_vm0, %v5448_v36  ;;  %v2368_v33 = vrot.slane %v2147_v14, %v5733_v31  ;;  %v2382_v36 = vrot.slane %v2147_v14, %v5745_v39 }
  0x47   : > { %5357 = vmatprep.mubr.msk.bf16.mxu1 %vm758_vm0, %v5450_v37  ;;  %v2148_v37 = vld [vmem:[%s5709_s16 + $0x20] sm:$0xff] }
  0x48   : > { %2272 = vbcast.lane.b32.xlu1 %v2270_v61, 256  ;;  %2293 = vbcast.lane.b32.xlu0 %v2291_v0, 256  ;;  %v2403_v38 = vrot.slane %v2148_v37, %v5716_v24  ;;  %v2417_v46 = vrot.slane %v2148_v37, %v5719_v25  ;;  %v2424_v53 = vrot.slane %v2148_v37, %v5733_v31  ;;  %v5486_v61 = vld [vmem:[%s5667_s11 + $0x1e0] sm:$0xff]   ;;  %v5485_v0 = vld [vmem:[%s5667_s11 + $0xe8] sm:$0xff]  }
  0x49   : > { %v2452_v62 = vrot.slane %v2148_v37, %v5754_v42 }
  0x4c   : > { %2286 = vbcast.lane.b32.xlu1 %v2284_v2, 256  ;;  %2307 = vbcast.lane.b32.xlu0 %v2305_v3, 256  ;;  %v5488_v2 = vld [vmem:[%s5667_s11 + $0xf0] sm:$0xff]  }
  0x4d   : > { %5294 = vmatmul.mubr.msk.bf16.gmra.mrb[20].mxu0 %vm758_vm0, %v5449_v41  ;;  %v5475_v41 = vld [vmem:[%s5667_s11 + $0x1b8] sm:$0xff]   ;;  %v5490_v3 = vld [vmem:[%s5667_s11 + $0x1f0] sm:$0xff]  }
  0x4e   : > { %5358 = vmatmul.mubr.msk.bf16.gmra.mrb[20].mxu1 %vm758_vm0, %v5451_v45  ;;  %5297 = vmatprep.mubr.msk.bf16.mxu0 %vm758_vm0, %v5452_v47  ;;  %v2396_v45 = vrot.slane %v2147_v14, %v5754_v42  ;;  %v2410_v47 = vrot.slane %v2148_v37, %v5712_v22 }
  0x4f   : > { %5361 = vmatprep.mubr.msk.bf16.mxu1 %vm758_vm0, %v5454_v48  ;;  %v2431_v48 = vrot.slane %v2148_v37, %v5724_v27 }
  0x50   : > { %2300 = vbcast.lane.b32.xlu1 %v2298_v5, 256  ;;  %2321 = vbcast.lane.b32.xlu0 %v2319_v7, 256  ;;  %v5489_v5 = vld [vmem:[%s5667_s11 + $0xf8] sm:$0xff]  }
  0x54   : > { %2314 = vbcast.lane.b32.xlu1 %v2312_v11, 256  ;;  %2335 = vbcast.lane.b32.xlu0 %v2333_v12, 256 }
  0x55   : > { %5298 = vmatmul.mubr.msk.bf16.gmra.mrb[24].mxu0 %vm758_vm0, %v5453_v52  ;;  %v5482_v52 = vld [vmem:[%s5667_s11 + $0x1d0] sm:$0xff]  }
  0x56   : > { %5362 = vmatmul.mubr.msk.bf16.gmra.mrb[24].mxu1 %vm758_vm0, %v5455_v54  ;;  %5301 = vmatprep.mubr.msk.bf16.mxu0 %vm758_vm0, %v5456_v55  ;;  %v2445_v54 = vrot.slane %v2148_v37, %v5739_v35  ;;  %v2438_v55 = vrot.slane %v2148_v37, %v5745_v39 }
  0x57   : > { %5365 = vmatprep.mubr.msk.bf16.mxu1 %vm758_vm0, %v5458_v56  ;;  %v2149_v56 = vld [vmem:[%s5709_s16 + $0x28] sm:$0xff] }
  0x58   : > { %2328 = vbcast.lane.b32.xlu1 %v2326_v13, 256  ;;  %2349 = vbcast.lane.b32.xlu0 %v2347_v16, 256  ;;  %v2459_v57 = vrot.slane %v2149_v56, %v5716_v24 }
  0x5c   : > { %2342 = vbcast.lane.b32.xlu1 %v2340_v20, 256  ;;  %2363 = vbcast.lane.b32.xlu0 %v2361_v21, 256  ;;  %v5899_v20 = vld [vmem:[%s8495_s5] ss:$0 sm:$0xff] }
  0x5d   : > { %5302 = vmatmul.mubr.msk.bf16.gmra.mrb[28].mxu0 %vm758_vm0, %v5457_v59  ;;  %v5483_v59 = vld [vmem:[%s5667_s11 + $0x1d8] sm:$0xff]  }
  0x5e   : > { %5366 = vmatmul.mubr.msk.bf16.gmra.mrb[28].mxu1 %vm758_vm0, %v5459_v60  ;;  %5305 = vmatprep.mubr.msk.bf16.mxu0 %vm758_vm0, %v5460_v63  ;;  %v5484_v60 = vld [vmem:[%s5667_s11 + $0xe0] sm:$0xff]   ;;  %v2466_v63 = vrot.slane %v2149_v56, %v5712_v22 }
  0x5f   : > { %5369 = vmatprep.mubr.msk.bf16.mxu1 %vm758_vm0, %v5462_v1  ;;  %v5487_v1 = vld [vmem:[%s5667_s11 + $0x1e8] sm:$0xff]  }
  0x60   : > { %2356 = vbcast.lane.b32.xlu1 %v2354_v23, 256  ;;  %2377 = vbcast.lane.b32.xlu0 %v2375_v28, 256 }
  0x64   : > { %2370 = vbcast.lane.b32.xlu1 %v2368_v33, 256  ;;  %2391 = vbcast.lane.b32.xlu0 %v2389_v34, 256 }
  0x65   : > { %5306 = vmatmul.mubr.msk.bf16.gmra.mrb[32].mxu0 %vm758_vm0, %v5461_v6  ;;  %v5491_v6 = vld [vmem:[%s5667_s11 + $0x1f8] sm:$0xff]  }
  0x66   : > { %5370 = vmatmul.mubr.msk.bf16.gmra.mrb[32].mxu1 %vm758_vm0, %v5463_v8  ;;  %5309 = vmatprep.mubr.msk.bf16.mxu0 %vm758_vm0, %v5464_v9  ;;  %v5887_v9 = vld [vmem:[%s8494_s4] ss:$0 sm:$0xff] }
  0x67   : > { %5373 = vmatprep.mubr.msk.bf16.mxu1 %vm758_vm0, %v5466_v10 }
  0x68   : > { %2384 = vbcast.lane.b32.xlu1 %v2382_v36, 256  ;;  %2405 = vbcast.lane.b32.xlu0 %v2403_v38, 256 }
  0x6c   : > { %2398 = vbcast.lane.b32.xlu1 %v2396_v45, 256  ;;  %2419 = vbcast.lane.b32.xlu0 %v2417_v46, 256 }
  0x6d   : > { %5310 = vmatmul.mubr.msk.bf16.gmra.mrb[36].mxu0 %vm758_vm0, %v5465_v15 }
  0x6e   : > { %5374 = vmatmul.mubr.msk.bf16.gmra.mrb[36].mxu1 %vm758_vm0, %v5467_v17  ;;  %5313 = vmatprep.mubr.msk.bf16.mxu0 %vm758_vm0, %v5468_v18 }
  0x6f   : > { %5377 = vmatprep.mubr.msk.bf16.mxu1 %vm758_vm0, %v5470_v19 }
  0x70   : > { %2412 = vbcast.lane.b32.xlu1 %v2410_v47, 256  ;;  %2433 = vbcast.lane.b32.xlu0 %v2431_v48, 256 }
  0x74   : > { %2426 = vbcast.lane.b32.xlu1 %v2424_v53, 256  ;;  %2447 = vbcast.lane.b32.xlu0 %v2445_v54, 256 }
  0x75   : > { %5314 = vmatmul.mubr.msk.bf16.gmra.mrb[40].mxu0 %vm758_vm0, %v5469_v26 }
  0x76   : > { %5378 = vmatmul.mubr.msk.bf16.gmra.mrb[40].mxu1 %vm758_vm0, %v5471_v29  ;;  %5317 = vmatprep.mubr.msk.bf16.mxu0 %vm758_vm0, %v5472_v30 }
  0x77   : > { %5381 = vmatprep.mubr.msk.bf16.mxu1 %vm758_vm0, %v5474_v32 }
  0x78   : > { %2440 = vbcast.lane.b32.xlu1 %v2438_v55, 256  ;;  %2461 = vbcast.lane.b32.xlu0 %v2459_v57, 256 }
  0x7c   : > { %2454 = vbcast.lane.b32.xlu1 %v2452_v62, 256 }
  0x7d   : > { %5318 = vmatmul.mubr.msk.bf16.gmra.mrb[44].mxu0 %vm758_vm0, %v5473_v40 }
  0x7e   : > { %5382 = vmatmul.mubr.msk.bf16.gmra.mrb[44].mxu1 %vm758_vm0, %v5475_v41  ;;  %5321 = vmatprep.mubr.msk.bf16.mxu0 %vm758_vm0, %v5476_v43 }
  0x7f   : > { %5385 = vmatprep.mubr.msk.bf16.mxu1 %vm758_vm0, %v5478_v44 }
  0x80   : > { %2468 = vbcast.lane.b32.xlu1 %v2466_v63, 256 }
  0x85   : > { %5322 = vmatmul.mubr.msk.bf16.gmra.mrb[48].mxu0 %vm758_vm0, %v5477_v49 }
  0x86   : > { %5386 = vmatmul.mubr.msk.bf16.gmra.mrb[48].mxu1 %vm758_vm0, %v5479_v50  ;;  %5325 = vmatprep.mubr.msk.bf16.mxu0 %vm758_vm0, %v5480_v51 }
  0x87   : > { %5389 = vmatprep.mubr.msk.bf16.mxu1 %vm758_vm0, %v5482_v52 }
  0x8d   : > { %5326 = vmatmul.mubr.msk.bf16.gmra.mrb[52].mxu0 %vm758_vm0, %v5481_v58 }
  0x8e   : > { %5390 = vmatmul.mubr.msk.bf16.gmra.mrb[52].mxu1 %vm758_vm0, %v5483_v59  ;;  %5329 = vmatprep.mubr.msk.bf16.mxu0 %vm758_vm0, %v5484_v60 }
  0x8f   : > { %5393 = vmatprep.mubr.msk.bf16.mxu1 %vm758_vm0, %v5486_v61 }
  0x95   : > { %5330 = vmatmul.mubr.msk.bf16.gmra.mrb[56].mxu0 %vm758_vm0, %v5485_v0 }
  0x96   : > { %5394 = vmatmul.mubr.msk.bf16.gmra.mrb[56].mxu1 %vm758_vm0, %v5487_v1  ;;  %5333 = vmatprep.mubr.msk.bf16.mxu0 %vm758_vm0, %v5488_v2 }
  0x97   : > { %5397 = vmatprep.mubr.msk.bf16.mxu1 %vm758_vm0, %v5490_v3 }
  0x9d   : > { %5334 = vmatmul.mubr.msk.bf16.gmra.mrb[60].mxu0 %vm758_vm0, %v5489_v5 }
  0x9e   : > { %5398 = vmatmul.mubr.msk.bf16.gmra.mrb[60].mxu1 %vm758_vm0, %v5491_v6  ;;  %v5880_v7 = vpop.permute.xlu1 %2188  ;;  %v5889_v10 = vpop.permute.xlu0 %2181 }
  0x9f   : > { %8533 = vst [vmem:[#allocation14_spill] sm:$0xff] %v5880_v7  ;;  %8535 = vst [vmem:[#allocation16_spill] sm:$0xff] %v5889_v10 }
  0xa2   : > { %v5882_v8 = vpop.permute.xlu1 %2195  ;;  %v5910_v46 = vpop.permute.xlu0 %2209 }
  0xa3   : > { %8534 = vst [vmem:[#allocation15_spill] sm:$0xff] %v5882_v8  ;;  %8537 = vst [vmem:[#allocation18_spill] sm:$0xff] %v5910_v46 }
  0xa6   : > { %v5891_v12 = vpop.permute.xlu1 %2202 }
  0xa7   : > { %8536 = vst [vmem:[#allocation17_spill] sm:$0xff] %v5891_v12 }
  0xaa   : > { %v5914_v51 = vpop.permute.xlu1 %2216 }
  0xab   : > { %8538 = vst [vmem:[#allocation19_spill] sm:$0xff] %v5914_v51 }
  0xf8   : > { %v5275_v11 = vpop.f32.mrb[0].mxu0 }
  0xf9   : > { %v994_v13 = vadd.f32 %v5275_v11, %v5887_v9  ;;  %v5339_v14 = vpop.f32.mrb[0].mxu1  ;;  %v985_v15 = vpop.f32.mrb[1].mxu0 }
  0xfa   : > { %v1250_v16 = vadd.f32 %v5339_v14, %v5887_v9  ;;  %v986_v17 = vadd.f32 %v5887_v9, %v985_v15  ;;  %v1241_v18 = vpop.f32.mrb[1].mxu1  ;;  %v5276_v19 = vpop.f32.mrb[2].mxu0 }
  0xfb   : > { %v1498_v21 = vmax.f32 %v994_v13, 0.0  ;;  %v997_v23 = vadd.f32 %v5276_v19, %v5887_v9  ;;  %v5340_v26 = vpop.f32.mrb[2].mxu1  ;;  %v988_v28 = vpop.f32.mrb[3].mxu0  ;;  %v1242_v32 = vadd.f32 %v5887_v9, %v1241_v18 }
  0xfc   : > { %v1562_v29 = vmax.f32 %v1250_v16, 0.0  ;;  %v1496_v30 = vmax.f32 %v986_v17, 0.0  ;;  %v1253_v33 = vadd.f32 %v5340_v26, %v5887_v9  ;;  %v1244_v34 = vpop.f32.mrb[3].mxu1  ;;  %v989_v48 = vadd.f32 %v5887_v9, %v988_v28  ;;  %v5926_v15 = vpop.permute.xlu0 %2223 }
  0xfd   : > { %v1499_v36 = vmax.f32 %v997_v23, 0.0  ;;  %v1633_v37 = vmul.f32 %v5899_v20, %v1498_v21  ;;  %v1245_v43 = vadd.f32 %v5887_v9, %v1244_v34  ;;  %v1560_v47 = vmax.f32 %v1242_v32, 0.0  ;;  %8539 = vst [vmem:[#allocation20_spill] sm:$0xff] %v5926_v15  ;;  %v5930_v18 = vpop.permute.xlu1 %2230 }
  0xfe   : > { %v1697_v38 = vmul.f32 %v5899_v20, %v1562_v29  ;;  %v1631_v40 = vmul.f32 %v5899_v20, %v1496_v30  ;;  %v1563_v41 = vmax.f32 %v1253_v33, 0.0  ;;  %v1497_v0 = vmax.f32 %v989_v48, 0.0  ;;  %8540 = vst [vmem:[#allocation21_spill] sm:$0xff] %v5930_v18 }
  0xff   : > { %v1766_v44 = vsel %vm1759_vm1, %v1633_v37, 0.0  ;;  %v1634_v45 = vmul.f32 %v5899_v20, %v1499_v36  ;;  %v1561_v59 = vmax.f32 %v1245_v43, 0.0  ;;  %v1695_v1 = vmul.f32 %v5899_v20, %v1560_v47 }
 0x100   : > { %v1958_v49 = vsel %vm1759_vm1, %v1697_v38, 0.0  ;;  %1767 = vadd.xlane.f32.xlu1 %v1766_v44  ;;  %v5279_v50 = vpop.f32.mrb[4].mxu0  ;;  %v1760_v55 = vsel %vm1759_vm1, %v1631_v40, 0.0  ;;  %v1698_v61 = vmul.f32 %v5899_v20, %v1563_v41  ;;  %v1632_v17 = vmul.f32 %v5899_v20, %v1497_v0 }
 0x101   : > { %1959 = vadd.xlane.f32.xlu0 %v1958_v49  ;;  %v1769_v52 = vsel %vm1759_vm1, %v1634_v45, 0.0  ;;  %v1001_v53 = vpop.f32.mrb[5].mxu0  ;;  %v5343_v54 = vpop.f32.mrb[4].mxu1  ;;  %v1010_v56 = vadd.f32 %v5279_v50, %v5887_v9  ;;  %v1696_v14 = vmul.f32 %v5899_v20, %v1561_v59  ;;  %v1952_v16 = vsel %vm1759_vm1, %v1695_v1, 0.0 }
 0x102   : > { %v5280_v57 = vpop.f32.mrb[6].mxu0  ;;  %v1257_v58 = vpop.f32.mrb[5].mxu1  ;;  %v1266_v11 = vadd.f32 %v5343_v54, %v5887_v9  ;;  %v1961_v13 = vsel %vm1759_vm1, %v1698_v61, 0.0  ;;  %v1002_v40 = vadd.f32 %v5887_v9, %v1001_v53  ;;  %v1763_v41 = vsel %vm1759_vm1, %v1632_v17, 0.0 }
 0x103   : > { %v1013_v60 = vadd.f32 %v5280_v57, %v5887_v9  ;;  %v1004_v62 = vpop.f32.mrb[7].mxu0  ;;  %v5344_v63 = vpop.f32.mrb[6].mxu1  ;;  %v1502_v6 = vmax.f32 %v1010_v56, 0.0  ;;  %v1955_v36 = vsel %vm1759_vm1, %v1696_v14, 0.0  ;;  %v1258_v54 = vadd.f32 %v5887_v9, %v1257_v58 }
 0x104   : > { %1770 = vadd.xlane.f32.xlu1 %v1769_v52  ;;  %v1260_v2 = vpop.f32.mrb[7].mxu1  ;;  %v1269_v5 = vadd.f32 %v5344_v63, %v5887_v9  ;;  %v1566_v29 = vmax.f32 %v1266_v11, 0.0  ;;  %v1005_v34 = vadd.f32 %v5887_v9, %v1004_v62  ;;  %v5949_v52 = vpop.permute.xlu0 %2237  ;;  %v1500_v53 = vmax.f32 %v1002_v40, 0.0 }
 0x105   : > { %1761 = vadd.xlane.f32.xlu0 %v1760_v55  ;;  %v1503_v3 = vmax.f32 %v1013_v60, 0.0  ;;  %v1637_v30 = vmul.f32 %v5899_v20, %v1502_v6  ;;  %v1261_v50 = vadd.f32 %v5887_v9, %v1260_v2  ;;  %8541 = vst [vmem:[#allocation22_spill] sm:$0xff] %v5949_v52  ;;  %v5952_v55 = vpop.permute.xlu1 %2244  ;;  %v1564_v6 = vmax.f32 %v1258_v54, 0.0 }
 0x106   : > { %v1567_v21 = vmax.f32 %v1269_v5, 0.0  ;;  %v1701_v48 = vmul.f32 %v5899_v20, %v1566_v29  ;;  %v1501_v49 = vmax.f32 %v1005_v34, 0.0  ;;  %8542 = vst [vmem:[#allocation23_spill] sm:$0xff] %v5952_v55  ;;  %v1635_v11 = vmul.f32 %v5899_v20, %v1500_v53 }
 0x107   : > { %v1638_v23 = vmul.f32 %v5899_v20, %v1503_v3  ;;  %v1778_v47 = vsel %vm1759_vm1, %v1637_v30, 0.0  ;;  %v1565_v1 = vmax.f32 %v1261_v50, 0.0  ;;  %v1699_v34 = vmul.f32 %v5899_v20, %v1564_v6 }
 0x108   : > { %1962 = vadd.xlane.f32.xlu1 %v1961_v13  ;;  %v5283_v19 = vpop.f32.mrb[8].mxu0  ;;  %v1702_v45 = vmul.f32 %v5899_v20, %v1567_v21  ;;  %v1970_v62 = vsel %vm1759_vm1, %v1701_v48, 0.0  ;;  %v1636_v2 = vmul.f32 %v5899_v20, %v1501_v49  ;;  %v5976_v21 = vpop.permute.xlu0 %2251 }
 0x109   : > { %1953 = vadd.xlane.f32.xlu0 %v1952_v16  ;;  %v5933_v26 = vpop.f32.mrb[9].mxu0  ;;  %v5347_v28 = vpop.f32.mrb[8].mxu1  ;;  %v1781_v44 = vsel %vm1759_vm1, %v1638_v23, 0.0  ;;  %v1026_v63 = vadd.f32 %v5283_v19, %v5887_v9  ;;  %8543 = vst [vmem:[#allocation24_spill] sm:$0xff] %v5976_v21  ;;  %v1700_v29 = vmul.f32 %v5899_v20, %v1565_v1 }
 0x10a   : > { %v5284_v32 = vpop.f32.mrb[10].mxu0  ;;  %v5936_v33 = vpop.f32.mrb[9].mxu1  ;;  %v1973_v57 = vsel %vm1759_vm1, %v1702_v45, 0.0  ;;  %v1282_v19 = vadd.f32 %v5347_v28, %v5887_v9  ;;  %v1775_v23 = vsel %vm1759_vm1, %v1636_v2, 0.0 }
 0x10b   : > { %v1020_v37 = vpop.f32.mrb[11].mxu0  ;;  %v5348_v38 = vpop.f32.mrb[10].mxu1  ;;  %v1029_v59 = vadd.f32 %v5284_v32, %v5887_v9  ;;  %v1506_v17 = vmax.f32 %v1026_v63, 0.0  ;;  %v1772_v32 = vsel %vm1759_vm1, %v1635_v11, 0.0  ;;  %v1967_v50 = vsel %vm1759_vm1, %v1700_v29, 0.0 }
 0x10c   : > { %1956 = vadd.xlane.f32.xlu1 %v1955_v36  ;;  %v5942_v43 = vpop.f32.mrb[11].mxu1  ;;  %v1285_v16 = vadd.f32 %v5348_v38, %v5887_v9  ;;  %v5980_v30 = vpop.permute.xlu1 %2258  ;;  %v1021_v49 = vadd.f32 %v5887_v9, %v1020_v37 }
 0x10d   : > { %1764 = vadd.xlane.f32.xlu0 %v1763_v41  ;;  %v1507_v14 = vmax.f32 %v1029_v59, 0.0  ;;  %8544 = vst [vmem:[#allocation25_spill] sm:$0xff] %v5980_v30  ;;  %v1641_v45 = vmul.f32 %v5899_v20, %v1506_v17  ;;  %v1964_v59 = vsel %vm1759_vm1, %v1699_v34, 0.0  ;;  %v6011_v11 = vpop.permute.xlu0 %2265  ;;  %v1274_v17 = vadd.f32 %v5887_v9, %v5936_v33 }
 0x10e   : > { %v1571_v38 = vmax.f32 %v1285_v16, 0.0  ;;  %v1505_v6 = vmax.f32 %v1021_v49, 0.0  ;;  %8545 = vst [vmem:[#allocation26_spill] sm:$0xff] %v6011_v11 }
 0x10f   : > { %v1642_v40 = vmul.f32 %v5899_v20, %v1507_v14  ;;  %v1790_v37 = vsel %vm1759_vm1, %v1641_v45, 0.0 }
 0x110   : > { %1782 = vadd.xlane.f32.xlu1 %v1781_v44  ;;  %v5954_v56 = vpop.f32.mrb[12].mxu0  ;;  %v1570_v44 = vmax.f32 %v1282_v19, 0.0  ;;  %v1706_v1 = vmul.f32 %v5899_v20, %v1571_v38  ;;  %v6015_v16 = vpop.permute.xlu1 %2272  ;;  %v1640_v45 = vmul.f32 %v5899_v20, %v1505_v6 }
 0x111   : > { %1779 = vadd.xlane.f32.xlu0 %v1778_v47  ;;  %v5958_v60 = vpop.f32.mrb[13].mxu0  ;;  %v5960_v61 = vpop.f32.mrb[12].mxu1  ;;  %v1793_v63 = vsel %vm1759_vm1, %v1642_v40, 0.0  ;;  %8546 = vst [vmem:[#allocation27_spill] sm:$0xff] %v6015_v16  ;;  %v1042_v38 = vadd.f32 %v5954_v56, %v5887_v9 }
 0x112   : > { %v5288_v0 = vpop.f32.mrb[14].mxu0  ;;  %v5964_v58 = vpop.f32.mrb[13].mxu1  ;;  %v1705_v2 = vmul.f32 %v5899_v20, %v1570_v44  ;;  %v1787_v6 = vsel %vm1759_vm1, %v1640_v45, 0.0 }
 0x113   : > { %v5967_v3 = vpop.f32.mrb[15].mxu0  ;;  %v5969_v5 = vpop.f32.mrb[14].mxu1  ;;  %v1045_v29 = vadd.f32 %v5288_v0, %v5887_v9  ;;  %v1568_v0 = vmax.f32 %v1274_v17, 0.0 }
 0x114   : > { %1974 = vadd.xlane.f32.xlu1 %v1973_v57  ;;  %v5972_v13 = vpop.f32.mrb[15].mxu1  ;;  %v1018_v57 = vadd.f32 %v5887_v9, %v5933_v26  ;;  %v1277_v26 = vadd.f32 %v5887_v9, %v5942_v43  ;;  %v1982_v43 = vsel %vm1759_vm1, %v1705_v2, 0.0  ;;  %v1301_v56 = vadd.f32 %v5969_v5, %v5887_v9  ;;  %v6046_v2 = vpop.permute.xlu0 %2279 }
 0x115   : > { %1971 = vadd.xlane.f32.xlu0 %v1970_v62  ;;  %8547 = vst [vmem:[#allocation28_spill] sm:$0xff] %v6046_v2  ;;  %v6050_v17 = vpop.permute.xlu1 %2286 }
 0x116   : > { %v1504_v14 = vmax.f32 %v1018_v57, 0.0  ;;  %v1569_v44 = vmax.f32 %v1277_v26, 0.0  ;;  %8548 = vst [vmem:[#allocation29_spill] sm:$0xff] %v6050_v17  ;;  %v1575_v5 = vmax.f32 %v1301_v56, 0.0 }
 0x118   : > { %1776 = vadd.xlane.f32.xlu1 %v1775_v23  ;;  %v5984_v36 = vpop.f32.mrb[16].mxu0  ;;  %v1985_v23 = vsel %vm1759_vm1, %v1706_v1, 0.0  ;;  %v1639_v57 = vmul.f32 %v5899_v20, %v1504_v14  ;;  %v1510_v1 = vmax.f32 %v1042_v38, 0.0  ;;  %v1704_v26 = vmul.f32 %v5899_v20, %v1569_v44  ;;  %v6082_v2 = vpop.permute.xlu0 %2293 }
 0x119   : > { %1773 = vadd.xlane.f32.xlu0 %v1772_v32  ;;  %v5987_v28 = vpop.f32.mrb[17].mxu0  ;;  %v5989_v41 = vpop.f32.mrb[16].mxu1  ;;  %v1710_v16 = vmul.f32 %v5899_v20, %v1575_v5  ;;  %8549 = vst [vmem:[#allocation30_spill] sm:$0xff] %v6082_v2 }
 0x11a   : > { %v5992_v47 = vpop.f32.mrb[18].mxu0  ;;  %v5994_v48 = vpop.f32.mrb[17].mxu1  ;;  %v1784_v14 = vsel %vm1759_vm1, %v1639_v57, 0.0  ;;  %v1645_v44 = vmul.f32 %v5899_v20, %v1510_v1  ;;  %v1979_v57 = vsel %vm1759_vm1, %v1704_v26, 0.0 }
 0x11b   : > { %v5998_v53 = vpop.f32.mrb[19].mxu0  ;;  %v6000_v54 = vpop.f32.mrb[18].mxu1  ;;  %v1997_v5 = vsel %vm1759_vm1, %v1710_v16, 0.0 }
 0x11c   : > { %1968 = vadd.xlane.f32.xlu1 %v1967_v50  ;;  %v6005_v62 = vpop.f32.mrb[19].mxu1 }
 0x11d   : > { %1965 = vadd.xlane.f32.xlu0 %v1964_v59 }
 0x120   : > { %1794 = vadd.xlane.f32.xlu1 %v1793_v63  ;;  %v6019_v19 = vpop.f32.mrb[20].mxu0  ;;  %v1511_v63 = vmax.f32 %v1045_v29, 0.0 }
 0x121   : > { %1791 = vadd.xlane.f32.xlu0 %v1790_v37  ;;  %v6023_v32 = vpop.f32.mrb[21].mxu0  ;;  %v6025_v34 = vpop.f32.mrb[20].mxu1  ;;  %v1298_v37 = vadd.f32 %v5960_v61, %v5887_v9 }
 0x122   : > { %v6030_v40 = vpop.f32.mrb[22].mxu0  ;;  %v6032_v33 = vpop.f32.mrb[21].mxu1 }
 0x123   : > { %v6035_v49 = vpop.f32.mrb[23].mxu0  ;;  %v6037_v50 = vpop.f32.mrb[22].mxu1  ;;  %v1574_v45 = vmax.f32 %v1298_v37, 0.0 }
 0x124   : > { %1986 = vadd.xlane.f32.xlu1 %v1985_v23  ;;  %v6040_v59 = vpop.f32.mrb[23].mxu1  ;;  %v1703_v23 = vmul.f32 %v5899_v20, %v1568_v0  ;;  %v1037_v0 = vadd.f32 %v5887_v9, %v5967_v3  ;;  %v1802_v3 = vsel %vm1759_vm1, %v1645_v44, 0.0 }
 0x125   : > { %1983 = vadd.xlane.f32.xlu0 %v1982_v43  ;;  %v1646_v43 = vmul.f32 %v5899_v20, %v1511_v63  ;;  %v1034_v63 = vadd.f32 %v5887_v9, %v5958_v60  ;;  %v1709_v26 = vmul.f32 %v5899_v20, %v1574_v45  ;;  %v1293_v60 = vadd.f32 %v5887_v9, %v5972_v13 }
 0x126   : > { %v1976_v37 = vsel %vm1759_vm1, %v1703_v23, 0.0  ;;  %v1509_v30 = vmax.f32 %v1037_v0, 0.0  ;;  %v1061_v45 = vadd.f32 %v5992_v47, %v5887_v9 }
 0x127   : > { %v1805_v17 = vsel %vm1759_vm1, %v1646_v43, 0.0  ;;  %v1508_v23 = vmax.f32 %v1034_v63, 0.0  ;;  %v1994_v13 = vsel %vm1759_vm1, %v1709_v26, 0.0  ;;  %v1058_v63 = vadd.f32 %v5984_v36, %v5887_v9 }
 0x128   : > { %1788 = vadd.xlane.f32.xlu1 %v1787_v6  ;;  %v6054_v29 = vpop.f32.mrb[24].mxu0  ;;  %v1515_v26 = vmax.f32 %v1061_v45, 0.0  ;;  %v1317_v36 = vadd.f32 %v6000_v54, %v5887_v9 }
 0x129   : > { %1785 = vadd.xlane.f32.xlu0 %v1784_v14  ;;  %v6057_v61 = vpop.f32.mrb[25].mxu0  ;;  %v6059_v38 = vpop.f32.mrb[24].mxu1  ;;  %v1643_v11 = vmul.f32 %v5899_v20, %v1508_v23  ;;  %v1514_v21 = vmax.f32 %v1058_v63, 0.0 }
 0x12a   : > { %v6062_v4 = vpop.f32.mrb[26].mxu0  ;;  %v6064_v6 = vpop.f32.mrb[25].mxu1  ;;  %v1579_v54 = vmax.f32 %v1317_v36, 0.0  ;;  %v1650_v63 = vmul.f32 %v5899_v20, %v1515_v26  ;;  %v1050_v26 = vadd.f32 %v5887_v9, %v5987_v28  ;;  %v1309_v28 = vadd.f32 %v5887_v9, %v6005_v62 }
 0x12b   : > { %v6069_v14 = vpop.f32.mrb[27].mxu0  ;;  %v6071_v56 = vpop.f32.mrb[26].mxu1  ;;  %v1796_v23 = vsel %vm1759_vm1, %v1643_v11, 0.0  ;;  %v1053_v11 = vadd.f32 %v5887_v9, %v5998_v53 }
 0x12c   : > { %1980 = vadd.xlane.f32.xlu1 %v1979_v57  ;;  %v6076_v1 = vpop.f32.mrb[27].mxu1  ;;  %v6086_v57 = vpop.permute.xlu1 %2300  ;;  %v1714_v51 = vmul.f32 %v5899_v20, %v1579_v54 }
 0x12d   : > { %1977 = vadd.xlane.f32.xlu0 %v1976_v37  ;;  %8550 = vst [vmem:[#allocation31_spill] sm:$0xff] %v6086_v57  ;;  %v1290_v37 = vadd.f32 %v5887_v9, %v5964_v58  ;;  %v1513_v12 = vmax.f32 %v1053_v11, 0.0 }
 0x12e   : > { %v2009_v54 = vsel %vm1759_vm1, %v1714_v51, 0.0 }
 0x12f   : > { %v1572_v47 = vmax.f32 %v1290_v37, 0.0 }
 0x130   : > { %1806 = vadd.xlane.f32.xlu1 %v1805_v17  ;;  %v6090_v43 = vpop.f32.mrb[28].mxu0  ;;  %v1573_v17 = vmax.f32 %v1293_v60, 0.0  ;;  %v1314_v60 = vadd.f32 %v5989_v41, %v5887_v9 }
 0x131   : > { %1803 = vadd.xlane.f32.xlu0 %v1802_v3  ;;  %v6095_v44 = vpop.f32.mrb[29].mxu0  ;;  %v6097_v0 = vpop.f32.mrb[28].mxu1  ;;  %v1644_v3 = vmul.f32 %v5899_v20, %v1509_v30  ;;  %v1707_v45 = vmul.f32 %v5899_v20, %v1572_v47 }
 0x132   : > { %v6102_v57 = vpop.f32.mrb[30].mxu0  ;;  %v6104_v58 = vpop.f32.mrb[29].mxu1  ;;  %v1708_v37 = vmul.f32 %v5899_v20, %v1573_v17  ;;  %v1649_v17 = vmul.f32 %v5899_v20, %v1514_v21 }
 0x133   : > { %v6107_v16 = vpop.f32.mrb[31].mxu0  ;;  %v6109_v2 = vpop.f32.mrb[30].mxu1  ;;  %v1799_v18 = vsel %vm1759_vm1, %v1644_v3, 0.0  ;;  %v1578_v3 = vmax.f32 %v1314_v60, 0.0  ;;  %v1988_v60 = vsel %vm1759_vm1, %v1707_v45, 0.0  ;;  %v1512_v45 = vmax.f32 %v1050_v26, 0.0 }
 0x134   : > { %1998 = vadd.xlane.f32.xlu1 %v1997_v5  ;;  %v6112_v55 = vpop.f32.mrb[31].mxu1  ;;  %v6118_v30 = vpop.permute.xlu0 %2307  ;;  %v1991_v47 = vsel %vm1759_vm1, %v1708_v37, 0.0  ;;  %v1814_v53 = vsel %vm1759_vm1, %v1649_v17, 0.0  ;;  %v1074_v26 = vadd.f32 %v6019_v19, %v5887_v9  ;;  %v1333_v19 = vadd.f32 %v6037_v50, %v5887_v9 }
 0x135   : > { %1995 = vadd.xlane.f32.xlu0 %v1994_v13  ;;  %8551 = vst [vmem:[#allocation32_spill] sm:$0xff] %v6118_v30  ;;  %v6122_v5 = vpop.permute.xlu1 %2314  ;;  %v1713_v37 = vmul.f32 %v5899_v20, %v1578_v3  ;;  %v1077_v3 = vadd.f32 %v6030_v40, %v5887_v9  ;;  %v1647_v46 = vmul.f32 %v5899_v20, %v1512_v45 }
 0x136   : > { %8552 = vst [vmem:[#allocation33_spill] sm:$0xff] %v6122_v5  ;;  %v1817_v5 = vsel %vm1759_vm1, %v1650_v63, 0.0  ;;  %v1518_v8 = vmax.f32 %v1074_v26, 0.0  ;;  %v1583_v50 = vmax.f32 %v1333_v19, 0.0 }
 0x137   : > { %v2006_v62 = vsel %vm1759_vm1, %v1713_v37, 0.0  ;;  %v1519_v37 = vmax.f32 %v1077_v3, 0.0  ;;  %v1808_v45 = vsel %vm1759_vm1, %v1647_v46, 0.0  ;;  %v1069_v46 = vadd.f32 %v5887_v9, %v6035_v49 }
 0x138   : > { %1800 = vadd.xlane.f32.xlu1 %v1799_v18  ;;  %v6126_v13 = vpop.f32.mrb[32].mxu0  ;;  %v6154_v15 = vpop.permute.xlu0 %2321  ;;  %v1718_v35 = vmul.f32 %v5899_v20, %v1583_v50 }
 0x139   : > { %1797 = vadd.xlane.f32.xlu0 %v1796_v23  ;;  %v6129_v41 = vpop.f32.mrb[33].mxu0  ;;  %v6131_v30 = vpop.f32.mrb[32].mxu1  ;;  %8553 = vst [vmem:[#allocation34_spill] sm:$0xff] %v6154_v15  ;;  %v1654_v26 = vmul.f32 %v5899_v20, %v1519_v37  ;;  %v1066_v37 = vadd.f32 %v5887_v9, %v6023_v32  ;;  %v1517_v27 = vmax.f32 %v1069_v46, 0.0  ;;  %v1325_v32 = vadd.f32 %v5887_v9, %v6040_v59 }
 0x13a   : > { %v6134_v52 = vpop.f32.mrb[34].mxu0  ;;  %v6136_v18 = vpop.f32.mrb[33].mxu1  ;;  %v2021_v50 = vsel %vm1759_vm1, %v1718_v35, 0.0 }
 0x13b   : > { %v6141_v23 = vpop.f32.mrb[35].mxu0  ;;  %v6143_v36 = vpop.f32.mrb[34].mxu1 }
 0x13c   : > { %1992 = vadd.xlane.f32.xlu1 %v1991_v47  ;;  %v6148_v21 = vpop.f32.mrb[35].mxu1  ;;  %v6158_v47 = vpop.permute.xlu1 %2328 }
 0x13d   : > { %1989 = vadd.xlane.f32.xlu0 %v1988_v60  ;;  %8554 = vst [vmem:[#allocation35_spill] sm:$0xff] %v6158_v47  ;;  %v1306_v60 = vadd.f32 %v5887_v9, %v5994_v48 }
 0x13f   : > { %v1576_v40 = vmax.f32 %v1306_v60, 0.0 }
 0x140   : > { %1818 = vadd.xlane.f32.xlu1 %v1817_v5  ;;  %v6162_v63 = vpop.f32.mrb[36].mxu0  ;;  %v1577_v5 = vmax.f32 %v1309_v28, 0.0  ;;  %v1330_v28 = vadd.f32 %v6025_v34, %v5887_v9 }
 0x141   : > { %1815 = vadd.xlane.f32.xlu0 %v1814_v53  ;;  %v6167_v17 = vpop.f32.mrb[37].mxu0  ;;  %v6169_v11 = vpop.f32.mrb[36].mxu1  ;;  %v1648_v53 = vmul.f32 %v5899_v20, %v1513_v12  ;;  %v1711_v3 = vmul.f32 %v5899_v20, %v1576_v40 }
 0x142   : > { %v6174_v47 = vpop.f32.mrb[38].mxu0  ;;  %v6176_v48 = vpop.f32.mrb[37].mxu1  ;;  %v1712_v60 = vmul.f32 %v5899_v20, %v1577_v5  ;;  %v1653_v5 = vmul.f32 %v5899_v20, %v1518_v8 }
 0x143   : > { %v6179_v51 = vpop.f32.mrb[39].mxu0  ;;  %v6181_v15 = vpop.f32.mrb[38].mxu1  ;;  %v1811_v7 = vsel %vm1759_vm1, %v1648_v53, 0.0  ;;  %v1582_v53 = vmax.f32 %v1330_v28, 0.0  ;;  %v2000_v28 = vsel %vm1759_vm1, %v1711_v3, 0.0  ;;  %v1516_v3 = vmax.f32 %v1066_v37, 0.0 }
 0x144   : > { %2010 = vadd.xlane.f32.xlu1 %v2009_v54  ;;  %v6184_v10 = vpop.f32.mrb[39].mxu1  ;;  %v6190_v12 = vpop.permute.xlu0 %2335  ;;  %v2003_v40 = vsel %vm1759_vm1, %v1712_v60, 0.0  ;;  %v1826_v49 = vsel %vm1759_vm1, %v1653_v5, 0.0  ;;  %v1090_v37 = vadd.f32 %v6054_v29, %v5887_v9  ;;  %v1349_v29 = vadd.f32 %v6071_v56, %v5887_v9 }
 0x145   : > { %2007 = vadd.xlane.f32.xlu0 %v2006_v62  ;;  %8555 = vst [vmem:[#allocation36_spill] sm:$0xff] %v6190_v12  ;;  %v6194_v54 = vpop.permute.xlu1 %2342  ;;  %v1717_v60 = vmul.f32 %v5899_v20, %v1582_v53  ;;  %v1093_v53 = vadd.f32 %v6062_v4, %v5887_v9  ;;  %v1651_v42 = vmul.f32 %v5899_v20, %v1516_v3 }
 0x146   : > { %8556 = vst [vmem:[#allocation37_spill] sm:$0xff] %v6194_v54  ;;  %v1829_v54 = vsel %vm1759_vm1, %v1654_v26, 0.0  ;;  %v1522_v39 = vmax.f32 %v1090_v37, 0.0  ;;  %v1587_v56 = vmax.f32 %v1349_v29, 0.0 }
 0x147   : > { %v2018_v59 = vsel %vm1759_vm1, %v1717_v60, 0.0  ;;  %v1523_v60 = vmax.f32 %v1093_v53, 0.0  ;;  %v1820_v3 = vsel %vm1759_vm1, %v1651_v42, 0.0  ;;  %v1085_v42 = vadd.f32 %v5887_v9, %v6069_v14 }
 0x148   : > { %1812 = vadd.xlane.f32.xlu1 %v1811_v7  ;;  %v6198_v62 = vpop.f32.mrb[40].mxu0  ;;  %v6226_v22 = vpop.permute.xlu0 %2349 }
 0x149   : > { %1809 = vadd.xlane.f32.xlu0 %v1808_v45  ;;  %v6201_v34 = vpop.f32.mrb[41].mxu0  ;;  %v6203_v12 = vpop.f32.mrb[40].mxu1  ;;  %8557 = vst [vmem:[#allocation38_spill] sm:$0xff] %v6226_v22  ;;  %v1658_v37 = vmul.f32 %v5899_v20, %v1523_v60  ;;  %v1082_v60 = vadd.f32 %v5887_v9, %v6057_v61  ;;  %v1341_v61 = vadd.f32 %v5887_v9, %v6076_v1 }
 0x14a   : > { %v6206_v24 = vpop.f32.mrb[42].mxu0  ;;  %v6208_v7 = vpop.f32.mrb[41].mxu1 }
 0x14b   : > { %v6213_v45 = vpop.f32.mrb[43].mxu0  ;;  %v6215_v19 = vpop.f32.mrb[42].mxu1 }
 0x14c   : > { %2004 = vadd.xlane.f32.xlu1 %v2003_v40  ;;  %v6220_v8 = vpop.f32.mrb[43].mxu1  ;;  %v6230_v40 = vpop.permute.xlu1 %2356 }
 0x14d   : > { %2001 = vadd.xlane.f32.xlu0 %v2000_v28  ;;  %8558 = vst [vmem:[#allocation39_spill] sm:$0xff] %v6230_v40  ;;  %v1322_v28 = vadd.f32 %v5887_v9, %v6032_v33 }
 0x14f   : > { %v1580_v4 = vmax.f32 %v1322_v28, 0.0 }
 0x150   : > { %1830 = vadd.xlane.f32.xlu1 %v1829_v54  ;;  %v6234_v26 = vpop.f32.mrb[44].mxu0  ;;  %v1581_v54 = vmax.f32 %v1325_v32, 0.0  ;;  %v1346_v32 = vadd.f32 %v6059_v38, %v5887_v9 }
 0x151   : > { %1827 = vadd.xlane.f32.xlu0 %v1826_v49  ;;  %v6239_v5 = vpop.f32.mrb[45].mxu0  ;;  %v6241_v46 = vpop.f32.mrb[44].mxu1  ;;  %v1652_v49 = vmul.f32 %v5899_v20, %v1517_v27  ;;  %v1715_v53 = vmul.f32 %v5899_v20, %v1580_v4 }
 0x152   : > { %v6246_v40 = vpop.f32.mrb[46].mxu0  ;;  %v6248_v33 = vpop.f32.mrb[45].mxu1  ;;  %v1716_v28 = vmul.f32 %v5899_v20, %v1581_v54  ;;  %v1657_v54 = vmul.f32 %v5899_v20, %v1522_v39 }
 0x153   : > { %8559 = vst [vmem:[#allocation40_spill] sm:$0xff] %v6248_v33  ;;  %v6251_v35 = vpop.f32.mrb[47].mxu0  ;;  %v6253_v22 = vpop.f32.mrb[46].mxu1  ;;  %v1823_v31 = vsel %vm1759_vm1, %v1652_v49, 0.0  ;;  %v1586_v49 = vmax.f32 %v1346_v32, 0.0  ;;  %v2012_v32 = vsel %vm1759_vm1, %v1715_v53, 0.0 }
 0x154   : > { %2022 = vadd.xlane.f32.xlu1 %v2021_v50  ;;  %v6256_v25 = vpop.f32.mrb[47].mxu1  ;;  %v6262_v27 = vpop.permute.xlu0 %2363  ;;  %v2015_v4 = vsel %vm1759_vm1, %v1716_v28, 0.0  ;;  %v1838_v14 = vsel %vm1759_vm1, %v1657_v54, 0.0  ;;  %v1520_v53 = vmax.f32 %v1082_v60, 0.0  ;;  %v1106_v60 = vadd.f32 %v6090_v43, %v5887_v9 }
 0x155   : > { %2019 = vadd.xlane.f32.xlu0 %v2018_v59  ;;  %8560 = vst [vmem:[#allocation41_spill] sm:$0xff] %v6262_v27  ;;  %v6266_v50 = vpop.permute.xlu1 %2370  ;;  %v1721_v28 = vmul.f32 %v5899_v20, %v1586_v49  ;;  %v1109_v49 = vadd.f32 %v6102_v57, %v5887_v9  ;;  %v1365_v43 = vadd.f32 %v6109_v2, %v5887_v9 }
 0x156   : > { %8561 = vst [vmem:[#allocation42_spill] sm:$0xff] %v6266_v50  ;;  %v1841_v50 = vsel %vm1759_vm1, %v1658_v37, 0.0 }
 0x157   : > { %v2030_v1 = vsel %vm1759_vm1, %v1721_v28, 0.0  ;;  %v1527_v28 = vmax.f32 %v1109_v49, 0.0 }
 0x158   : > { %1824 = vadd.xlane.f32.xlu1 %v1823_v31  ;;  %v6270_v59 = vpop.f32.mrb[48].mxu0 }
 0x159   : > { %1821 = vadd.xlane.f32.xlu0 %v1820_v3  ;;  %v6273_v38 = vpop.f32.mrb[49].mxu0  ;;  %v6275_v27 = vpop.f32.mrb[48].mxu1  ;;  %v1662_v2 = vmul.f32 %v5899_v20, %v1527_v28 }
 0x15a   : > { %8562 = vst [vmem:[#allocation43_spill] sm:$0xff] %v6273_v38  ;;  %v6278_v33 = vpop.f32.mrb[50].mxu0  ;;  %v6280_v31 = vpop.f32.mrb[49].mxu1 }
 0x15b   : > { %8563 = vst [vmem:[#allocation44_spill] sm:$0xff] %v6280_v31  ;;  %v6285_v3 = vpop.f32.mrb[51].mxu0  ;;  %v6287_v29 = vpop.f32.mrb[50].mxu1  ;;  %v1722_v31 = vmul.f32 %v5899_v20, %v1587_v56 }
 0x15c   : > { %8564 = vst [vmem:[#allocation45_spill] sm:$0xff] %v6285_v3  ;;  %2016 = vadd.xlane.f32.xlu1 %v2015_v4  ;;  %v6292_v39 = vpop.f32.mrb[51].mxu1  ;;  %v6298_v38 = vpop.permute.xlu0 %2377  ;;  %v1521_v3 = vmax.f32 %v1085_v42, 0.0 }
 0x15d   : > { %2013 = vadd.xlane.f32.xlu0 %v2012_v32  ;;  %8565 = vst [vmem:[#allocation46_spill] sm:$0xff] %v6298_v38  ;;  %v6302_v4 = vpop.permute.xlu1 %2384  ;;  %v1338_v32 = vadd.f32 %v5887_v9, %v6064_v6  ;;  %v2033_v56 = vsel %vm1759_vm1, %v1722_v31, 0.0 }
 0x15e   : > { %8566 = vst [vmem:[#allocation47_spill] sm:$0xff] %v6302_v4 }
 0x15f   : > { %v1584_v57 = vmax.f32 %v1338_v32, 0.0 }
 0x160   : > { %1842 = vadd.xlane.f32.xlu1 %v1841_v50  ;;  %v6306_v37 = vpop.f32.mrb[52].mxu0  ;;  %v1585_v50 = vmax.f32 %v1341_v61, 0.0  ;;  %v1362_v61 = vadd.f32 %v6097_v0, %v5887_v9 }
 0x161   : > { %8567 = vst [vmem:[#allocation48_spill] sm:$0xff] %v6306_v37  ;;  %1839 = vadd.xlane.f32.xlu0 %v1838_v14  ;;  %v6311_v54 = vpop.f32.mrb[53].mxu0  ;;  %v6313_v42 = vpop.f32.mrb[52].mxu1  ;;  %v1656_v14 = vmul.f32 %v5899_v20, %v1521_v3  ;;  %v1526_v37 = vmax.f32 %v1106_v60, 0.0  ;;  %v1719_v49 = vmul.f32 %v5899_v20, %v1584_v57  ;;  %v1591_v60 = vmax.f32 %v1365_v43, 0.0 }
 0x162   : > { %8568 = vst [vmem:[#allocation49_spill] sm:$0xff] %v6311_v54  ;;  %8569 = vst [vmem:[#allocation50_spill] sm:$0xff] %v6313_v42  ;;  %v6318_v4 = vpop.f32.mrb[54].mxu0  ;;  %v6320_v6 = vpop.f32.mrb[53].mxu1  ;;  %v1655_v54 = vmul.f32 %v5899_v20, %v1520_v53  ;;  %v1098_v43 = vadd.f32 %v5887_v9, %v6095_v44  ;;  %v1357_v44 = vadd.f32 %v5887_v9, %v6112_v55 }
 0x163   : > { %8570 = vst [vmem:[#allocation51_spill] sm:$0xff] %v6320_v6  ;;  %v6323_v31 = vpop.f32.mrb[55].mxu0  ;;  %v6325_v38 = vpop.f32.mrb[54].mxu1  ;;  %v1720_v6 = vmul.f32 %v5899_v20, %v1585_v50  ;;  %v1835_v32 = vsel %vm1759_vm1, %v1656_v14, 0.0  ;;  %v1590_v50 = vmax.f32 %v1362_v61, 0.0  ;;  %v1661_v14 = vmul.f32 %v5899_v20, %v1526_v37 }
 0x164   : > { %2034 = vadd.xlane.f32.xlu1 %v2033_v56  ;;  %v6328_v42 = vpop.f32.mrb[55].mxu1  ;;  %v6334_v3 = vpop.permute.xlu0 %2391  ;;  %v1832_v53 = vsel %vm1759_vm1, %v1655_v54, 0.0  ;;  %v1101_v54 = vadd.f32 %v5887_v9, %v6107_v16  ;;  %v2024_v61 = vsel %vm1759_vm1, %v1719_v49, 0.0  ;;  %v1524_v49 = vmax.f32 %v1098_v43, 0.0 }
 0x165   : > { %8571 = vst [vmem:[#allocation52_spill] sm:$0xff] %v6328_v42  ;;  %2031 = vadd.xlane.f32.xlu0 %v2030_v1  ;;  %8572 = vst [vmem:[#allocation53_spill] sm:$0xff] %v6334_v3  ;;  %v6338_v56 = vpop.permute.xlu1 %2398  ;;  %v2027_v57 = vsel %vm1759_vm1, %v1720_v6, 0.0  ;;  %v1725_v16 = vmul.f32 %v5899_v20, %v1590_v50  ;;  %v1850_v6 = vsel %vm1759_vm1, %v1661_v14, 0.0  ;;  %v1125_v50 = vadd.f32 %v6134_v52, %v5887_v9 }
 0x166   : > { %8573 = vst [vmem:[#allocation54_spill] sm:$0xff] %v6338_v56  ;;  %v1122_v43 = vadd.f32 %v6126_v13, %v5887_v9  ;;  %v1659_v52 = vmul.f32 %v5899_v20, %v1524_v49  ;;  %v1381_v13 = vadd.f32 %v6143_v36, %v5887_v9 }
 0x167   : > { %v2042_v55 = vsel %vm1759_vm1, %v1725_v16, 0.0  ;;  %v1531_v16 = vmax.f32 %v1125_v50, 0.0 }
 0x168   : > { %1836 = vadd.xlane.f32.xlu1 %v1835_v32  ;;  %v6342_v1 = vpop.f32.mrb[56].mxu0  ;;  %v1595_v36 = vmax.f32 %v1381_v13, 0.0 }
 0x169   : > { %1833 = vadd.xlane.f32.xlu0 %v1832_v53  ;;  %v6345_v0 = vpop.f32.mrb[57].mxu0  ;;  %v6347_v3 = vpop.f32.mrb[56].mxu1  ;;  %v1726_v53 = vmul.f32 %v5899_v20, %v1591_v60  ;;  %v1666_v50 = vmul.f32 %v5899_v20, %v1531_v16 }
 0x16a   : > { %8574 = vst [vmem:[#allocation55_spill] sm:$0xff] %v6345_v0  ;;  %v6350_v42 = vpop.f32.mrb[58].mxu0  ;;  %v6352_v32 = vpop.f32.mrb[57].mxu1 }
 0x16b   : > { %8575 = vst [vmem:[#allocation56_spill] sm:$0xff] %v6352_v32  ;;  %v6357_v56 = vpop.f32.mrb[59].mxu0  ;;  %v6359_v28 = vpop.f32.mrb[58].mxu1  ;;  %v1853_v32 = vsel %vm1759_vm1, %v1662_v2, 0.0  ;;  %v2045_v2 = vsel %vm1759_vm1, %v1726_v53, 0.0  ;;  %v1865_v16 = vsel %vm1759_vm1, %v1666_v50, 0.0  ;;  %v1141_v50 = vadd.f32 %v6174_v47, %v5887_v9 }
 0x16c   : > { %8576 = vst [vmem:[#allocation57_spill] sm:$0xff] %v6357_v56  ;;  %2028 = vadd.xlane.f32.xlu1 %v2027_v57  ;;  %v6364_v37 = vpop.f32.mrb[59].mxu1  ;;  %v6370_v0 = vpop.permute.xlu0 %2405  ;;  %v1525_v56 = vmax.f32 %v1101_v54, 0.0 }
 0x16d   : > { %8577 = vst [vmem:[#allocation58_spill] sm:$0xff] %v6364_v37  ;;  %2025 = vadd.xlane.f32.xlu0 %v2024_v61  ;;  %8578 = vst [vmem:[#allocation59_spill] sm:$0xff] %v6370_v0  ;;  %v6374_v57 = vpop.permute.xlu1 %2412  ;;  %v1354_v37 = vadd.f32 %v5887_v9, %v6104_v58  ;;  %v1535_v47 = vmax.f32 %v1141_v50, 0.0 }
 0x16e   : > { %8579 = vst [vmem:[#allocation60_spill] sm:$0xff] %v6374_v57 }
 0x16f   : > { %v1588_v0 = vmax.f32 %v1354_v37, 0.0 }
 0x170   : > { %1854 = vadd.xlane.f32.xlu1 %v1853_v32  ;;  %v6378_v60 = vpop.f32.mrb[60].mxu0  ;;  %v1660_v32 = vmul.f32 %v5899_v20, %v1525_v56  ;;  %v1378_v56 = vadd.f32 %v6131_v30, %v5887_v9  ;;  %v6410_v49 = vpop.permute.xlu0 %2419 }
 0x171   : > { %1851 = vadd.xlane.f32.xlu0 %v1850_v6  ;;  %v6383_v14 = vpop.f32.mrb[61].mxu0  ;;  %v6385_v54 = vpop.f32.mrb[60].mxu1  ;;  %v1589_v6 = vmax.f32 %v1357_v44, 0.0  ;;  %v1723_v37 = vmul.f32 %v5899_v20, %v1588_v0 }
 0x172   : > { %8580 = vst [vmem:[#allocation61_spill] sm:$0xff] %v6383_v14  ;;  %8581 = vst [vmem:[#allocation62_spill] sm:$0xff] %v6385_v54  ;;  %v6390_v61 = vpop.f32.mrb[62].mxu0  ;;  %v6392_v58 = vpop.f32.mrb[61].mxu1  ;;  %v1530_v54 = vmax.f32 %v1122_v43, 0.0  ;;  %v1594_v30 = vmax.f32 %v1378_v56, 0.0  ;;  %v1117_v43 = vadd.f32 %v5887_v9, %v6141_v23 }
 0x173   : > { %8582 = vst [vmem:[#allocation63_spill] sm:$0xff] %v6392_v58  ;;  %v6395_v53 = vpop.f32.mrb[63].mxu0  ;;  %v6397_v57 = vpop.f32.mrb[62].mxu1  ;;  %v1724_v58 = vmul.f32 %v5899_v20, %v1589_v6  ;;  %v2036_v0 = vsel %vm1759_vm1, %v1723_v37, 0.0  ;;  %v1370_v37 = vadd.f32 %v5887_v9, %v6136_v18 }
 0x174   : > { %8583 = vst [vmem:[#allocation64_spill] sm:$0xff] %v6395_v53  ;;  %2046 = vadd.xlane.f32.xlu1 %v2045_v2  ;;  %v6400_v14 = vpop.f32.mrb[63].mxu1  ;;  %v6406_v44 = vpop.permute.xlu1 %2426  ;;  %v1847_v53 = vsel %vm1759_vm1, %v1660_v32, 0.0  ;;  %v1844_v2 = vsel %vm1759_vm1, %v1659_v52, 0.0  ;;  %v1114_v32 = vadd.f32 %v5887_v9, %v6129_v41  ;;  %v1730_v52 = vmul.f32 %v5899_v20, %v1595_v36 }
 0x175   : > { %2043 = vadd.xlane.f32.xlu0 %v2042_v55  ;;  %v1665_v55 = vmul.f32 %v5899_v20, %v1530_v54  ;;  %v2039_v6 = vsel %vm1759_vm1, %v1724_v58, 0.0  ;;  %v6426_v54 = vpop.permute.xlu0 %2433  ;;  %v1729_v13 = vmul.f32 %v5899_v20, %v1594_v30  ;;  %v1529_v58 = vmax.f32 %v1117_v43, 0.0 }
 0x176   : > { %v1373_v41 = vadd.f32 %v5887_v9, %v6148_v21  ;;  %v1528_v56 = vmax.f32 %v1114_v32, 0.0  ;;  %v1592_v9 = vmax.f32 %v1370_v37, 0.0 }
 0x177   : > { %v1862_v23 = vsel %vm1759_vm1, %v1665_v55, 0.0  ;;  %v2054_v36 = vsel %vm1759_vm1, %v1729_v13, 0.0  ;;  %v6441_v55 = vld [vmem:[%s8494_s4] ss:$0 sm:$0xff]  ;;  %v1664_v18 = vmul.f32 %v5899_v20, %v1529_v58 }
 0x178   : > { %1848 = vadd.xlane.f32.xlu1 %v1847_v53  ;;  %v6422_v53 = vpop.permute.xlu1 %2440  ;;  %v1138_v21 = vadd.f32 %v6441_v55, %v6162_v63  ;;  %v1593_v43 = vmax.f32 %v1373_v41, 0.0  ;;  %v1663_v32 = vmul.f32 %v5899_v20, %v1528_v56  ;;  %v1394_v63 = vadd.f32 %v6441_v55, %v6169_v11 }
 0x179   : > { %1845 = vadd.xlane.f32.xlu0 %v1844_v2  ;;  %v2057_v2 = vsel %vm1759_vm1, %v1730_v52, 0.0  ;;  %v1859_v20 = vsel %vm1759_vm1, %v1664_v18, 0.0  ;;  %v1133_v50 = vadd.f32 %v6441_v55, %v6179_v51 }
 0x17a   : > { %v1534_v52 = vmax.f32 %v1138_v21, 0.0  ;;  %v1856_v58 = vsel %vm1759_vm1, %v1663_v32, 0.0  ;;  %v1130_v21 = vadd.f32 %v6441_v55, %v6167_v17  ;;  %v1389_v17 = vadd.f32 %v6441_v55, %v6184_v10 }
 0x17b   : > { %v1154_v10 = vadd.f32 %v6441_v55, %v6198_v62  ;;  %v1410_v62 = vadd.f32 %v6441_v55, %v6203_v12  ;;  %v1149_v12 = vadd.f32 %v6441_v55, %v6213_v45 }
 0x17c   : > { %2040 = vadd.xlane.f32.xlu1 %v2039_v6  ;;  %v6445_v30 = vpop.permute.xlu1 %2454  ;;  %v6448_v6 = vpop.permute.xlu0 %2447 }
 0x17d   : > { %2037 = vadd.xlane.f32.xlu0 %v2036_v0  ;;  %8584 = vst [vmem:[#allocation65_spill] sm:$0xff] %v6445_v30  ;;  %v1397_v0 = vadd.f32 %v6441_v55, %v6181_v15 }
 0x17f   : > { %v1599_v11 = vmax.f32 %v1397_v0, 0.0 }
 0x180   : > { %1866 = vadd.xlane.f32.xlu1 %v1865_v16  ;;  %v6458_v16 = vld [vmem:[%s8495_s5] ss:$0 sm:$0xff]  ;;  %v6464_v41 = vpop.permute.xlu1 %2468  ;;  %v6467_v56 = vpop.permute.xlu0 %2461 }
 0x181   : > { %1863 = vadd.xlane.f32.xlu0 %v1862_v23  ;;  %v1728_v13 = vmul.f32 %v6458_v16, %v1593_v43  ;;  %v1727_v23 = vmul.f32 %v6458_v16, %v1592_v9  ;;  %8585 = vst [vmem:[#allocation66_spill] sm:$0xff] %v6464_v41  ;;  %v1670_v15 = vmul.f32 %v6458_v16, %v1535_v47  ;;  %8586 = vst [vmem:[#allocation67_spill] sm:$0xff] %v6467_v56 }
 0x182   : > { %v1669_v37 = vmul.f32 %v6458_v16, %v1534_v52  ;;  %v1734_v43 = vmul.f32 %v6458_v16, %v1599_v11  ;;  %v1533_v52 = vmax.f32 %v1133_v50, 0.0 }
 0x183   : > { %v2048_v18 = vsel %vm1759_vm1, %v1727_v23, 0.0  ;;  %v1877_v9 = vsel %vm1759_vm1, %v1670_v15, 0.0 }
 0x184   : > { %2058 = vadd.xlane.f32.xlu1 %v2057_v2  ;;  %v1598_v2 = vmax.f32 %v1394_v63, 0.0  ;;  %v1874_v51 = vsel %vm1759_vm1, %v1669_v37, 0.0  ;;  %v1532_v63 = vmax.f32 %v1130_v21, 0.0  ;;  %v2069_v23 = vsel %vm1759_vm1, %v1734_v43, 0.0 }
 0x185   : > { %2055 = vadd.xlane.f32.xlu0 %v2054_v36  ;;  %v2051_v36 = vsel %vm1759_vm1, %v1728_v13, 0.0  ;;  %v1386_v13 = vadd.f32 %v6441_v55, %v6176_v48  ;;  %v1668_v37 = vmul.f32 %v6458_v16, %v1533_v52 }
 0x186   : > { %v1733_v47 = vmul.f32 %v6458_v16, %v1598_v2  ;;  %v1597_v2 = vmax.f32 %v1389_v17, 0.0  ;;  %v1667_v48 = vmul.f32 %v6458_v16, %v1532_v63 }
 0x187   : > { %v1596_v50 = vmax.f32 %v1386_v13, 0.0 }
 0x188   : > { %1860 = vadd.xlane.f32.xlu1 %v1859_v20  ;;  %v2066_v11 = vsel %vm1759_vm1, %v1733_v47, 0.0  ;;  %v1871_v47 = vsel %vm1759_vm1, %v1668_v37, 0.0  ;;  %v1868_v52 = vsel %vm1759_vm1, %v1667_v48, 0.0 }
 0x189   : > { %1857 = vadd.xlane.f32.xlu0 %v1856_v58  ;;  %v1157_v58 = vadd.f32 %v6441_v55, %v6206_v24  ;;  %v1413_v24 = vadd.f32 %v6441_v55, %v6215_v19 }
 0x18b   : > { %v1539_v21 = vmax.f32 %v1157_v58, 0.0  ;;  %v1603_v19 = vmax.f32 %v1413_v24, 0.0 }
 0x18c   : > { %2052 = vadd.xlane.f32.xlu1 %v2051_v36 }
 0x18d   : > { %2049 = vadd.xlane.f32.xlu0 %v2048_v18  ;;  %v6477_v32 = vpop.xlane.xlu1 %1767  ;;  %v1538_v18 = vmax.f32 %v1154_v10, 0.0  ;;  %v1674_v17 = vmul.f32 %v6458_v16, %v1539_v21  ;;  %v1146_v10 = vadd.f32 %v6441_v55, %v6201_v34  ;;  %v1405_v34 = vadd.f32 %v6441_v55, %v6220_v8 }
 0x18e   : > { %v6481_v0 = vpop.xlane.xlu0 %1959  ;;  %v1170_v8 = vadd.f32 %v6441_v55, %v6234_v26  ;;  %v1426_v26 = vadd.f32 %v6441_v55, %v6241_v46  ;;  %v1165_v46 = vadd.f32 %v6441_v55, %v6251_v35 }
 0x18f   : > { %8587 = vst [vmem:[#allocation68_spill] sm:$0xff] %v6481_v0  ;;  %v1673_v13 = vmul.f32 %v6458_v16, %v1538_v18  ;;  %v1537_v18 = vmax.f32 %v1149_v12, 0.0 }
 0x190   : > { %1878 = vadd.xlane.f32.xlu1 %v1877_v9  ;;  %v1732_v9 = vmul.f32 %v6458_v16, %v1597_v2  ;;  %v1738_v2 = vmul.f32 %v6458_v16, %v1603_v19 }
 0x191   : > { %1875 = vadd.xlane.f32.xlu0 %v1874_v51  ;;  %v6488_v20 = vpop.xlane.xlu1 %1770  ;;  %v1731_v51 = vmul.f32 %v6458_v16, %v1596_v50  ;;  %v1889_v50 = vsel %vm1759_vm1, %v1674_v17, 0.0  ;;  %v1886_v45 = vsel %vm1759_vm1, %v1673_v13, 0.0  ;;  %v1672_v13 = vmul.f32 %v6458_v16, %v1537_v18 }
 0x192   : > { %v6493_v15 = vpop.xlane.xlu0 %1761 }
 0x193   : > { %v2060_v37 = vsel %vm1759_vm1, %v1731_v51, 0.0  ;;  %v2081_v51 = vsel %vm1759_vm1, %v1738_v2, 0.0 }
 0x194   : > { %2070 = vadd.xlane.f32.xlu1 %v2069_v23  ;;  %v1602_v23 = vmax.f32 %v1410_v62, 0.0  ;;  %v1536_v62 = vmax.f32 %v1146_v10, 0.0 }
 0x195   : > { %2067 = vadd.xlane.f32.xlu0 %v2066_v11  ;;  %v6500_v36 = vpop.xlane.xlu1 %1962  ;;  %v2063_v11 = vsel %vm1759_vm1, %v1732_v9, 0.0  ;;  %v1402_v9 = vadd.f32 %v6441_v55, %v6208_v7 }
 0x196   : > { %8588 = vst [vmem:[#allocation69_spill] sm:$0xff] %v6500_v36  ;;  %v6504_v43 = vpop.xlane.xlu0 %1953  ;;  %v1737_v21 = vmul.f32 %v6458_v16, %v1602_v23  ;;  %v1601_v23 = vmax.f32 %v1405_v34, 0.0  ;;  %v1671_v7 = vmul.f32 %v6458_v16, %v1536_v62  ;;  %v8644_v36 = vld [vmem:[#allocation11_spill] sm:$0xff] }
 0x197   : > { %8589 = vst [vmem:[#allocation70_spill] sm:$0xff] %v6504_v43  ;;  %v1600_v12 = vmax.f32 %v1402_v9, 0.0 }
 0x198   : > { %1872 = vadd.xlane.f32.xlu1 %v1871_v47  ;;  %v2078_v19 = vsel %vm1759_vm1, %v1737_v21, 0.0  ;;  %v1883_v21 = vsel %vm1759_vm1, %v1672_v13, 0.0  ;;  %v1880_v18 = vsel %vm1759_vm1, %v1671_v7, 0.0 }
 0x199   : > { %1869 = vadd.xlane.f32.xlu0 %v1868_v52  ;;  %v6513_v63 = vpop.xlane.xlu1 %1956  ;;  %v1173_v52 = vadd.f32 %v6441_v55, %v6246_v40  ;;  %v1429_v40 = vadd.f32 %v6441_v55, %v6253_v22 }
 0x19a   : > { %8590 = vst [vmem:[#allocation71_spill] sm:$0xff] %v6513_v63  ;;  %v6516_v58 = vpop.xlane.xlu0 %1764 }
 0x19b   : > { %v1543_v10 = vmax.f32 %v1173_v52, 0.0  ;;  %v1607_v22 = vmax.f32 %v1429_v40, 0.0 }
 0x19c   : > { %2064 = vadd.xlane.f32.xlu1 %v2063_v11 }
 0x19d   : > { %2061 = vadd.xlane.f32.xlu0 %v2060_v37  ;;  %v6525_v48 = vpop.xlane.xlu1 %1782  ;;  %v1542_v37 = vmax.f32 %v1170_v8, 0.0  ;;  %v1678_v34 = vmul.f32 %v6458_v16, %v1543_v10  ;;  %v1162_v8 = vadd.f32 %v6441_v55, %v6239_v5  ;;  %v1421_v5 = vadd.f32 %v6441_v55, %v6256_v25 }
 0x19e   : > { %v6529_v24 = vpop.xlane.xlu0 %1779  ;;  %v1186_v25 = vadd.f32 %v6441_v55, %v6270_v59  ;;  %v1442_v59 = vadd.f32 %v6441_v55, %v6275_v27  ;;  %v8600_v27 = vld [vmem:[#allocation45_spill] sm:$0xff] }
 0x19f   : > { %v1677_v9 = vmul.f32 %v6458_v16, %v1542_v37  ;;  %v1541_v37 = vmax.f32 %v1165_v46, 0.0  ;;  %v1605_v46 = vmax.f32 %v1421_v5, 0.0 }
 0x1a0   : > { %1890 = vadd.xlane.f32.xlu1 %v1889_v50  ;;  %v1736_v50 = vmul.f32 %v6458_v16, %v1601_v23  ;;  %v1742_v23 = vmul.f32 %v6458_v16, %v1607_v22 }
 0x1a1   : > { %1887 = vadd.xlane.f32.xlu0 %v1886_v45  ;;  %v6536_v47 = vpop.xlane.xlu1 %1974  ;;  %v1735_v45 = vmul.f32 %v6458_v16, %v1600_v12  ;;  %v1901_v12 = vsel %vm1759_vm1, %v1678_v34, 0.0  ;;  %v1898_v35 = vsel %vm1759_vm1, %v1677_v9, 0.0  ;;  %v1189_v34 = vadd.f32 %v6441_v55, %v6278_v33 }
 0x1a2   : > { %8591 = vst [vmem:[#allocation72_spill] sm:$0xff] %v6536_v47  ;;  %v6541_v17 = vpop.xlane.xlu0 %1971  ;;  %v1445_v33 = vadd.f32 %v6441_v55, %v6287_v29  ;;  %v8642_v47 = vld [vmem:[#allocation9_spill] sm:$0xff] }
 0x1a3   : > { %8592 = vst [vmem:[#allocation73_spill] sm:$0xff] %v6541_v17  ;;  %v2072_v13 = vsel %vm1759_vm1, %v1735_v45, 0.0 }
 0x1a4   : > { %2082 = vadd.xlane.f32.xlu1 %v2081_v51  ;;  %v1606_v51 = vmax.f32 %v1426_v26, 0.0  ;;  %v1540_v26 = vmax.f32 %v1162_v8, 0.0  ;;  %v1611_v29 = vmax.f32 %v1445_v33, 0.0 }
 0x1a5   : > { %2079 = vadd.xlane.f32.xlu0 %v2078_v19  ;;  %v6548_v11 = vpop.xlane.xlu1 %1776  ;;  %v2075_v19 = vsel %vm1759_vm1, %v1736_v50, 0.0  ;;  %v8595_v50 = vld [vmem:[#allocation40_spill] sm:$0xff] }
 0x1a6   : > { %v6552_v2 = vpop.xlane.xlu0 %1773  ;;  %v1741_v10 = vmul.f32 %v6458_v16, %v1606_v51  ;;  %v1676_v51 = vmul.f32 %v6458_v16, %v1541_v37 }
 0x1a8   : > { %1884 = vadd.xlane.f32.xlu1 %v1883_v21  ;;  %v1418_v21 = vadd.f32 %v6441_v55, %v8595_v50  ;;  %v2090_v9 = vsel %vm1759_vm1, %v1741_v10, 0.0  ;;  %v1740_v10 = vmul.f32 %v6458_v16, %v1605_v46  ;;  %v1895_v37 = vsel %vm1759_vm1, %v1676_v51, 0.0  ;;  %v8601_v46 = vld [vmem:[#allocation43_spill] sm:$0xff] }
 0x1a9   : > { %1881 = vadd.xlane.f32.xlu0 %v1880_v18  ;;  %v6561_v62 = vpop.xlane.xlu1 %1968  ;;  %v2093_v18 = vsel %vm1759_vm1, %v1742_v23, 0.0  ;;  %v1547_v23 = vmax.f32 %v1189_v34, 0.0  ;;  %v1610_v34 = vmax.f32 %v1442_v59, 0.0 }
 0x1aa   : > { %8593 = vst [vmem:[#allocation74_spill] sm:$0xff] %v6561_v62  ;;  %v6564_v52 = vpop.xlane.xlu0 %1965  ;;  %v1604_v8 = vmax.f32 %v1418_v21, 0.0  ;;  %v2087_v51 = vsel %vm1759_vm1, %v1740_v10, 0.0 }
 0x1ab   : > { %8594 = vst [vmem:[#allocation75_spill] sm:$0xff] %v6564_v52  ;;  %v1682_v50 = vmul.f32 %v6458_v16, %v1547_v23  ;;  %v1746_v23 = vmul.f32 %v6458_v16, %v1611_v29  ;;  %v1745_v59 = vmul.f32 %v6458_v16, %v1610_v34  ;;  %v1205_v34 = vadd.f32 %v6441_v55, %v6318_v4 }
 0x1ac   : > { %2076 = vadd.xlane.f32.xlu1 %v2075_v19  ;;  %v1675_v19 = vmul.f32 %v6458_v16, %v1540_v26  ;;  %v1739_v5 = vmul.f32 %v6458_v16, %v1604_v8  ;;  %v1178_v8 = vadd.f32 %v6441_v55, %v8601_v46  ;;  %v8602_v46 = vld [vmem:[#allocation44_spill] sm:$0xff]  ;;  %v1461_v4 = vadd.f32 %v6441_v55, %v6325_v38 }
 0x1ad   : > { %2073 = vadd.xlane.f32.xlu0 %v2072_v13  ;;  %v6573_v7 = vpop.xlane.xlu1 %1794 }
 0x1ae   : > { %v6577_v40 = vpop.xlane.xlu0 %1791  ;;  %v1892_v26 = vsel %vm1759_vm1, %v1675_v19, 0.0  ;;  %v2084_v19 = vsel %vm1759_vm1, %v1739_v5, 0.0  ;;  %v1434_v5 = vadd.f32 %v6441_v55, %v8602_v46  ;;  %v1615_v38 = vmax.f32 %v1461_v4, 0.0 }
 0x1b0   : > { %1902 = vadd.xlane.f32.xlu1 %v1901_v12  ;;  %v1546_v12 = vmax.f32 %v1186_v25, 0.0  ;;  %v1181_v25 = vadd.f32 %v6441_v55, %v8600_v27  ;;  %v1437_v27 = vadd.f32 %v6441_v55, %v6292_v39 }
 0x1b1   : > { %1899 = vadd.xlane.f32.xlu0 %v1898_v35  ;;  %v6584_v45 = vpop.xlane.xlu1 %1986 }
 0x1b2   : > { %8596 = vst [vmem:[#allocation40_spill] sm:$0xff] %v6584_v45  ;;  %v6589_v22 = vpop.xlane.xlu0 %1983  ;;  %v1545_v10 = vmax.f32 %v1181_v25, 0.0  ;;  %v8605_v25 = vld [vmem:[#allocation48_spill] sm:$0xff]  ;;  %v1609_v45 = vmax.f32 %v1437_v27, 0.0 }
 0x1b3   : > { %8597 = vst [vmem:[#allocation76_spill] sm:$0xff] %v6589_v22  ;;  %v1202_v39 = vadd.f32 %v6441_v55, %v8605_v25  ;;  %v2150_v22 = vld [vmem:[%s5709_s16 + $0x30] sm:$0xff] }
 0x1b4   : > { %2094 = vadd.xlane.f32.xlu1 %v2093_v18  ;;  %v1681_v18 = vmul.f32 %v6458_v16, %v1546_v12  ;;  %v1913_v12 = vsel %vm1759_vm1, %v1682_v50, 0.0  ;;  %v2105_v50 = vsel %vm1759_vm1, %v1746_v23, 0.0  ;;  %v1551_v23 = vmax.f32 %v1205_v34, 0.0 }
 0x1b5   : > { %2091 = vadd.xlane.f32.xlu0 %v2090_v9  ;;  %v6596_v13 = vpop.xlane.xlu1 %1788 }
 0x1b6   : > { %v6600_v35 = vpop.xlane.xlu0 %1785 }
 0x1b8   : > { %1896 = vadd.xlane.f32.xlu1 %v1895_v37 }
 0x1b9   : > { %1893 = vadd.xlane.f32.xlu0 %v1892_v26  ;;  %v6609_v21 = vpop.xlane.xlu1 %1980  ;;  %v1910_v26 = vsel %vm1759_vm1, %v1681_v18, 0.0  ;;  %v2102_v18 = vsel %vm1759_vm1, %v1745_v59, 0.0  ;;  %v8606_v59 = vld [vmem:[#allocation50_spill] sm:$0xff] }
 0x1ba   : > { %8598 = vst [vmem:[#allocation77_spill] sm:$0xff] %v6609_v21  ;;  %v6612_v9 = vpop.xlane.xlu0 %1977  ;;  %v1458_v25 = vadd.f32 %v6441_v55, %v8606_v59 }
 0x1bb   : > { %8599 = vst [vmem:[#allocation78_spill] sm:$0xff] %v6612_v9  ;;  %v8643_v9 = vld [vmem:[#allocation6_spill] sm:$0xff] }
 0x1bc   : > { %2088 = vadd.xlane.f32.xlu1 %v2087_v51  ;;  %v1544_v51 = vmax.f32 %v1178_v8, 0.0  ;;  %v1680_v8 = vmul.f32 %v6458_v16, %v1545_v10  ;;  %v1744_v10 = vmul.f32 %v6458_v16, %v1609_v45  ;;  %v1197_v45 = vadd.f32 %v6441_v55, %v6323_v31 }
 0x1bd   : > { %2085 = vadd.xlane.f32.xlu0 %v2084_v19  ;;  %v6621_v33 = vpop.xlane.xlu1 %1806  ;;  %v2522_v62 = vrot.slane %v2150_v22, %v8643_v9 }
 0x1be   : > { %v6625_v37 = vpop.xlane.xlu0 %1803  ;;  %v1907_v27 = vsel %vm1759_vm1, %v1680_v8, 0.0  ;;  %v2099_v8 = vsel %vm1759_vm1, %v1744_v10, 0.0  ;;  %v1549_v10 = vmax.f32 %v1197_v45, 0.0  ;;  %v1218_v45 = vadd.f32 %v6441_v55, %v6342_v1 }
 0x1bf   : > { %v1474_v1 = vadd.f32 %v6441_v55, %v6347_v3  ;;  %v8616_v3 = vld [vmem:[#allocation57_spill] sm:$0xff] }
 0x1c0   : > { %1914 = vadd.xlane.f32.xlu1 %v1913_v12  ;;  %v1679_v12 = vmul.f32 %v6458_v16, %v1544_v51 }
 0x1c1   : > { %1911 = vadd.xlane.f32.xlu0 %v1910_v26  ;;  %v6632_v29 = vpop.xlane.xlu1 %1998  ;;  %v1608_v26 = vmax.f32 %v1434_v5, 0.0 }
 0x1c2   : > { %8603 = vst [vmem:[#allocation45_spill] sm:$0xff] %v6632_v29  ;;  %v6637_v19 = vpop.xlane.xlu0 %1995  ;;  %v1550_v29 = vmax.f32 %v1202_v39, 0.0  ;;  %v1904_v5 = vsel %vm1759_vm1, %v1679_v12, 0.0  ;;  %v1614_v39 = vmax.f32 %v1458_v25, 0.0 }
 0x1c3   : > { %8604 = vst [vmem:[#allocation43_spill] sm:$0xff] %v6637_v19  ;;  %v1743_v51 = vmul.f32 %v6458_v16, %v1608_v26  ;;  %v8609_v26 = vld [vmem:[#allocation49_spill] sm:$0xff] }
 0x1c4   : > { %2106 = vadd.xlane.f32.xlu1 %v2105_v50  ;;  %v1686_v50 = vmul.f32 %v6458_v16, %v1551_v23  ;;  %v1194_v59 = vadd.f32 %v6441_v55, %v8609_v26  ;;  %v1750_v23 = vmul.f32 %v6458_v16, %v1615_v38  ;;  %v1749_v25 = vmul.f32 %v6458_v16, %v1614_v39 }
 0x1c5   : > { %2103 = vadd.xlane.f32.xlu0 %v2102_v18  ;;  %v6644_v46 = vpop.xlane.xlu1 %1800  ;;  %v1685_v18 = vmul.f32 %v6458_v16, %v1550_v29  ;;  %v2096_v12 = vsel %vm1759_vm1, %v1743_v51, 0.0  ;;  %v1221_v39 = vadd.f32 %v6441_v55, %v6350_v42  ;;  %v1477_v42 = vadd.f32 %v6441_v55, %v6359_v28 }
 0x1c6   : > { %v6648_v19 = vpop.xlane.xlu0 %1797  ;;  %v1925_v29 = vsel %vm1759_vm1, %v1686_v50, 0.0  ;;  %v2117_v50 = vsel %vm1759_vm1, %v1750_v23, 0.0 }
 0x1c7   : > { %v1922_v31 = vsel %vm1759_vm1, %v1685_v18, 0.0  ;;  %v2114_v18 = vsel %vm1759_vm1, %v1749_v25, 0.0  ;;  %v1555_v23 = vmax.f32 %v1221_v39, 0.0  ;;  %v1619_v28 = vmax.f32 %v1477_v42, 0.0 }
 0x1c8   : > { %1908 = vadd.xlane.f32.xlu1 %v1907_v27 }
 0x1c9   : > { %1905 = vadd.xlane.f32.xlu0 %v1904_v5  ;;  %v6657_v34 = vpop.xlane.xlu1 %1992  ;;  %v8610_v5 = vld [vmem:[#allocation52_spill] sm:$0xff] }
 0x1ca   : > { %8607 = vst [vmem:[#allocation44_spill] sm:$0xff] %v6657_v34  ;;  %v6660_v21 = vpop.xlane.xlu0 %1989  ;;  %v1453_v26 = vadd.f32 %v6441_v55, %v8610_v5  ;;  %v8611_v34 = vld [vmem:[#allocation51_spill] sm:$0xff] }
 0x1cb   : > { %8608 = vst [vmem:[#allocation48_spill] sm:$0xff] %v6660_v21  ;;  %v1450_v51 = vadd.f32 %v6441_v55, %v8611_v34 }
 0x1cc   : > { %2100 = vadd.xlane.f32.xlu1 %v2099_v8  ;;  %v1548_v8 = vmax.f32 %v1194_v59, 0.0  ;;  %v1684_v59 = vmul.f32 %v6458_v16, %v1549_v10  ;;  %v1613_v5 = vmax.f32 %v1453_v26, 0.0 }
 0x1cd   : > { %2097 = vadd.xlane.f32.xlu0 %v2096_v12  ;;  %v6669_v4 = vpop.xlane.xlu1 %1818 }
 0x1ce   : > { %v6673_v27 = vpop.xlane.xlu0 %1815  ;;  %v1683_v34 = vmul.f32 %v6458_v16, %v1548_v8  ;;  %v1748_v25 = vmul.f32 %v6458_v16, %v1613_v5  ;;  %v1919_v10 = vsel %vm1759_vm1, %v1684_v59, 0.0  ;;  %v1213_v5 = vadd.f32 %v6441_v55, %v8616_v3 }
 0x1d0   : > { %1926 = vadd.xlane.f32.xlu1 %v1925_v29  ;;  %v1612_v29 = vmax.f32 %v1450_v51, 0.0  ;;  %v1916_v8 = vsel %vm1759_vm1, %v1683_v34, 0.0  ;;  %v1690_v51 = vmul.f32 %v6458_v16, %v1555_v23  ;;  %v2111_v59 = vsel %vm1759_vm1, %v1748_v25, 0.0 }
 0x1d1   : > { %1923 = vadd.xlane.f32.xlu0 %v1922_v31  ;;  %v6680_v38 = vpop.xlane.xlu1 %2010  ;;  %v1754_v23 = vmul.f32 %v6458_v16, %v1619_v28  ;;  %v1553_v25 = vmax.f32 %v1213_v5, 0.0 }
 0x1d2   : > { %8612 = vst [vmem:[#allocation50_spill] sm:$0xff] %v6680_v38  ;;  %v6685_v12 = vpop.xlane.xlu0 %2007  ;;  %v1554_v38 = vmax.f32 %v1218_v45, 0.0  ;;  %v1747_v26 = vmul.f32 %v6458_v16, %v1612_v29  ;;  %v8617_v29 = vld [vmem:[#allocation55_spill] sm:$0xff] }
 0x1d3   : > { %8613 = vst [vmem:[#allocation49_spill] sm:$0xff] %v6685_v12  ;;  %v1688_v5 = vmul.f32 %v6458_v16, %v1553_v25 }
 0x1d4   : > { %2118 = vadd.xlane.f32.xlu1 %v2117_v50  ;;  %v1689_v39 = vmul.f32 %v6458_v16, %v1554_v38  ;;  %v2108_v34 = vsel %vm1759_vm1, %v1747_v26, 0.0  ;;  %v1937_v38 = vsel %vm1759_vm1, %v1690_v51, 0.0  ;;  %v2129_v51 = vsel %vm1759_vm1, %v1754_v23, 0.0 }
 0x1d5   : > { %2115 = vadd.xlane.f32.xlu0 %v2114_v18  ;;  %v6692_v31 = vpop.xlane.xlu1 %1812  ;;  %v1618_v18 = vmax.f32 %v1474_v1, 0.0 }
 0x1d6   : > { %v6696_v12 = vpop.xlane.xlu0 %1809  ;;  %v1934_v3 = vsel %vm1759_vm1, %v1689_v39, 0.0 }
 0x1d7   : > { %v1753_v1 = vmul.f32 %v6458_v16, %v1618_v18  ;;  %v1237_v18 = vadd.f32 %v6441_v55, %v6390_v61  ;;  %v1493_v61 = vadd.f32 %v6441_v55, %v6397_v57 }
 0x1d8   : > { %1920 = vadd.xlane.f32.xlu1 %v1919_v10  ;;  %v1210_v10 = vadd.f32 %v6441_v55, %v8617_v29 }
 0x1d9   : > { %1917 = vadd.xlane.f32.xlu0 %v1916_v8  ;;  %v6705_v50 = vpop.xlane.xlu1 %2004  ;;  %v2126_v39 = vsel %vm1759_vm1, %v1753_v1, 0.0  ;;  %v1559_v23 = vmax.f32 %v1237_v18, 0.0  ;;  %v8622_v1 = vld [vmem:[#allocation62_spill] sm:$0xff]  ;;  %v1623_v57 = vmax.f32 %v1493_v61, 0.0 }
 0x1da   : > { %8614 = vst [vmem:[#allocation52_spill] sm:$0xff] %v6705_v50  ;;  %v6708_v45 = vpop.xlane.xlu0 %2001  ;;  %v8618_v50 = vld [vmem:[#allocation58_spill] sm:$0xff] }
 0x1db   : > { %8615 = vst [vmem:[#allocation51_spill] sm:$0xff] %v6708_v45  ;;  %v1469_v29 = vadd.f32 %v6441_v55, %v8618_v50  ;;  %v8619_v45 = vld [vmem:[#allocation56_spill] sm:$0xff]  ;;  %v1234_v50 = vadd.f32 %v6441_v55, %v6378_v60  ;;  %v1490_v60 = vadd.f32 %v6441_v55, %v8622_v1 }
 0x1dc   : > { %2112 = vadd.xlane.f32.xlu1 %v2111_v59  ;;  %v1552_v59 = vmax.f32 %v1210_v10, 0.0  ;;  %v1466_v26 = vadd.f32 %v6441_v55, %v8619_v45  ;;  %v8625_v1 = vld [vmem:[#allocation64_spill] sm:$0xff] }
 0x1dd   : > { %2109 = vadd.xlane.f32.xlu0 %v2108_v34  ;;  %v6717_v42 = vpop.xlane.xlu1 %1830  ;;  %v1617_v10 = vmax.f32 %v1469_v29, 0.0  ;;  %v1931_v29 = vsel %vm1759_vm1, %v1688_v5, 0.0 }
 0x1de   : > { %v6721_v8 = vpop.xlane.xlu0 %1827  ;;  %v1687_v45 = vmul.f32 %v6458_v16, %v1552_v59 }
 0x1df   : > { %v1752_v25 = vmul.f32 %v6458_v16, %v1617_v10  ;;  %v1229_v10 = vadd.f32 %v6441_v55, %v8625_v1 }
 0x1e0   : > { %1938 = vadd.xlane.f32.xlu1 %v1937_v38  ;;  %v1616_v38 = vmax.f32 %v1466_v26, 0.0  ;;  %v1928_v26 = vsel %vm1759_vm1, %v1687_v45, 0.0 }
 0x1e1   : > { %1935 = vadd.xlane.f32.xlu0 %v1934_v3  ;;  %v6728_v28 = vpop.xlane.xlu1 %2022  ;;  %v2123_v5 = vsel %vm1759_vm1, %v1752_v25, 0.0  ;;  %v1557_v25 = vmax.f32 %v1229_v10, 0.0 }
 0x1e2   : > { %8620 = vst [vmem:[#allocation57_spill] sm:$0xff] %v6728_v28  ;;  %v6733_v34 = vpop.xlane.xlu0 %2019  ;;  %v1558_v28 = vmax.f32 %v1234_v50, 0.0  ;;  %v1751_v59 = vmul.f32 %v6458_v16, %v1616_v38  ;;  %v1622_v50 = vmax.f32 %v1490_v60, 0.0  ;;  %v8626_v38 = vld [vmem:[#allocation61_spill] sm:$0xff] }
 0x1e3   : > { %8621 = vst [vmem:[#allocation55_spill] sm:$0xff] %v6733_v34 }
 0x1e4   : > { %2130 = vadd.xlane.f32.xlu1 %v2129_v51  ;;  %v1694_v51 = vmul.f32 %v6458_v16, %v1559_v23  ;;  %v2120_v45 = vsel %vm1759_vm1, %v1751_v59, 0.0  ;;  %v1758_v23 = vmul.f32 %v6458_v16, %v1623_v57  ;;  %v1757_v60 = vmul.f32 %v6458_v16, %v1622_v50 }
 0x1e5   : > { %2127 = vadd.xlane.f32.xlu0 %v2126_v39  ;;  %v6740_v3 = vpop.xlane.xlu1 %1824  ;;  %v1693_v39 = vmul.f32 %v6458_v16, %v1558_v28 }
 0x1e6   : > { %v6744_v34 = vpop.xlane.xlu0 %1821  ;;  %v1949_v28 = vsel %vm1759_vm1, %v1694_v51, 0.0  ;;  %v2141_v51 = vsel %vm1759_vm1, %v1758_v23, 0.0  ;;  %v2138_v50 = vsel %vm1759_vm1, %v1757_v60, 0.0 }
 0x1e7   : > { %v1946_v1 = vsel %vm1759_vm1, %v1693_v39, 0.0  ;;  %v1692_v39 = vmul.f32 %v6458_v16, %v1557_v25 }
 0x1e8   : > { %1932 = vadd.xlane.f32.xlu1 %v1931_v29  ;;  %v1226_v29 = vadd.f32 %v6441_v55, %v8626_v38  ;;  %v1485_v38 = vadd.f32 %v6441_v55, %v6400_v14 }
 0x1e9   : > { %1929 = vadd.xlane.f32.xlu0 %v1928_v26  ;;  %v6753_v18 = vpop.xlane.xlu1 %2016  ;;  %v1943_v23 = vsel %vm1759_vm1, %v1692_v39, 0.0 }
 0x1ea   : > { %8623 = vst [vmem:[#allocation58_spill] sm:$0xff] %v6753_v18  ;;  %v6756_v21 = vpop.xlane.xlu0 %2013  ;;  %v8627_v18 = vld [vmem:[#allocation63_spill] sm:$0xff]  ;;  %v1621_v10 = vmax.f32 %v1485_v38, 0.0 }
 0x1eb   : > { %8624 = vst [vmem:[#allocation56_spill] sm:$0xff] %v6756_v21  ;;  %v1482_v59 = vadd.f32 %v6441_v55, %v8627_v18 }
 0x1ec   : > { %2124 = vadd.xlane.f32.xlu1 %v2123_v5  ;;  %v1556_v5 = vmax.f32 %v1226_v29, 0.0  ;;  %v1756_v18 = vmul.f32 %v6458_v16, %v1621_v10 }
 0x1ed   : > { %2121 = vadd.xlane.f32.xlu0 %v2120_v45  ;;  %v6765_v61 = vpop.xlane.xlu1 %1842  ;;  %v1620_v14 = vmax.f32 %v1482_v59, 0.0 }
 0x1ee   : > { %v6769_v26 = vpop.xlane.xlu0 %1839  ;;  %v1691_v21 = vmul.f32 %v6458_v16, %v1556_v5  ;;  %v2135_v38 = vsel %vm1759_vm1, %v1756_v18, 0.0  ;;  %v8635_v18 = vld [vmem:[#allocation10_spill] sm:$0xff] }
 0x1f0   : > { %1950 = vadd.xlane.f32.xlu1 %v1949_v28  ;;  %v1755_v28 = vmul.f32 %v6458_v16, %v1620_v14  ;;  %v1940_v60 = vsel %vm1759_vm1, %v1691_v21, 0.0  ;;  %v5528_v14 = vld [vmem:[%s5709_s16 + $0x28] sm:$0xff] }
 0x1f1   : > { %1947 = vadd.xlane.f32.xlu0 %v1946_v1  ;;  %v6776_v57 = vpop.xlane.xlu1 %2034 }
 0x1f2   : > { %8628 = vst [vmem:[#allocation62_spill] sm:$0xff] %v6776_v57  ;;  %v6779_v45 = vpop.xlane.xlu0 %2031  ;;  %v2132_v5 = vsel %vm1759_vm1, %v1755_v28, 0.0 }
 0x1f3   : > { %8629 = vst [vmem:[#allocation64_spill] sm:$0xff] %v6779_v45  ;;  %v8640_v45 = vld [vmem:[#allocation13_spill] sm:$0xff] }
 0x1f4   : > { %2142 = vadd.xlane.f32.xlu1 %v2141_v51 }
 0x1f5   : > { %2139 = vadd.xlane.f32.xlu0 %v2138_v50  ;;  %v6784_v29 = vpop.xlane.xlu1 %1836 }
 0x1f6   : > { %v6786_v55 = vpop.xlane.xlu0 %1833 }
 0x1f8   : > { %1944 = vadd.xlane.f32.xlu1 %v1943_v23  ;;  %v2480_v23 = vrot.slane %v5528_v14, %v8635_v18 }
 0x1f9   : > { %1941 = vadd.xlane.f32.xlu0 %v1940_v60  ;;  %v6792_v1 = vpop.xlane.xlu1 %2028 }
 0x1fa   : > { %8630 = vst [vmem:[#allocation61_spill] sm:$0xff] %v6792_v1  ;;  %v6794_v25 = vpop.xlane.xlu0 %2025 }
 0x1fb   : > { %8631 = vst [vmem:[#allocation63_spill] sm:$0xff] %v6794_v25  ;;  %v2508_v25 = vrot.slane %v5528_v14, %v8640_v45 }
 0x1fc   : > { %2136 = vadd.xlane.f32.xlu1 %v2135_v38  ;;  %v8637_v38 = vld [vmem:[#allocation12_spill] sm:$0xff] }
 0x1fd   : > { %2133 = vadd.xlane.f32.xlu0 %v2132_v5  ;;  %v6798_v59 = vpop.xlane.xlu1 %1854  ;;  %v2494_v5 = vrot.slane %v5528_v14, %v8637_v38  ;;  %v2550_v0 = vrot.slane %v2150_v22, %v8637_v38 }
 0x1fe   : > { %v6800_v51 = vpop.xlane.xlu0 %1851 }
 0x201   : > { %v6802_v16 = vpop.xlane.xlu1 %2046 }
 0x202   : > { %8632 = vst [vmem:[#allocation79_spill] sm:$0xff] %v6802_v16  ;;  %v6804_v50 = vpop.xlane.xlu0 %2043 }
 0x203   : > { %8633 = vst [vmem:[#allocation80_spill] sm:$0xff] %v6804_v50  ;;  %v8638_v50 = vld [vmem:[#allocation8_spill] sm:$0xff] }
 0x204   : > { %v2473_v57 = vrot.slane %v5528_v14, %v8638_v50 }
 0x205   : > { %v6806_v21 = vpop.xlane.xlu1 %1848 }
 0x206   : > { %v6808_v39 = vpop.xlane.xlu0 %1845 }
 0x209   : > { %v6810_v10 = vpop.xlane.xlu1 %2040 }
 0x20a   : > { %8634 = vst [vmem:[#allocation81_spill] sm:$0xff] %v6810_v10  ;;  %v6814_v28 = vpop.xlane.xlu0 %2037 }
 0x20b   : > { %8636 = vst [vmem:[#allocation10_spill] sm:$0xff] %v6814_v28  ;;  %v2487_v28 = vrot.slane %v5528_v14, %v8642_v47 }
 0x20d   : > { %2482 = vbcast.lane.b32.xlu1 %v2480_v23, 256  ;;  %v6816_v60 = vpop.xlane.xlu1 %1866 }
 0x20e   : > { %v6819_v16 = vpop.xlane.xlu0 %1863 }
 0x211   : > { %2496 = vbcast.lane.b32.xlu1 %v2494_v5, 256  ;;  %v6822_v1 = vpop.xlane.xlu1 %2058  ;;  %v2501_v5 = vrot.slane %v5528_v14, %v8644_v36 }
 0x212   : > { %8639 = vst [vmem:[#allocation12_spill] sm:$0xff] %v6822_v1  ;;  %v6825_v10 = vpop.xlane.xlu0 %2055 }
 0x213   : > { %8641 = vst [vmem:[#allocation8_spill] sm:$0xff] %v6825_v10  ;;  %2475 = vbcast.lane.b32.xlu0 %v2473_v57, 256  ;;  %v2536_v10 = vrot.slane %v2150_v22, %v8635_v18  ;;  %v8647_v57 = vld [vmem:[#allocation7_spill] sm:$0xff] }
 0x215   : > { %2510 = vbcast.lane.b32.xlu1 %v2508_v25, 256  ;;  %v6829_v23 = vpop.xlane.xlu1 %1860  ;;  %v2515_v25 = vrot.slane %v2150_v22, %v8647_v57 }
 0x216   : > { %v6832_v17 = vpop.xlane.xlu0 %1857 }
 0x217   : > { %2489 = vbcast.lane.b32.xlu0 %v2487_v28, 256  ;;  %v2564_v28 = vrot.slane %v2150_v22, %v8640_v45 }
 0x219   : > { %2524 = vbcast.lane.b32.xlu1 %v2522_v62, 256  ;;  %v6835_v1 = vpop.xlane.xlu1 %2052  ;;  %v2529_v62 = vrot.slane %v2150_v22, %v8638_v50 }
 0x21a   : > { %8645 = vst [vmem:[#allocation13_spill] sm:$0xff] %v6835_v1  ;;  %v6838_v52 = vpop.xlane.xlu0 %2049 }
 0x21b   : > { %8646 = vst [vmem:[#allocation9_spill] sm:$0xff] %v6838_v52  ;;  %2503 = vbcast.lane.b32.xlu0 %v2501_v5, 256  ;;  %v2151_v5 = vld [vmem:[%s5709_s16 + $0x38] sm:$0xff] }
 0x21c   : > { %v2578_v41 = vrot.slane %v2151_v5, %v8643_v9 }
 0x21d   : > { %2538 = vbcast.lane.b32.xlu1 %v2536_v10, 256  ;;  %v6841_v63 = vpop.xlane.xlu1 %1878  ;;  %v2543_v10 = vrot.slane %v2150_v22, %v8642_v47 }
 0x21e   : > { %8648 = vst [vmem:[#allocation6_spill] sm:$0xff] %v6841_v63  ;;  %v6844_v43 = vpop.xlane.xlu0 %1875  ;;  %v2606_v63 = vrot.slane %v2151_v5, %v8637_v38 }
 0x21f   : > { %2517 = vbcast.lane.b32.xlu0 %v2515_v25, 256 }
 0x221   : > { %2552 = vbcast.lane.b32.xlu1 %v2550_v0, 256  ;;  %v6847_v14 = vpop.xlane.xlu1 %2070  ;;  %v2557_v0 = vrot.slane %v2150_v22, %v8644_v36 }
 0x222   : > { %8649 = vst [vmem:[#allocation11_spill] sm:$0xff] %v6847_v14  ;;  %v6850_v1 = vpop.xlane.xlu0 %2067  ;;  %v2592_v14 = vrot.slane %v2151_v5, %v8635_v18 }
 0x223   : > { %8650 = vst [vmem:[#allocation7_spill] sm:$0xff] %v6850_v1  ;;  %2531 = vbcast.lane.b32.xlu0 %v2529_v62, 256  ;;  %v2571_v62 = vrot.slane %v2151_v5, %v8647_v57 }
 0x225   : > { %2566 = vbcast.lane.b32.xlu1 %v2564_v28, 256  ;;  %v6854_v52 = vpop.xlane.xlu1 %1872 }
 0x226   : > { %v6857_v30 = vpop.xlane.xlu0 %1869 }
 0x227   : > { %2545 = vbcast.lane.b32.xlu0 %v2543_v10, 256  ;;  %v2620_v10 = vrot.slane %v2151_v5, %v8640_v45 }
 0x229   : > { %2580 = vbcast.lane.b32.xlu1 %v2578_v41, 256  ;;  %v6860_v25 = vpop.xlane.xlu1 %2064  ;;  %v2585_v41 = vrot.slane %v2151_v5, %v8638_v50 }
 0x22a   : > { %8651 = vst [vmem:[#allocation82_spill] sm:$0xff] %v6860_v25  ;;  %v6863_v1 = vpop.xlane.xlu0 %2061 }
 0x22b   : > { %8652 = vst [vmem:[#allocation83_spill] sm:$0xff] %v6863_v1  ;;  %2559 = vbcast.lane.b32.xlu0 %v2557_v0, 256  ;;  %v2152_v0 = vld [vmem:[%s5709_s16 + $0x40] sm:$0xff] }
 0x22d   : > { %2594 = vbcast.lane.b32.xlu1 %v2592_v14, 256  ;;  %v6866_v28 = vpop.xlane.xlu1 %1890  ;;  %v2599_v14 = vrot.slane %v2151_v5, %v8642_v47 }
 0x22e   : > { %8653 = vst [vmem:[#allocation84_spill] sm:$0xff] %v6866_v28  ;;  %v6869_v56 = vpop.xlane.xlu0 %1887  ;;  %v2634_v28 = vrot.slane %v2152_v0, %v8643_v9 }
 0x22f   : > { %8654 = vst [vmem:[#allocation85_spill] sm:$0xff] %v6869_v56  ;;  %2573 = vbcast.lane.b32.xlu0 %v2571_v62, 256  ;;  %v5589_v62 = vmov 0  }
 0x230   : > { %5426 = vset.pattern.permute.xlu1 %v5589_v62  ;;  %5425 = vset.pattern.permute.xlu0 %v5589_v62 }
 0x231   : > { %2608 = vbcast.lane.b32.xlu1 %v2606_v63, 256  ;;  %v6872_v22 = vpop.xlane.xlu1 %2082  ;;  %v2613_v63 = vrot.slane %v2151_v5, %v8644_v36 }
 0x232   : > { %8655 = vst [vmem:[#allocation86_spill] sm:$0xff] %v6872_v22  ;;  %v6875_v25 = vpop.xlane.xlu0 %2079 }
 0x233   : > { %8656 = vst [vmem:[#allocation87_spill] sm:$0xff] %v6875_v25  ;;  %2587 = vbcast.lane.b32.xlu0 %v2585_v41, 256  ;;  %v2648_v41 = vrot.slane %v2152_v0, %v8635_v18 }
 0x235   : > { %2622 = vbcast.lane.b32.xlu1 %v2620_v10, 256  ;;  %v6879_v1 = vpop.xlane.xlu1 %1884  ;;  %v2627_v10 = vrot.slane %v2152_v0, %v8647_v57 }
 0x236   : > { %8657 = vst [vmem:[#allocation88_spill] sm:$0xff] %v6879_v1  ;;  %v6882_v56 = vpop.xlane.xlu0 %1881 }
 0x237   : > { %8658 = vst [vmem:[#allocation89_spill] sm:$0xff] %v6882_v56  ;;  %2601 = vbcast.lane.b32.xlu0 %v2599_v14, 256  ;;  %v2662_v14 = vrot.slane %v2152_v0, %v8637_v38 }
 0x239   : > { %2636 = vbcast.lane.b32.xlu1 %v2634_v28, 256  ;;  %v6885_v22 = vpop.xlane.xlu1 %2076  ;;  %v2641_v28 = vrot.slane %v2152_v0, %v8638_v50 }
 0x23a   : > { %8659 = vst [vmem:[#allocation90_spill] sm:$0xff] %v6885_v22  ;;  %v6888_v25 = vpop.xlane.xlu0 %2073  ;;  %v2676_v22 = vrot.slane %v2152_v0, %v8640_v45 }
 0x23b   : > { %8660 = vst [vmem:[#allocation91_spill] sm:$0xff] %v6888_v25  ;;  %2615 = vbcast.lane.b32.xlu0 %v2613_v63, 256  ;;  %v2153_v63 = vld [vmem:[%s5709_s16 + $0x48] sm:$0xff] }
 0x23d   : > { %2650 = vbcast.lane.b32.xlu1 %v2648_v41, 256  ;;  %v6891_v1 = vpop.xlane.xlu1 %1902  ;;  %v2655_v41 = vrot.slane %v2152_v0, %v8642_v47 }
 0x23e   : > { %8661 = vst [vmem:[#allocation92_spill] sm:$0xff] %v6891_v1  ;;  %v6894_v5 = vpop.xlane.xlu0 %1899  ;;  %v2690_v1 = vrot.slane %v2153_v63, %v8643_v9 }
 0x23f   : > { %8662 = vst [vmem:[#allocation93_spill] sm:$0xff] %v6894_v5  ;;  %2629 = vbcast.lane.b32.xlu0 %v2627_v10, 256  ;;  %v2669_v10 = vrot.slane %v2152_v0, %v8644_v36 }
 0x241   : > { %2664 = vbcast.lane.b32.xlu1 %v2662_v14, 256  ;;  %v6897_v62 = vpop.xlane.xlu1 %2094 }
 0x242   : > { %8663 = vst [vmem:[#allocation94_spill] sm:$0xff] %v6897_v62  ;;  %v6900_v56 = vpop.xlane.xlu0 %2091  ;;  %v2704_v62 = vrot.slane %v2153_v63, %v8635_v18 }
 0x243   : > { %8664 = vst [vmem:[#allocation95_spill] sm:$0xff] %v6900_v56  ;;  %2643 = vbcast.lane.b32.xlu0 %v2641_v28, 256 }
 0x245   : > { %2678 = vbcast.lane.b32.xlu1 %v2676_v22, 256  ;;  %v6904_v25 = vpop.xlane.xlu1 %1896  ;;  %v2683_v22 = vrot.slane %v2153_v63, %v8647_v57 }
 0x246   : > { %8665 = vst [vmem:[#allocation96_spill] sm:$0xff] %v6904_v25  ;;  %v6907_v5 = vpop.xlane.xlu0 %1893  ;;  %v2718_v25 = vrot.slane %v2153_v63, %v8637_v38 }
 0x247   : > { %8666 = vst [vmem:[#allocation97_spill] sm:$0xff] %v6907_v5  ;;  %2657 = vbcast.lane.b32.xlu0 %v2655_v41, 256  ;;  %v2732_v41 = vrot.slane %v2153_v63, %v8640_v45 }
 0x249   : > { %2692 = vbcast.lane.b32.xlu1 %v2690_v1, 256  ;;  %v6910_v14 = vpop.xlane.xlu1 %2088  ;;  %v2697_v1 = vrot.slane %v2153_v63, %v8638_v50 }
 0x24a   : > { %8667 = vst [vmem:[#allocation98_spill] sm:$0xff] %v6910_v14  ;;  %v6913_v56 = vpop.xlane.xlu0 %2085 }
 0x24b   : > { %8668 = vst [vmem:[#allocation99_spill] sm:$0xff] %v6913_v56  ;;  %2671 = vbcast.lane.b32.xlu0 %v2669_v10, 256  ;;  %v2154_v10 = vld [vmem:[%s5709_s16 + $0x50] sm:$0xff] }
 0x24d   : > { %2706 = vbcast.lane.b32.xlu1 %v2704_v62, 256  ;;  %v6916_v28 = vpop.xlane.xlu1 %1914  ;;  %v2711_v62 = vrot.slane %v2153_v63, %v8642_v47 }
 0x24e   : > { %8669 = vst [vmem:[#allocation100_spill] sm:$0xff] %v6916_v28  ;;  %v6919_v5 = vpop.xlane.xlu0 %1911  ;;  %v2746_v28 = vrot.slane %v2154_v10, %v8643_v9 }
 0x24f   : > { %8670 = vst [vmem:[#allocation101_spill] sm:$0xff] %v6919_v5  ;;  %2685 = vbcast.lane.b32.xlu0 %v2683_v22, 256 }
 0x251   : > { %2720 = vbcast.lane.b32.xlu1 %v2718_v25, 256  ;;  %v6922_v0 = vpop.xlane.xlu1 %2106  ;;  %v2725_v25 = vrot.slane %v2153_v63, %v8644_v36  ;;  %v2753_v63 = vrot.slane %v2154_v10, %v8638_v50 }
 0x252   : > { %8671 = vst [vmem:[#allocation102_spill] sm:$0xff] %v6922_v0  ;;  %v6925_v14 = vpop.xlane.xlu0 %2103  ;;  %v2760_v0 = vrot.slane %v2154_v10, %v8635_v18 }
 0x253   : > { %8672 = vst [vmem:[#allocation103_spill] sm:$0xff] %v6925_v14  ;;  %2699 = vbcast.lane.b32.xlu0 %v2697_v1, 256  ;;  %v2739_v1 = vrot.slane %v2154_v10, %v8647_v57 }
 0x255   : > { %2734 = vbcast.lane.b32.xlu1 %v2732_v41, 256  ;;  %v6929_v56 = vpop.xlane.xlu1 %1908 }
 0x256   : > { %8673 = vst [vmem:[#allocation104_spill] sm:$0xff] %v6929_v56  ;;  %v6932_v5 = vpop.xlane.xlu0 %1905  ;;  %v2774_v56 = vrot.slane %v2154_v10, %v8637_v38 }
 0x257   : > { %8674 = vst [vmem:[#allocation105_spill] sm:$0xff] %v6932_v5  ;;  %2713 = vbcast.lane.b32.xlu0 %v2711_v62, 256  ;;  %v2788_v62 = vrot.slane %v2154_v10, %v8640_v45 }
 0x259   : > { %2748 = vbcast.lane.b32.xlu1 %v2746_v28, 256  ;;  %v6935_v22 = vpop.xlane.xlu1 %2100 }
 0x25a   : > { %8675 = vst [vmem:[#allocation106_spill] sm:$0xff] %v6935_v22  ;;  %v6938_v14 = vpop.xlane.xlu0 %2097 }
 0x25b   : > { %8676 = vst [vmem:[#allocation107_spill] sm:$0xff] %v6938_v14  ;;  %2727 = vbcast.lane.b32.xlu0 %v2725_v25, 256  ;;  %v2155_v25 = vld [vmem:[%s5709_s16 + $0x58] sm:$0xff] }
 0x25d   : > { %2762 = vbcast.lane.b32.xlu1 %v2760_v0, 256  ;;  %v6941_v41 = vpop.xlane.xlu1 %1926  ;;  %v2767_v0 = vrot.slane %v2154_v10, %v8642_v47 }
 0x25e   : > { %8677 = vst [vmem:[#allocation108_spill] sm:$0xff] %v6941_v41  ;;  %v6944_v5 = vpop.xlane.xlu0 %1923  ;;  %v2802_v41 = vrot.slane %v2155_v25, %v8643_v9 }
 0x25f   : > { %8678 = vst [vmem:[#allocation109_spill] sm:$0xff] %v6944_v5  ;;  %2741 = vbcast.lane.b32.xlu0 %v2739_v1, 256 }
 0x261   : > { %2776 = vbcast.lane.b32.xlu1 %v2774_v56, 256  ;;  %v6947_v28 = vpop.xlane.xlu1 %2118  ;;  %v2781_v56 = vrot.slane %v2154_v10, %v8644_v36  ;;  %v2809_v10 = vrot.slane %v2155_v25, %v8638_v50 }
 0x262   : > { %8679 = vst [vmem:[#allocation110_spill] sm:$0xff] %v6947_v28  ;;  %v6950_v22 = vpop.xlane.xlu0 %2115  ;;  %v2816_v28 = vrot.slane %v2155_v25, %v8635_v18 }
 0x263   : > { %8680 = vst [vmem:[#allocation111_spill] sm:$0xff] %v6950_v22  ;;  %2755 = vbcast.lane.b32.xlu0 %v2753_v63, 256  ;;  %v2795_v63 = vrot.slane %v2155_v25, %v8647_v57 }
 0x265   : > { %2790 = vbcast.lane.b32.xlu1 %v2788_v62, 256  ;;  %v6954_v14 = vpop.xlane.xlu1 %1920 }
 0x266   : > { %8681 = vst [vmem:[#allocation112_spill] sm:$0xff] %v6954_v14  ;;  %v6957_v5 = vpop.xlane.xlu0 %1917  ;;  %v2830_v14 = vrot.slane %v2155_v25, %v8637_v38 }
 0x267   : > { %8682 = vst [vmem:[#allocation113_spill] sm:$0xff] %v6957_v5  ;;  %2769 = vbcast.lane.b32.xlu0 %v2767_v0, 256  ;;  %v2844_v0 = vrot.slane %v2155_v25, %v8640_v45 }
 0x269   : > { %2804 = vbcast.lane.b32.xlu1 %v2802_v41, 256  ;;  %v6960_v1 = vpop.xlane.xlu1 %2112 }
 0x26a   : > { %8683 = vst [vmem:[#allocation114_spill] sm:$0xff] %v6960_v1  ;;  %v6963_v22 = vpop.xlane.xlu0 %2109 }
 0x26b   : > { %8684 = vst [vmem:[#allocation115_spill] sm:$0xff] %v6963_v22  ;;  %2783 = vbcast.lane.b32.xlu0 %v2781_v56, 256  ;;  %v2156_v56 = vld [vmem:[%s5709_s16 + $0x60] sm:$0xff] }
 0x26d   : > { %2818 = vbcast.lane.b32.xlu1 %v2816_v28, 256  ;;  %v6966_v62 = vpop.xlane.xlu1 %1938  ;;  %v2823_v28 = vrot.slane %v2155_v25, %v8642_v47 }
 0x26e   : > { %8685 = vst [vmem:[#allocation116_spill] sm:$0xff] %v6966_v62  ;;  %v6969_v5 = vpop.xlane.xlu0 %1935  ;;  %v2858_v62 = vrot.slane %v2156_v56, %v8643_v9 }
 0x26f   : > { %8686 = vst [vmem:[#allocation117_spill] sm:$0xff] %v6969_v5  ;;  %2797 = vbcast.lane.b32.xlu0 %v2795_v63, 256 }
 0x271   : > { %2832 = vbcast.lane.b32.xlu1 %v2830_v14, 256  ;;  %v6972_v41 = vpop.xlane.xlu1 %2130  ;;  %v2837_v14 = vrot.slane %v2155_v25, %v8644_v36  ;;  %v2865_v25 = vrot.slane %v2156_v56, %v8638_v50 }
 0x272   : > { %8687 = vst [vmem:[#allocation118_spill] sm:$0xff] %v6972_v41  ;;  %v6975_v1 = vpop.xlane.xlu0 %2127  ;;  %v2872_v41 = vrot.slane %v2156_v56, %v8635_v18 }
 0x273   : > { %8688 = vst [vmem:[#allocation119_spill] sm:$0xff] %v6975_v1  ;;  %2811 = vbcast.lane.b32.xlu0 %v2809_v10, 256  ;;  %v2851_v10 = vrot.slane %v2156_v56, %v8647_v57 }
 0x275   : > { %2846 = vbcast.lane.b32.xlu1 %v2844_v0, 256  ;;  %v6979_v22 = vpop.xlane.xlu1 %1932 }
 0x276   : > { %8689 = vst [vmem:[#allocation120_spill] sm:$0xff] %v6979_v22  ;;  %v6982_v5 = vpop.xlane.xlu0 %1929  ;;  %v2886_v22 = vrot.slane %v2156_v56, %v8637_v38 }
 0x277   : > { %8690 = vst [vmem:[#allocation121_spill] sm:$0xff] %v6982_v5  ;;  %2825 = vbcast.lane.b32.xlu0 %v2823_v28, 256  ;;  %v2900_v28 = vrot.slane %v2156_v56, %v8640_v45 }
 0x279   : > { %2860 = vbcast.lane.b32.xlu1 %v2858_v62, 256  ;;  %v6985_v63 = vpop.xlane.xlu1 %2124 }
 0x27a   : > { %8691 = vst [vmem:[#allocation122_spill] sm:$0xff] %v6985_v63  ;;  %v6988_v1 = vpop.xlane.xlu0 %2121 }
 0x27b   : > { %8692 = vst [vmem:[#allocation123_spill] sm:$0xff] %v6988_v1  ;;  %2839 = vbcast.lane.b32.xlu0 %v2837_v14, 256  ;;  %v2157_v14 = vld [vmem:[%s5709_s16 + $0x68] sm:$0xff] }
 0x27d   : > { %2874 = vbcast.lane.b32.xlu1 %v2872_v41, 256  ;;  %v6991_v0 = vpop.xlane.xlu1 %1950  ;;  %v2879_v41 = vrot.slane %v2156_v56, %v8642_v47 }
 0x27e   : > { %8693 = vst [vmem:[#allocation124_spill] sm:$0xff] %v6991_v0  ;;  %v6994_v5 = vpop.xlane.xlu0 %1947  ;;  %v2914_v0 = vrot.slane %v2157_v14, %v8643_v9 }
 0x27f   : > { %8694 = vst [vmem:[#allocation125_spill] sm:$0xff] %v6994_v5  ;;  %2853 = vbcast.lane.b32.xlu0 %v2851_v10, 256 }
 0x281   : > { %2888 = vbcast.lane.b32.xlu1 %v2886_v22, 256  ;;  %v6997_v62 = vpop.xlane.xlu1 %2142  ;;  %v2893_v22 = vrot.slane %v2156_v56, %v8644_v36  ;;  %v2921_v56 = vrot.slane %v2157_v14, %v8638_v50 }
 0x282   : > { %8695 = vst [vmem:[#allocation126_spill] sm:$0xff] %v6997_v62  ;;  %v7000_v63 = vpop.xlane.xlu0 %2139  ;;  %v2928_v62 = vrot.slane %v2157_v14, %v8635_v18 }
 0x283   : > { %8696 = vst [vmem:[#allocation127_spill] sm:$0xff] %v7000_v63  ;;  %2867 = vbcast.lane.b32.xlu0 %v2865_v25, 256  ;;  %v2907_v25 = vrot.slane %v2157_v14, %v8647_v57 }
 0x285   : > { %2902 = vbcast.lane.b32.xlu1 %v2900_v28, 256  ;;  %v7004_v1 = vpop.xlane.xlu1 %1944 }
 0x286   : > { %8697 = vst [vmem:[#allocation128_spill] sm:$0xff] %v7004_v1  ;;  %v7007_v5 = vpop.xlane.xlu0 %1941  ;;  %v2942_v1 = vrot.slane %v2157_v14, %v8637_v38 }
 0x287   : > { %8698 = vst [vmem:[#allocation129_spill] sm:$0xff] %v7007_v5  ;;  %2881 = vbcast.lane.b32.xlu0 %v2879_v41, 256  ;;  %v2956_v41 = vrot.slane %v2157_v14, %v8640_v45 }
 0x289   : > { %2916 = vbcast.lane.b32.xlu1 %v2914_v0, 256  ;;  %v7010_v10 = vpop.xlane.xlu1 %2136 }
 0x28a   : > { %8699 = vst [vmem:[#allocation130_spill] sm:$0xff] %v7010_v10  ;;  %v7013_v63 = vpop.xlane.xlu0 %2133 }
 0x28b   : > { %8700 = vst [vmem:[#allocation131_spill] sm:$0xff] %v7013_v63  ;;  %2895 = vbcast.lane.b32.xlu0 %v2893_v22, 256  ;;  %v2158_v22 = vld [vmem:[%s5709_s16 + $0x70] sm:$0xff] }
 0x28d   : > { %2930 = vbcast.lane.b32.xlu1 %v2928_v62, 256  ;;  %v7016_v28 = vpop.permute.xlu1 %2482  ;;  %v2935_v62 = vrot.slane %v2157_v14, %v8642_v47 }
 0x28e   : > { %8701 = vst [vmem:[#allocation132_spill] sm:$0xff] %v7016_v28  ;;  %v7019_v5 = vpop.permute.xlu0 %2475  ;;  %v2970_v28 = vrot.slane %v2158_v22, %v8643_v9 }
 0x28f   : > { %8702 = vst [vmem:[#allocation133_spill] sm:$0xff] %v7019_v5  ;;  %2909 = vbcast.lane.b32.xlu0 %v2907_v25, 256 }
 0x291   : > { %2944 = vbcast.lane.b32.xlu1 %v2942_v1, 256  ;;  %v7022_v0 = vpop.permute.xlu1 %2496  ;;  %v2949_v1 = vrot.slane %v2157_v14, %v8644_v36  ;;  %v2977_v14 = vrot.slane %v2158_v22, %v8638_v50 }
 0x292   : > { %8703 = vst [vmem:[#allocation134_spill] sm:$0xff] %v7022_v0  ;;  %v7025_v10 = vpop.permute.xlu0 %2489  ;;  %v2984_v0 = vrot.slane %v2158_v22, %v8635_v18 }
 0x293   : > { %8704 = vst [vmem:[#allocation135_spill] sm:$0xff] %v7025_v10  ;;  %2923 = vbcast.lane.b32.xlu0 %v2921_v56, 256  ;;  %v2963_v56 = vrot.slane %v2158_v22, %v8647_v57 }
 0x295   : > { %2958 = vbcast.lane.b32.xlu1 %v2956_v41, 256  ;;  %v7029_v63 = vpop.permute.xlu1 %2510 }
 0x296   : > { %8705 = vst [vmem:[#allocation136_spill] sm:$0xff] %v7029_v63  ;;  %v7032_v5 = vpop.permute.xlu0 %2503  ;;  %v2998_v63 = vrot.slane %v2158_v22, %v8637_v38 }
 0x297   : > { %8706 = vst [vmem:[#allocation137_spill] sm:$0xff] %v7032_v5  ;;  %2937 = vbcast.lane.b32.xlu0 %v2935_v62, 256  ;;  %v3012_v62 = vrot.slane %v2158_v22, %v8640_v45 }
 0x299   : > { %2972 = vbcast.lane.b32.xlu1 %v2970_v28, 256  ;;  %v7035_v25 = vpop.permute.xlu1 %2524 }
 0x29a   : > { %8707 = vst [vmem:[#allocation138_spill] sm:$0xff] %v7035_v25  ;;  %v7038_v10 = vpop.permute.xlu0 %2517 }
 0x29b   : > { %8708 = vst [vmem:[#allocation139_spill] sm:$0xff] %v7038_v10  ;;  %2951 = vbcast.lane.b32.xlu0 %v2949_v1, 256  ;;  %v2159_v1 = vld [vmem:[%s5709_s16 + $0x78] sm:$0xff] }
 0x29c   : > { %v3026_v10 = vrot.slane %v2159_v1, %v8643_v9  ;;  %v3054_v9 = vrot.slane %v2159_v1, %v8637_v38  ;;  %v8717_v38 = vld [vmem:[#allocation14_spill] sm:$0xff] }
 0x29d   : > { %2986 = vbcast.lane.b32.xlu1 %v2984_v0, 256  ;;  %v7041_v41 = vpop.permute.xlu1 %2538  ;;  %v2991_v0 = vrot.slane %v2158_v22, %v8642_v47 }
 0x29e   : > { %8709 = vst [vmem:[#allocation140_spill] sm:$0xff] %v7041_v41  ;;  %v7044_v5 = vpop.permute.xlu0 %2531 }
 0x29f   : > { %8710 = vst [vmem:[#allocation141_spill] sm:$0xff] %v7044_v5  ;;  %2965 = vbcast.lane.b32.xlu0 %v2963_v56, 256 }
 0x2a1   : > { %3000 = vbcast.lane.b32.xlu1 %v2998_v63, 256  ;;  %v7047_v28 = vpop.permute.xlu1 %2552  ;;  %v3005_v63 = vrot.slane %v2158_v22, %v8644_v36  ;;  %v3033_v22 = vrot.slane %v2159_v1, %v8638_v50  ;;  %v3061_v50 = vrot.slane %v2159_v1, %v8644_v36 }
 0x2a2   : > { %8711 = vst [vmem:[#allocation142_spill] sm:$0xff] %v7047_v28  ;;  %v7050_v25 = vpop.permute.xlu0 %2545  ;;  %v3040_v28 = vrot.slane %v2159_v1, %v8635_v18  ;;  %v3068_v18 = vrot.slane %v2159_v1, %v8640_v45 }
 0x2a3   : > { %8712 = vst [vmem:[#allocation143_spill] sm:$0xff] %v7050_v25  ;;  %2979 = vbcast.lane.b32.xlu0 %v2977_v14, 256  ;;  %v3019_v14 = vrot.slane %v2159_v1, %v8647_v57  ;;  %v3047_v57 = vrot.slane %v2159_v1, %v8642_v47  ;;  %v8719_v47 = vld [vmem:[#allocation16_spill] sm:$0xff]  ;;  %v8721_v1 = vld [vmem:[#allocation17_spill] sm:$0xff] }
 0x2a5   : > { %3014 = vbcast.lane.b32.xlu1 %v3012_v62, 256  ;;  %v7054_v41 = vpop.permute.xlu1 %2566 }
 0x2a6   : > { %8713 = vst [vmem:[#allocation144_spill] sm:$0xff] %v7054_v41  ;;  %v7057_v5 = vpop.permute.xlu0 %2559 }
 0x2a7   : > { %2993 = vbcast.lane.b32.xlu0 %v2991_v0, 256 }
 0x2a9   : > { %3028 = vbcast.lane.b32.xlu1 %v3026_v10, 256  ;;  %v7060_v56 = vpop.permute.xlu1 %2580 }
 0x2aa   : > { %v7063_v25 = vpop.permute.xlu0 %2573 }
 0x2ab   : > { %3007 = vbcast.lane.b32.xlu0 %v3005_v63, 256 }
 0x2ad   : > { %3042 = vbcast.lane.b32.xlu1 %v3040_v28, 256  ;;  %v7066_v62 = vpop.permute.xlu1 %2594 }
 0x2ae   : > { %v7069_v41 = vpop.permute.xlu0 %2587 }
 0x2af   : > { %3021 = vbcast.lane.b32.xlu0 %v3019_v14, 256  ;;  %v3201_v14 = vmul.f32 %v8717_v38, %v6516_v58  ;;  %v8720_v58 = vld [vmem:[#allocation18_spill] sm:$0xff] }
 0x2b0   : > { %v3204_v36 = vmul.f32 %v8720_v58, %v6552_v2 }
 0x2b1   : > { %3056 = vbcast.lane.b32.xlu1 %v3054_v9, 256  ;;  %v7072_v10 = vpop.permute.xlu1 %2608 }
 0x2b2   : > { %8714 = vst [vmem:[#allocation145_spill] sm:$0xff] %v7072_v10  ;;  %v7075_v0 = vpop.permute.xlu0 %2601 }
 0x2b3   : > { %3035 = vbcast.lane.b32.xlu0 %v3033_v22, 256  ;;  %v8718_v22 = vld [vmem:[#allocation15_spill] sm:$0xff] }
 0x2b4   : > { %v3202_v10 = vmul.f32 %v8718_v22, %v6477_v32 }
 0x2b5   : > { %3070 = vbcast.lane.b32.xlu1 %v3068_v18, 256  ;;  %v7078_v28 = vpop.permute.xlu1 %2622  ;;  %v3200_v18 = vmul.f32 %v8719_v47, %v6493_v15  ;;  %v8724_v47 = vld [vmem:[#allocation22_spill] sm:$0xff] }
 0x2b6   : > { %8715 = vst [vmem:[#allocation146_spill] sm:$0xff] %v7078_v28  ;;  %v7080_v63 = vpop.permute.xlu0 %2615 }
 0x2b7   : > { %8716 = vst [vmem:[#allocation147_spill] sm:$0xff] %v7080_v63  ;;  %3049 = vbcast.lane.b32.xlu0 %v3047_v57, 256  ;;  %v3203_v57 = vmul.f32 %v8721_v1, %v6488_v20  ;;  %v3208_v20 = vmul.f32 %v8724_v47, %v6600_v35  ;;  %v8726_v1 = vld [vmem:[#allocation24_spill] sm:$0xff] }
 0x2b9   : > { %v7085_v9 = vpop.permute.xlu1 %2636  ;;  %3460 = vperm.xlu1 %5426, %v3201_v14   ;;  %v8722_v14 = vld [vmem:[#allocation20_spill] sm:$0xff] }
 0x2ba   : > { %v7087_v45 = vpop.permute.xlu0 %2629  ;;  %v3206_v15 = vmul.f32 %v8722_v14, %v6529_v24 }
 0x2bb   : > { %3063 = vbcast.lane.b32.xlu0 %v3061_v50, 256 }
 0x2bd   : > { %v7093_v28 = vpop.permute.xlu1 %2650  ;;  %3463 = vperm.xlu1 %5426, %v3202_v10   ;;  %v8723_v10 = vld [vmem:[#allocation19_spill] sm:$0xff] }
 0x2be   : > { %v7095_v63 = vpop.permute.xlu0 %2643  ;;  %v3205_v50 = vmul.f32 %v8723_v10, %v6548_v11  ;;  %v3210_v11 = vmul.f32 %v8726_v1, %v6577_v40  ;;  %v8728_v10 = vld [vmem:[#allocation26_spill] sm:$0xff] }
 0x2bf   : > { %3457 = vperm.xlu0 %5425, %v3200_v18   ;;  %v8725_v18 = vld [vmem:[#allocation21_spill] sm:$0xff] }
 0x2c0   : > { %v3207_v58 = vmul.f32 %v8725_v18, %v6525_v48  ;;  %v3212_v48 = vmul.f32 %v8728_v10, %v6648_v19  ;;  %v8730_v18 = vld [vmem:[#allocation28_spill] sm:$0xff] }
 0x2c1   : > { %v7101_v38 = vpop.permute.xlu1 %2664  ;;  %3469 = vperm.xlu1 %5426, %v3204_v36  }
 0x2c2   : > { %v7103_v32 = vpop.permute.xlu0 %2657 }
 0x2c3   : > { %3466 = vperm.xlu0 %5425, %v3203_v57   ;;  %v8727_v57 = vld [vmem:[#allocation23_spill] sm:$0xff] }
 0x2c4   : > { %v3209_v14 = vmul.f32 %v8727_v57, %v6596_v13  ;;  %v3214_v13 = vmul.f32 %v8730_v18, %v6625_v37  ;;  %v8732_v57 = vld [vmem:[#allocation30_spill] sm:$0xff] }
 0x2c5   : > { %v7109_v22 = vpop.permute.xlu1 %2678  ;;  %3475 = vperm.xlu1 %5426, %v3206_v15  }
 0x2c6   : > { %v7111_v2 = vpop.permute.xlu0 %2671 }
 0x2c7   : > { %3472 = vperm.xlu0 %5425, %v3205_v50   ;;  %v8729_v50 = vld [vmem:[#allocation25_spill] sm:$0xff] }
 0x2c8   : > { %v3211_v47 = vmul.f32 %v8729_v50, %v6573_v7  ;;  %v3216_v7 = vmul.f32 %v8732_v57, %v6696_v12  ;;  %v8734_v50 = vld [vmem:[#allocation32_spill] sm:$0xff] }
 0x2c9   : > { %v7117_v36 = vpop.permute.xlu1 %2692  ;;  %3481 = vperm.xlu1 %5426, %v3208_v20  }
 0x2ca   : > { %v7119_v24 = vpop.permute.xlu0 %2685 }
 0x2cb   : > { %3478 = vperm.xlu0 %5425, %v3207_v58   ;;  %v8731_v58 = vld [vmem:[#allocation27_spill] sm:$0xff] }
 0x2cc   : > { %v3213_v1 = vmul.f32 %v8731_v58, %v6644_v46  ;;  %v3218_v46 = vmul.f32 %v8734_v50, %v6673_v27  ;;  %v8736_v58 = vld [vmem:[#allocation34_spill] sm:$0xff] }
 0x2cd   : > { %v7125_v15 = vpop.permute.xlu1 %2706  ;;  %3487 = vperm.xlu1 %5426, %v3210_v11  }
 0x2ce   : > { %v7127_v35 = vpop.permute.xlu0 %2699 }
 0x2cf   : > { %3484 = vperm.xlu0 %5425, %v3209_v14   ;;  %v8733_v14 = vld [vmem:[#allocation29_spill] sm:$0xff] }
 0x2d0   : > { %v3215_v10 = vmul.f32 %v8733_v14, %v6621_v33  ;;  %v3220_v33 = vmul.f32 %v8736_v58, %v6744_v34  ;;  %v8738_v14 = vld [vmem:[#allocation36_spill] sm:$0xff] }
 0x2d1   : > { %v7133_v20 = vpop.permute.xlu1 %2720  ;;  %3493 = vperm.xlu1 %5426, %v3212_v48  }
 0x2d2   : > { %v7135_v40 = vpop.permute.xlu0 %2713 }
 0x2d3   : > { %3490 = vperm.xlu0 %5425, %v3211_v47   ;;  %v8735_v47 = vld [vmem:[#allocation31_spill] sm:$0xff] }
 0x2d4   : > { %v3217_v18 = vmul.f32 %v8735_v47, %v6692_v31  ;;  %v3222_v31 = vmul.f32 %v8738_v14, %v6721_v8  ;;  %v8740_v47 = vld [vmem:[#allocation38_spill] sm:$0xff] }
 0x2d5   : > { %v7141_v11 = vpop.permute.xlu1 %2734  ;;  %3499 = vperm.xlu1 %5426, %v3214_v13  }
 0x2d6   : > { %v7143_v19 = vpop.permute.xlu0 %2727 }
 0x2d7   : > { %3496 = vperm.xlu0 %5425, %v3213_v1   ;;  %v8737_v1 = vld [vmem:[#allocation33_spill] sm:$0xff] }
 0x2d8   : > { %v3219_v57 = vmul.f32 %v8737_v1, %v6669_v4  ;;  %v3224_v4 = vmul.f32 %v8740_v47, %v6786_v55  ;;  %v8742_v1 = vld [vmem:[#allocation41_spill] sm:$0xff] }
 0x2d9   : > { %v7149_v48 = vpop.permute.xlu1 %2748  ;;  %3505 = vperm.xlu1 %5426, %v3216_v7  }
 0x2da   : > { %v7151_v37 = vpop.permute.xlu0 %2741 }
 0x2db   : > { %3502 = vperm.xlu0 %5425, %v3215_v10   ;;  %v8739_v10 = vld [vmem:[#allocation35_spill] sm:$0xff] }
 0x2dc   : > { %v3221_v50 = vmul.f32 %v8739_v10, %v6740_v3  ;;  %v3226_v3 = vmul.f32 %v8742_v1, %v6769_v26  ;;  %v8744_v10 = vld [vmem:[#allocation46_spill] sm:$0xff] }
 0x2dd   : > { %v7157_v13 = vpop.permute.xlu1 %2762  ;;  %3511 = vperm.xlu1 %5426, %v3218_v46  }
 0x2de   : > { %v7159_v12 = vpop.permute.xlu0 %2755 }
 0x2df   : > { %3508 = vperm.xlu0 %5425, %v3217_v18   ;;  %v8741_v18 = vld [vmem:[#allocation37_spill] sm:$0xff] }
 0x2e0   : > { %v3223_v58 = vmul.f32 %v8741_v18, %v6717_v42  ;;  %v3228_v42 = vmul.f32 %v8744_v10, %v6808_v39  ;;  %v8746_v18 = vld [vmem:[#allocation53_spill] sm:$0xff] }
 0x2e1   : > { %v7165_v7 = vpop.permute.xlu1 %2776  ;;  %3517 = vperm.xlu1 %5426, %v3220_v33  }
 0x2e2   : > { %v7167_v27 = vpop.permute.xlu0 %2769 }
 0x2e3   : > { %3514 = vperm.xlu0 %5425, %v3219_v57   ;;  %v8743_v57 = vld [vmem:[#allocation39_spill] sm:$0xff] }
 0x2e4   : > { %v3225_v14 = vmul.f32 %v8743_v57, %v6784_v29  ;;  %v3230_v29 = vmul.f32 %v8746_v18, %v6800_v51  ;;  %v8748_v57 = vld [vmem:[#allocation59_spill] sm:$0xff] }
 0x2e5   : > { %v7173_v46 = vpop.permute.xlu1 %2790  ;;  %3523 = vperm.xlu1 %5426, %v3222_v31  }
 0x2e6   : > { %v7175_v34 = vpop.permute.xlu0 %2783 }
 0x2e7   : > { %3520 = vperm.xlu0 %5425, %v3221_v50   ;;  %v8745_v50 = vld [vmem:[#allocation42_spill] sm:$0xff] }
 0x2e8   : > { %v3227_v47 = vmul.f32 %v8745_v50, %v6765_v61  ;;  %v3232_v61 = vmul.f32 %v8748_v57, %v6832_v17  ;;  %v8750_v50 = vld [vmem:[#allocation60_spill] sm:$0xff]  ;;  %v8752_v57 = vld [vmem:[#allocation67_spill] sm:$0xff] }
 0x2e9   : > { %v7181_v33 = vpop.permute.xlu1 %2804  ;;  %3529 = vperm.xlu1 %5426, %v3224_v4  }
 0x2ea   : > { %v7183_v8 = vpop.permute.xlu0 %2797 }
 0x2eb   : > { %3526 = vperm.xlu0 %5425, %v3223_v58   ;;  %v8747_v58 = vld [vmem:[#allocation47_spill] sm:$0xff] }
 0x2ec   : > { %v3229_v1 = vmul.f32 %v8747_v58, %v6806_v21  ;;  %v3234_v21 = vmul.f32 %v6410_v49, %v6819_v16  ;;  %v3238_v16 = vmul.f32 %v6448_v6, %v6844_v43  ;;  %v8756_v43 = vld [vmem:[#allocation85_spill] sm:$0xff] }
 0x2ed   : > { %v7189_v31 = vpop.permute.xlu1 %2818  ;;  %3535 = vperm.xlu1 %5426, %v3226_v3  }
 0x2ee   : > { %v7191_v55 = vpop.permute.xlu0 %2811 }
 0x2ef   : > { %3532 = vperm.xlu0 %5425, %v3225_v14   ;;  %v8749_v14 = vld [vmem:[#allocation54_spill] sm:$0xff] }
 0x2f0   : > { %v3231_v10 = vmul.f32 %v8749_v14, %v6798_v59  ;;  %v3236_v59 = vmul.f32 %v6426_v54, %v6857_v30  ;;  %v8751_v30 = vld [vmem:[#allocation89_spill] sm:$0xff] }
 0x2f1   : > { %v7197_v4 = vpop.permute.xlu1 %2832  ;;  %3541 = vperm.xlu1 %5426, %v3228_v42  }
 0x2f2   : > { %v7199_v26 = vpop.permute.xlu0 %2825 }
 0x2f3   : > { %3538 = vperm.xlu0 %5425, %v3227_v47   ;;  %v3233_v47 = vmul.f32 %v8750_v50, %v6829_v23  ;;  %v3237_v23 = vmul.f32 %v6422_v53, %v6854_v52  ;;  %v8758_v52 = vld [vmem:[#allocation88_spill] sm:$0xff]  ;;  %v8759_v50 = vld [vmem:[#allocation66_spill] sm:$0xff] }
 0x2f5   : > { %v7205_v3 = vpop.permute.xlu1 %2846  ;;  %3547 = vperm.xlu1 %5426, %v3230_v29   ;;  %v3235_v29 = vmul.f32 %v6406_v44, %v6816_v60  ;;  %v3240_v44 = vmul.f32 %v8752_v57, %v8751_v30  ;;  %v8753_v60 = vld [vmem:[#allocation6_spill] sm:$0xff]  ;;  %v8763_v57 = vld [vmem:[#allocation84_spill] sm:$0xff] }
 0x2f6   : > { %v7207_v39 = vpop.permute.xlu0 %2839 }
 0x2f7   : > { %3544 = vperm.xlu0 %5425, %v3229_v1  }
 0x2f9   : > { %v7213_v42 = vpop.permute.xlu1 %2860  ;;  %3553 = vperm.xlu1 %5426, %v3232_v61   ;;  %v8754_v61 = vld [vmem:[#allocation65_spill] sm:$0xff] }
 0x2fa   : > { %v7215_v51 = vpop.permute.xlu0 %2853  ;;  %v3239_v14 = vmul.f32 %v8754_v61, %v8753_v60 }
 0x2fb   : > { %3550 = vperm.xlu0 %5425, %v3231_v10  }
 0x2fd   : > { %v7221_v18 = vpop.permute.xlu1 %2874  ;;  %3559 = vperm.xlu1 %5426, %v3234_v21   ;;  %v8757_v21 = vld [vmem:[#allocation133_spill] sm:$0xff] }
 0x2fe   : > { %v7223_v17 = vpop.permute.xlu0 %2867  ;;  %v3242_v53 = vmul.f32 %v8757_v21, %v8756_v43  ;;  %v8768_v21 = vld [vmem:[#allocation137_spill] sm:$0xff] }
 0x2ff   : > { %3556 = vperm.xlu0 %5425, %v3233_v47   ;;  %v3241_v47 = vmul.f32 %v8759_v50, %v8758_v52  ;;  %v8769_v50 = vld [vmem:[#allocation96_spill] sm:$0xff] }
 0x301   : > { %v7229_v58 = vpop.permute.xlu1 %2888  ;;  %3565 = vperm.xlu1 %5426, %v3236_v59  }
 0x302   : > { %v7231_v49 = vpop.permute.xlu0 %2881 }
 0x303   : > { %3562 = vperm.xlu0 %5425, %v3235_v29  }
 0x305   : > { %v7237_v1 = vpop.permute.xlu1 %2902  ;;  %3571 = vperm.xlu1 %5426, %v3238_v16   ;;  %v8761_v16 = vld [vmem:[#allocation97_spill] sm:$0xff] }
 0x306   : > { %v7239_v54 = vpop.permute.xlu0 %2895 }
 0x307   : > { %3568 = vperm.xlu0 %5425, %v3237_v23   ;;  %v8762_v23 = vld [vmem:[#allocation135_spill] sm:$0xff] }
 0x308   : > { %v3244_v30 = vmul.f32 %v8762_v23, %v8761_v16  ;;  %v8774_v23 = vld [vmem:[#allocation139_spill] sm:$0xff] }
 0x309   : > { %v7245_v10 = vpop.permute.xlu1 %2916  ;;  %3577 = vperm.xlu1 %5426, %v3240_v44   ;;  %v8764_v44 = vld [vmem:[#allocation132_spill] sm:$0xff] }
 0x30a   : > { %8755 = vst [vmem:[#allocation14_spill] sm:$0xff] %v7245_v10  ;;  %v7247_v6 = vpop.permute.xlu0 %2909  ;;  %v3243_v60 = vmul.f32 %v8764_v44, %v8763_v57  ;;  %v8775_v44 = vld [vmem:[#allocation92_spill] sm:$0xff] }
 0x30b   : > { %3574 = vperm.xlu0 %5425, %v3239_v14   ;;  %v8767_v14 = vld [vmem:[#allocation93_spill] sm:$0xff] }
 0x30c   : > { %v3246_v52 = vmul.f32 %v8768_v21, %v8767_v14  ;;  %v8780_v21 = vld [vmem:[#allocation141_spill] sm:$0xff] }
 0x30d   : > { %v7253_v59 = vpop.permute.xlu1 %2930  ;;  %3583 = vperm.xlu1 %5426, %v3242_v53   ;;  %v8770_v53 = vld [vmem:[#allocation134_spill] sm:$0xff] }
 0x30e   : > { %8760 = vst [vmem:[#allocation15_spill] sm:$0xff] %v7253_v59  ;;  %v7255_v29 = vpop.permute.xlu0 %2923  ;;  %v3245_v59 = vmul.f32 %v8770_v53, %v8769_v50  ;;  %v8781_v53 = vld [vmem:[#allocation104_spill] sm:$0xff] }
 0x30f   : > { %3580 = vperm.xlu0 %5425, %v3241_v47   ;;  %v8773_v47 = vld [vmem:[#allocation105_spill] sm:$0xff] }
 0x310   : > { %v3248_v57 = vmul.f32 %v8774_v23, %v8773_v47  ;;  %v8785_v23 = vld [vmem:[#allocation143_spill] sm:$0xff] }
 0x311   : > { %v7261_v61 = vpop.permute.xlu1 %2944  ;;  %3589 = vperm.xlu1 %5426, %v3244_v30   ;;  %v8776_v30 = vld [vmem:[#allocation136_spill] sm:$0xff] }
 0x312   : > { %8765 = vst [vmem:[#allocation16_spill] sm:$0xff] %v7261_v61  ;;  %v7263_v43 = vpop.permute.xlu0 %2937  ;;  %v3247_v61 = vmul.f32 %v8776_v30, %v8775_v44  ;;  %v8786_v30 = vld [vmem:[#allocation100_spill] sm:$0xff] }
 0x313   : > { %8766 = vst [vmem:[#allocation18_spill] sm:$0xff] %v7263_v43  ;;  %3586 = vperm.xlu0 %5425, %v3243_v60   ;;  %v8779_v60 = vld [vmem:[#allocation101_spill] sm:$0xff] }
 0x314   : > { %v3250_v50 = vmul.f32 %v8780_v21, %v8779_v60 }
 0x315   : > { %v7269_v10 = vpop.permute.xlu1 %2958  ;;  %3595 = vperm.xlu1 %5426, %v3246_v52   ;;  %v8782_v52 = vld [vmem:[#allocation138_spill] sm:$0xff] }
 0x316   : > { %8771 = vst [vmem:[#allocation17_spill] sm:$0xff] %v7269_v10  ;;  %v7271_v16 = vpop.permute.xlu0 %2951  ;;  %v3249_v10 = vmul.f32 %v8782_v52, %v8781_v53  ;;  %v8790_v53 = vld [vmem:[#allocation112_spill] sm:$0xff] }
 0x317   : > { %8772 = vst [vmem:[#allocation20_spill] sm:$0xff] %v7271_v16  ;;  %3592 = vperm.xlu0 %5425, %v3245_v59   ;;  %v8784_v59 = vld [vmem:[#allocation113_spill] sm:$0xff] }
 0x318   : > { %v3252_v44 = vmul.f32 %v8785_v23, %v8784_v59 }
 0x319   : > { %v7277_v43 = vpop.permute.xlu1 %2972  ;;  %3601 = vperm.xlu1 %5426, %v3248_v57   ;;  %v8787_v57 = vld [vmem:[#allocation140_spill] sm:$0xff] }
 0x31a   : > { %8777 = vst [vmem:[#allocation19_spill] sm:$0xff] %v7277_v43  ;;  %v7279_v14 = vpop.permute.xlu0 %2965  ;;  %v3251_v43 = vmul.f32 %v8787_v57, %v8786_v30  ;;  %v8795_v30 = vld [vmem:[#allocation108_spill] sm:$0xff] }
 0x31b   : > { %8778 = vst [vmem:[#allocation22_spill] sm:$0xff] %v7279_v14  ;;  %3598 = vperm.xlu0 %5425, %v3247_v61   ;;  %v8789_v61 = vld [vmem:[#allocation109_spill] sm:$0xff] }
 0x31c   : > { %v3254_v21 = vmul.f32 %v7057_v5, %v8789_v61 }
 0x31d   : > { %v7285_v16 = vpop.permute.xlu1 %2986  ;;  %3607 = vperm.xlu1 %5426, %v3250_v50   ;;  %v8791_v50 = vld [vmem:[#allocation142_spill] sm:$0xff] }
 0x31e   : > { %8783 = vst [vmem:[#allocation21_spill] sm:$0xff] %v7285_v16  ;;  %v7287_v47 = vpop.permute.xlu0 %2979  ;;  %v3253_v52 = vmul.f32 %v8791_v50, %v8790_v53  ;;  %v8798_v53 = vld [vmem:[#allocation120_spill] sm:$0xff] }
 0x31f   : > { %3604 = vperm.xlu0 %5425, %v3249_v10   ;;  %v8794_v10 = vld [vmem:[#allocation121_spill] sm:$0xff] }
 0x320   : > { %v3256_v23 = vmul.f32 %v7063_v25, %v8794_v10 }
 0x321   : > { %v7293_v14 = vpop.permute.xlu1 %3000  ;;  %3613 = vperm.xlu1 %5426, %v3252_v44   ;;  %v8796_v44 = vld [vmem:[#allocation144_spill] sm:$0xff] }
 0x322   : > { %8788 = vst [vmem:[#allocation24_spill] sm:$0xff] %v7293_v14  ;;  %v7295_v60 = vpop.permute.xlu0 %2993  ;;  %v3255_v57 = vmul.f32 %v8796_v44, %v8795_v30  ;;  %v8800_v30 = vld [vmem:[#allocation116_spill] sm:$0xff] }
 0x323   : > { %3610 = vperm.xlu0 %5425, %v3251_v43   ;;  %v8797_v43 = vld [vmem:[#allocation117_spill] sm:$0xff] }
 0x324   : > { %v3258_v61 = vmul.f32 %v7069_v41, %v8797_v43  ;;  %v8801_v41 = vld [vmem:[#allocation125_spill] sm:$0xff] }
 0x325   : > { %v7301_v16 = vpop.permute.xlu1 %3014  ;;  %3619 = vperm.xlu1 %5426, %v3254_v21   ;;  %v3257_v21 = vmul.f32 %v7060_v56, %v8798_v53  ;;  %v8803_v53 = vld [vmem:[#allocation128_spill] sm:$0xff] }
 0x326   : > { %8792 = vst [vmem:[#allocation23_spill] sm:$0xff] %v7301_v16  ;;  %v7303_v59 = vpop.permute.xlu0 %3007 }
 0x327   : > { %8793 = vst [vmem:[#allocation26_spill] sm:$0xff] %v7303_v59  ;;  %3616 = vperm.xlu0 %5425, %v3253_v52   ;;  %v8799_v52 = vld [vmem:[#allocation129_spill] sm:$0xff] }
 0x328   : > { %v3260_v10 = vmul.f32 %v7075_v0, %v8799_v52  ;;  %v8805_v0 = vld [vmem:[#allocation70_spill] sm:$0xff] }
 0x329   : > { %v7309_v14 = vpop.permute.xlu1 %3028  ;;  %3625 = vperm.xlu1 %5426, %v3256_v23   ;;  %v3259_v23 = vmul.f32 %v7066_v62, %v8800_v30  ;;  %v8806_v62 = vld [vmem:[#allocation124_spill] sm:$0xff]  ;;  %v8807_v52 = vld [vmem:[#allocation146_spill] sm:$0xff] }
 0x32a   : > { %v7311_v5 = vpop.permute.xlu0 %3021  ;;  %v3263_v30 = vmul.f32 %v8807_v52, %v8806_v62  ;;  %v8811_v62 = vld [vmem:[#allocation69_spill] sm:$0xff] }
 0x32b   : > { %3622 = vperm.xlu0 %5425, %v3255_v57   ;;  %v8802_v57 = vld [vmem:[#allocation147_spill] sm:$0xff] }
 0x32c   : > { %v3262_v43 = vmul.f32 %v8802_v57, %v8801_v41 }
 0x32d   : > { %v7317_v50 = vpop.permute.xlu1 %3042  ;;  %3631 = vperm.xlu1 %5426, %v3258_v61   ;;  %v8804_v61 = vld [vmem:[#allocation145_spill] sm:$0xff] }
 0x32e   : > { %v7319_v25 = vpop.permute.xlu0 %3035  ;;  %v3261_v16 = vmul.f32 %v8804_v61, %v8803_v53  ;;  %v8809_v53 = vld [vmem:[#allocation71_spill] sm:$0xff] }
 0x32f   : > { %3628 = vperm.xlu0 %5425, %v3257_v21   ;;  %v3264_v21 = vmul.f32 %v7087_v45, %v8805_v0  ;;  %v3265_v61 = vmul.f32 %v7085_v9, %v8809_v53 }
 0x331   : > { %v7325_v44 = vpop.permute.xlu1 %3056  ;;  %3637 = vperm.xlu1 %5426, %v3260_v10  }
 0x332   : > { %v7329_v56 = vpop.permute.xlu0 %3049 }
 0x333   : > { %3634 = vperm.xlu0 %5425, %v3259_v23   ;;  %v8808_v23 = vld [vmem:[#allocation68_spill] sm:$0xff] }
 0x334   : > { %v3266_v57 = vmul.f32 %v7095_v63, %v8808_v23  ;;  %v8813_v23 = vld [vmem:[#allocation74_spill] sm:$0xff] }
 0x335   : > { %v7333_v59 = vpop.permute.xlu1 %3070  ;;  %3643 = vperm.xlu1 %5426, %v3262_v43  }
 0x336   : > { %v7341_v41 = vpop.permute.xlu0 %3063 }
 0x337   : > { %3640 = vperm.xlu0 %5425, %v3261_v16   ;;  %v8810_v16 = vld [vmem:[#allocation75_spill] sm:$0xff] }
 0x338   : > { %v3268_v0 = vmul.f32 %v7103_v32, %v8810_v16  ;;  %v8815_v16 = vld [vmem:[#allocation72_spill] sm:$0xff] }
 0x339   : > { %v7339_v10 = vpop.permute.xlu1 %3460  ;;  %3649 = vperm.xlu1 %5426, %v3264_v21   ;;  %v3267_v21 = vmul.f32 %v7093_v28, %v8811_v62 }
 0x33b   : > { %3646 = vperm.xlu0 %5425, %v3263_v30   ;;  %v8812_v30 = vld [vmem:[#allocation73_spill] sm:$0xff] }
 0x33c   : > { %v3270_v9 = vmul.f32 %v7111_v2, %v8812_v30  ;;  %v8817_v30 = vld [vmem:[#allocation77_spill] sm:$0xff] }
 0x33d   : > { %v7347_v43 = vpop.permute.xlu1 %3463  ;;  %3655 = vperm.xlu1 %5426, %v3266_v57   ;;  %v3269_v57 = vmul.f32 %v7101_v38, %v8813_v23 }
 0x33e   : > { %v7349_v45 = vpop.permute.xlu0 %3457 }
 0x33f   : > { %3652 = vperm.xlu0 %5425, %v3265_v61   ;;  %v8814_v61 = vld [vmem:[#allocation78_spill] sm:$0xff] }
 0x340   : > { %v3272_v28 = vmul.f32 %v7119_v24, %v8814_v61  ;;  %v8819_v61 = vld [vmem:[#allocation40_spill] sm:$0xff] }
 0x341   : > { %v7355_v52 = vpop.permute.xlu1 %3469  ;;  %3661 = vperm.xlu1 %5426, %v3268_v0   ;;  %v3271_v0 = vmul.f32 %v7109_v22, %v8815_v16 }
 0x342   : > { %v7357_v63 = vpop.permute.xlu0 %3466 }
 0x343   : > { %3658 = vperm.xlu0 %5425, %v3267_v21   ;;  %v8816_v21 = vld [vmem:[#allocation76_spill] sm:$0xff] }
 0x344   : > { %v3274_v38 = vmul.f32 %v7127_v35, %v8816_v21  ;;  %v8821_v21 = vld [vmem:[#allocation44_spill] sm:$0xff] }
 0x345   : > { %v7363_v53 = vpop.permute.xlu1 %3475  ;;  %3667 = vperm.xlu1 %5426, %v3270_v9   ;;  %v3273_v9 = vmul.f32 %v7117_v36, %v8817_v30 }
 0x346   : > { %v7365_v32 = vpop.permute.xlu0 %3472 }
 0x347   : > { %3664 = vperm.xlu0 %5425, %v3269_v57   ;;  %v8818_v57 = vld [vmem:[#allocation48_spill] sm:$0xff] }
 0x348   : > { %v3276_v22 = vmul.f32 %v7135_v40, %v8818_v57  ;;  %v8823_v57 = vld [vmem:[#allocation45_spill] sm:$0xff] }
 0x349   : > { %v7371_v62 = vpop.permute.xlu1 %3481  ;;  %3673 = vperm.xlu1 %5426, %v3272_v28   ;;  %v3275_v28 = vmul.f32 %v7125_v15, %v8819_v61 }
 0x34a   : > { %v7373_v2 = vpop.permute.xlu0 %3478 }
 0x34b   : > { %3670 = vperm.xlu0 %5425, %v3271_v0   ;;  %v8820_v0 = vld [vmem:[#allocation43_spill] sm:$0xff] }
 0x34c   : > { %v3278_v36 = vmul.f32 %v7143_v19, %v8820_v0  ;;  %v8825_v0 = vld [vmem:[#allocation52_spill] sm:$0xff] }
 0x34d   : > { %v7379_v23 = vpop.permute.xlu1 %3487  ;;  %3679 = vperm.xlu1 %5426, %v3274_v38   ;;  %v3277_v38 = vmul.f32 %v7133_v20, %v8821_v21 }
 0x34e   : > { %v7381_v24 = vpop.permute.xlu0 %3484 }
 0x34f   : > { %3676 = vperm.xlu0 %5425, %v3273_v9   ;;  %v8822_v9 = vld [vmem:[#allocation51_spill] sm:$0xff] }
 0x350   : > { %v3280_v15 = vmul.f32 %v7151_v37, %v8822_v9  ;;  %v8827_v9 = vld [vmem:[#allocation50_spill] sm:$0xff] }
 0x351   : > { %v7387_v16 = vpop.permute.xlu1 %3493  ;;  %3685 = vperm.xlu1 %5426, %v3276_v22   ;;  %v3279_v22 = vmul.f32 %v7141_v11, %v8823_v57 }
 0x352   : > { %v7389_v35 = vpop.permute.xlu0 %3490 }
 0x353   : > { %3682 = vperm.xlu0 %5425, %v3275_v28   ;;  %v8824_v28 = vld [vmem:[#allocation49_spill] sm:$0xff] }
 0x354   : > { %v3282_v20 = vmul.f32 %v7159_v12, %v8824_v28  ;;  %v8829_v28 = vld [vmem:[#allocation58_spill] sm:$0xff] }
 0x355   : > { %v7395_v30 = vpop.permute.xlu1 %3499  ;;  %3691 = vperm.xlu1 %5426, %v3278_v36   ;;  %v3281_v36 = vmul.f32 %v7149_v48, %v8825_v0 }
 0x356   : > { %v7397_v40 = vpop.permute.xlu0 %3496 }
 0x357   : > { %3688 = vperm.xlu0 %5425, %v3277_v38   ;;  %v8826_v38 = vld [vmem:[#allocation56_spill] sm:$0xff] }
 0x358   : > { %v3284_v11 = vmul.f32 %v7167_v27, %v8826_v38  ;;  %v8831_v38 = vld [vmem:[#allocation57_spill] sm:$0xff] }
 0x359   : > { %v7403_v61 = vpop.permute.xlu1 %3505  ;;  %3697 = vperm.xlu1 %5426, %v3280_v15   ;;  %v3283_v15 = vmul.f32 %v7157_v13, %v8827_v9 }
 0x35a   : > { %v7405_v19 = vpop.permute.xlu0 %3502 }
 0x35b   : > { %3694 = vperm.xlu0 %5425, %v3279_v22   ;;  %v8828_v22 = vld [vmem:[#allocation55_spill] sm:$0xff] }
 0x35c   : > { %v3286_v48 = vmul.f32 %v7175_v34, %v8828_v22  ;;  %v8833_v22 = vld [vmem:[#allocation61_spill] sm:$0xff] }
 0x35d   : > { %v7411_v21 = vpop.permute.xlu1 %3511  ;;  %3703 = vperm.xlu1 %5426, %v3282_v20   ;;  %v3285_v20 = vmul.f32 %v7165_v7, %v8829_v28 }
 0x35e   : > { %v7413_v37 = vpop.permute.xlu0 %3508 }
 0x35f   : > { %3700 = vperm.xlu0 %5425, %v3281_v36   ;;  %v8830_v36 = vld [vmem:[#allocation63_spill] sm:$0xff] }
 0x360   : > { %v3288_v13 = vmul.f32 %v7183_v8, %v8830_v36  ;;  %v8835_v36 = vld [vmem:[#allocation62_spill] sm:$0xff] }
 0x361   : > { %v7419_v57 = vpop.permute.xlu1 %3517  ;;  %3709 = vperm.xlu1 %5426, %v3284_v11   ;;  %v3287_v11 = vmul.f32 %v7173_v46, %v8831_v38 }
 0x362   : > { %v7421_v12 = vpop.permute.xlu0 %3514 }
 0x363   : > { %3706 = vperm.xlu0 %5425, %v3283_v15   ;;  %v8832_v15 = vld [vmem:[#allocation64_spill] sm:$0xff] }
 0x364   : > { %v3290_v7 = vmul.f32 %v7191_v55, %v8832_v15  ;;  %v8837_v15 = vld [vmem:[#allocation81_spill] sm:$0xff] }
 0x365   : > { %v7427_v0 = vpop.permute.xlu1 %3523  ;;  %3715 = vperm.xlu1 %5426, %v3286_v48   ;;  %v3289_v48 = vmul.f32 %v7181_v33, %v8833_v22 }
 0x366   : > { %v7429_v27 = vpop.permute.xlu0 %3520 }
 0x367   : > { %3712 = vperm.xlu0 %5425, %v3285_v20   ;;  %v8834_v20 = vld [vmem:[#allocation10_spill] sm:$0xff] }
 0x368   : > { %v3292_v46 = vmul.f32 %v7199_v26, %v8834_v20  ;;  %v8840_v20 = vld [vmem:[#allocation79_spill] sm:$0xff] }
 0x369   : > { %v7435_v9 = vpop.permute.xlu1 %3529  ;;  %3721 = vperm.xlu1 %5426, %v3288_v13   ;;  %v3291_v13 = vmul.f32 %v7189_v31, %v8835_v36 }
 0x36a   : > { %v7437_v34 = vpop.permute.xlu0 %3526 }
 0x36b   : > { %3718 = vperm.xlu0 %5425, %v3287_v11   ;;  %v8836_v11 = vld [vmem:[#allocation80_spill] sm:$0xff] }
 0x36c   : > { %v3294_v33 = vmul.f32 %v7207_v39, %v8836_v11  ;;  %v8843_v11 = vld [vmem:[#allocation13_spill] sm:$0xff] }
 0x36d   : > { %v7443_v28 = vpop.permute.xlu1 %3535  ;;  %3727 = vperm.xlu1 %5426, %v3290_v7   ;;  %v3293_v7 = vmul.f32 %v7197_v4, %v8837_v15 }
 0x36e   : > { %v7445_v8 = vpop.permute.xlu0 %3532 }
 0x36f   : > { %3724 = vperm.xlu0 %5425, %v3289_v48   ;;  %v8839_v48 = vld [vmem:[#allocation9_spill] sm:$0xff] }
 0x370   : > { %v3296_v31 = vmul.f32 %v7215_v51, %v8839_v48  ;;  %v8845_v48 = vld [vmem:[#allocation12_spill] sm:$0xff] }
 0x371   : > { %v7451_v38 = vpop.permute.xlu1 %3541  ;;  %3733 = vperm.xlu1 %5426, %v3292_v46   ;;  %v3295_v46 = vmul.f32 %v7205_v3, %v8840_v20 }
 0x372   : > { %v7453_v55 = vpop.permute.xlu0 %3538 }
 0x373   : > { %3730 = vperm.xlu0 %5425, %v3291_v13   ;;  %v8842_v13 = vld [vmem:[#allocation8_spill] sm:$0xff] }
 0x374   : > { %v3298_v4 = vmul.f32 %v7223_v17, %v8842_v13  ;;  %v8848_v13 = vld [vmem:[#allocation82_spill] sm:$0xff] }
 0x375   : > { %v7459_v22 = vpop.permute.xlu1 %3547  ;;  %3739 = vperm.xlu1 %5426, %v3294_v33   ;;  %v3297_v33 = vmul.f32 %v7213_v42, %v8843_v11 }
 0x376   : > { %8838 = vst [vmem:[#allocation25_spill] sm:$0xff] %v7459_v22  ;;  %v7461_v26 = vpop.permute.xlu0 %3544 }
 0x377   : > { %3736 = vperm.xlu0 %5425, %v3293_v7   ;;  %v8844_v7 = vld [vmem:[#allocation83_spill] sm:$0xff] }
 0x378   : > { %v3300_v3 = vmul.f32 %v7231_v49, %v8844_v7  ;;  %v8852_v7 = vld [vmem:[#allocation11_spill] sm:$0xff] }
 0x379   : > { %v7467_v36 = vpop.permute.xlu1 %3553  ;;  %3745 = vperm.xlu1 %5426, %v3296_v31   ;;  %v3299_v31 = vmul.f32 %v7221_v18, %v8845_v48 }
 0x37a   : > { %v7469_v39 = vpop.permute.xlu0 %3550 }
 0x37b   : > { %8841 = vst [vmem:[#allocation28_spill] sm:$0xff] %v7469_v39  ;;  %3742 = vperm.xlu0 %5425, %v3295_v46   ;;  %v8847_v46 = vld [vmem:[#allocation7_spill] sm:$0xff] }
 0x37c   : > { %v3302_v42 = vmul.f32 %v7239_v54, %v8847_v46  ;;  %v8855_v46 = vld [vmem:[#allocation90_spill] sm:$0xff] }
 0x37d   : > { %v7475_v15 = vpop.permute.xlu1 %3559  ;;  %3751 = vperm.xlu1 %5426, %v3298_v4   ;;  %v3301_v4 = vmul.f32 %v7229_v58, %v8848_v13 }
 0x37e   : > { %v7477_v51 = vpop.permute.xlu0 %3556 }
 0x37f   : > { %3748 = vperm.xlu0 %5425, %v3297_v33   ;;  %v8851_v33 = vld [vmem:[#allocation91_spill] sm:$0xff] }
 0x380   : > { %v3304_v18 = vmul.f32 %v7247_v6, %v8851_v33  ;;  %v8858_v33 = vld [vmem:[#allocation18_spill] sm:$0xff] }
 0x381   : > { %v7483_v20 = vpop.permute.xlu1 %3565  ;;  %3757 = vperm.xlu1 %5426, %v3300_v3   ;;  %v3303_v3 = vmul.f32 %v7237_v1, %v8852_v7  ;;  %v8859_v7 = vld [vmem:[#allocation86_spill] sm:$0xff] }
 0x382   : > { %8846 = vst [vmem:[#allocation27_spill] sm:$0xff] %v7483_v20  ;;  %v7485_v17 = vpop.permute.xlu0 %3562 }
 0x383   : > { %3754 = vperm.xlu0 %5425, %v3299_v31   ;;  %v8854_v31 = vld [vmem:[#allocation87_spill] sm:$0xff] }
 0x384   : > { %v3306_v58 = vmul.f32 %v7255_v29, %v8854_v31  ;;  %v8863_v31 = vld [vmem:[#allocation20_spill] sm:$0xff] }
 0x385   : > { %v7491_v11 = vpop.permute.xlu1 %3571  ;;  %3763 = vperm.xlu1 %5426, %v3302_v42   ;;  %v8856_v42 = vld [vmem:[#allocation14_spill] sm:$0xff] }
 0x386   : > { %8849 = vst [vmem:[#allocation30_spill] sm:$0xff] %v7491_v11  ;;  %v7493_v49 = vpop.permute.xlu0 %3568  ;;  %v3305_v13 = vmul.f32 %v8856_v42, %v8855_v46  ;;  %v8864_v42 = vld [vmem:[#allocation98_spill] sm:$0xff] }
 0x387   : > { %8850 = vst [vmem:[#allocation29_spill] sm:$0xff] %v7493_v49  ;;  %3760 = vperm.xlu0 %5425, %v3301_v4   ;;  %v8857_v4 = vld [vmem:[#allocation99_spill] sm:$0xff] }
 0x388   : > { %v3308_v1 = vmul.f32 %v8858_v33, %v8857_v4  ;;  %v8868_v33 = vld [vmem:[#allocation22_spill] sm:$0xff] }
 0x389   : > { %v7499_v48 = vpop.permute.xlu1 %3577  ;;  %3769 = vperm.xlu1 %5426, %v3304_v18   ;;  %v8860_v18 = vld [vmem:[#allocation15_spill] sm:$0xff] }
 0x38a   : > { %v7501_v54 = vpop.permute.xlu0 %3574  ;;  %v3307_v49 = vmul.f32 %v8860_v18, %v8859_v7  ;;  %v8869_v18 = vld [vmem:[#allocation94_spill] sm:$0xff] }
 0x38b   : > { %8853 = vst [vmem:[#allocation32_spill] sm:$0xff] %v7501_v54  ;;  %3766 = vperm.xlu0 %5425, %v3303_v3   ;;  %v8862_v3 = vld [vmem:[#allocation95_spill] sm:$0xff] }
 0x38c   : > { %v3310_v46 = vmul.f32 %v8863_v31, %v8862_v3 }
 0x38d   : > { %v7507_v11 = vpop.permute.xlu1 %3583  ;;  %3775 = vperm.xlu1 %5426, %v3306_v58   ;;  %v8865_v58 = vld [vmem:[#allocation16_spill] sm:$0xff] }
 0x38e   : > { %v7509_v6 = vpop.permute.xlu0 %3580  ;;  %v3309_v20 = vmul.f32 %v8865_v58, %v8864_v42  ;;  %v8873_v42 = vld [vmem:[#allocation106_spill] sm:$0xff] }
 0x38f   : > { %3772 = vperm.xlu0 %5425, %v3305_v13   ;;  %v8867_v13 = vld [vmem:[#allocation107_spill] sm:$0xff] }
 0x390   : > { %v3312_v7 = vmul.f32 %v8868_v33, %v8867_v13 }
 0x391   : > { %v7515_v54 = vpop.permute.xlu1 %3589  ;;  %3781 = vperm.xlu1 %5426, %v3308_v1   ;;  %v8870_v1 = vld [vmem:[#allocation17_spill] sm:$0xff] }
 0x392   : > { %8861 = vst [vmem:[#allocation31_spill] sm:$0xff] %v7515_v54  ;;  %v7517_v29 = vpop.permute.xlu0 %3586  ;;  %v3311_v54 = vmul.f32 %v8870_v1, %v8869_v18  ;;  %v8876_v18 = vld [vmem:[#allocation122_spill] sm:$0xff] }
 0x393   : > { %3778 = vperm.xlu0 %5425, %v3307_v49   ;;  %v8872_v49 = vld [vmem:[#allocation123_spill] sm:$0xff] }
 0x394   : > { %v3320_v31 = vmul.f32 %v7311_v5, %v8872_v49  ;;  %v8878_v49 = vld [vmem:[#allocation21_spill] sm:$0xff] }
 0x395   : > { %v7523_v39 = vpop.permute.xlu1 %3595  ;;  %3787 = vperm.xlu1 %5426, %v3310_v46   ;;  %v8874_v46 = vld [vmem:[#allocation19_spill] sm:$0xff] }
 0x396   : > { %8866 = vst [vmem:[#allocation34_spill] sm:$0xff] %v7523_v39  ;;  %v7525_v4 = vpop.permute.xlu0 %3592  ;;  %v3313_v58 = vmul.f32 %v8874_v46, %v8873_v42  ;;  %v8879_v46 = vld [vmem:[#allocation119_spill] sm:$0xff] }
 0x397   : > { %3784 = vperm.xlu0 %5425, %v3309_v20   ;;  %v8875_v20 = vld [vmem:[#allocation103_spill] sm:$0xff] }
 0x398   : > { %v3314_v33 = vmul.f32 %v7287_v47, %v8875_v20  ;;  %v8882_v20 = vld [vmem:[#allocation118_spill] sm:$0xff] }
 0x399   : > { %v7531_v22 = vpop.permute.xlu1 %3601  ;;  %3793 = vperm.xlu1 %5426, %v3312_v7   ;;  %v3321_v7 = vmul.f32 %v7309_v14, %v8876_v18 }
 0x39a   : > { %v7533_v3 = vpop.permute.xlu0 %3598 }
 0x39b   : > { %8871 = vst [vmem:[#allocation33_spill] sm:$0xff] %v7533_v3  ;;  %3790 = vperm.xlu0 %5425, %v3311_v54   ;;  %v8877_v54 = vld [vmem:[#allocation102_spill] sm:$0xff] }
 0x39c   : > { %v3315_v42 = vmul.f32 %v8878_v49, %v8877_v54  ;;  %v8885_v49 = vld [vmem:[#allocation24_spill] sm:$0xff] }
 0x39d   : > { %v7539_v39 = vpop.permute.xlu1 %3607  ;;  %3817 = vperm.xlu1 %5426, %v3320_v31   ;;  %v3322_v31 = vmul.f32 %v7319_v25, %v8879_v46  ;;  %v8886_v46 = vld [vmem:[#allocation131_spill] sm:$0xff] }
 0x39e   : > { %v7541_v13 = vpop.permute.xlu0 %3604 }
 0x39f   : > { %3796 = vperm.xlu0 %5425, %v3313_v58   ;;  %v8881_v58 = vld [vmem:[#allocation115_spill] sm:$0xff] }
 0x3a0   : > { %v3316_v14 = vmul.f32 %v7295_v60, %v8881_v58  ;;  %v8889_v58 = vld [vmem:[#allocation26_spill] sm:$0xff] }
 0x3a1   : > { %v7547_v1 = vpop.permute.xlu1 %3613  ;;  %3799 = vperm.xlu1 %5426, %v3314_v33   ;;  %v3323_v33 = vmul.f32 %v7317_v50, %v8882_v20  ;;  %v8890_v20 = vld [vmem:[#allocation130_spill] sm:$0xff] }
 0x3a2   : > { %v7549_v5 = vpop.permute.xlu0 %3610 }
 0x3a3   : > { %3820 = vperm.xlu0 %5425, %v3321_v7   ;;  %v8884_v7 = vld [vmem:[#allocation114_spill] sm:$0xff] }
 0x3a4   : > { %v3317_v25 = vmul.f32 %v8885_v49, %v8884_v7  ;;  %v8892_v49 = vld [vmem:[#allocation23_spill] sm:$0xff] }
 0x3a5   : > { %v7555_v3 = vpop.permute.xlu1 %3619  ;;  %3802 = vperm.xlu1 %5426, %v3315_v42   ;;  %v3324_v42 = vmul.f32 %v7329_v56, %v8886_v46  ;;  %v8893_v46 = vld [vmem:[#allocation127_spill] sm:$0xff] }
 0x3a6   : > { %8880 = vst [vmem:[#allocation36_spill] sm:$0xff] %v7555_v3  ;;  %v7557_v47 = vpop.permute.xlu0 %3616 }
 0x3a7   : > { %3823 = vperm.xlu0 %5425, %v3322_v31   ;;  %v8888_v31 = vld [vmem:[#allocation111_spill] sm:$0xff] }
 0x3a8   : > { %v3318_v50 = vmul.f32 %v8889_v58, %v8888_v31 }
 0x3a9   : > { %v7563_v18 = vpop.permute.xlu1 %3625  ;;  %3805 = vperm.xlu1 %5426, %v3316_v14   ;;  %v3325_v14 = vmul.f32 %v7325_v44, %v8890_v20 }
 0x3aa   : > { %v7565_v54 = vpop.permute.xlu0 %3622 }
 0x3ab   : > { %8883 = vst [vmem:[#allocation35_spill] sm:$0xff] %v7565_v54  ;;  %3826 = vperm.xlu0 %5425, %v3323_v33   ;;  %v8891_v33 = vld [vmem:[#allocation110_spill] sm:$0xff] }
 0x3ac   : > { %v3319_v56 = vmul.f32 %v8892_v49, %v8891_v33 }
 0x3ad   : > { %v7571_v3 = vpop.permute.xlu1 %3631  ;;  %3808 = vperm.xlu1 %5426, %v3317_v25   ;;  %v3326_v25 = vmul.f32 %v7341_v41, %v8893_v46 }
 0x3ae   : > { %8887 = vst [vmem:[#allocation38_spill] sm:$0xff] %v7571_v3  ;;  %v7573_v60 = vpop.permute.xlu0 %3628 }
 0x3af   : > { %3829 = vperm.xlu0 %5425, %v3324_v42   ;;  %v8896_v42 = vld [vmem:[#allocation126_spill] sm:$0xff] }
 0x3b0   : > { %v3327_v44 = vmul.f32 %v7333_v59, %v8896_v42 }
 0x3b1   : > { %v7579_v54 = vpop.permute.xlu1 %3637  ;;  %3811 = vperm.xlu1 %5426, %v3318_v50  }
 0x3b2   : > { %v7581_v7 = vpop.permute.xlu0 %3634 }
 0x3b3   : > { %3832 = vperm.xlu0 %5425, %v3325_v14  }
 0x3b5   : > { %v7587_v3 = vpop.permute.xlu1 %3643  ;;  %3814 = vperm.xlu1 %5426, %v3319_v56  }
 0x3b6   : > { %8894 = vst [vmem:[#allocation37_spill] sm:$0xff] %v7587_v3  ;;  %v7589_v31 = vpop.permute.xlu0 %3640 }
 0x3b7   : > { %8895 = vst [vmem:[#allocation41_spill] sm:$0xff] %v7589_v31  ;;  %3835 = vperm.xlu0 %5425, %v3326_v25   ;;  %v8901_v25 = vld [vmem:[#allocation5_spill] sm:$0xff] }
 0x3b8   : > { %v3845_v42 = vrot.slane %v7349_v45, %v8901_v25  ;;  %v3881_v3 = vrot.slane %v7381_v24, %v8901_v25  ;;  %v3857_v45 = vrot.slane %v7357_v63, %v8901_v25  ;;  %v3913_v24 = vrot.slane %v7413_v37, %v8901_v25 }
 0x3b9   : > { %v7593_v58 = vpop.permute.xlu1 %3649  ;;  %v3861_v63 = vrot.slane %v7355_v52, %v8901_v25  ;;  %v3893_v52 = vrot.slane %v7387_v16, %v8901_v25 }
 0x3ba   : > { %v7595_v50 = vpop.permute.xlu0 %3646 }
 0x3bb   : > { %8897 = vst [vmem:[#allocation39_spill] sm:$0xff] %v7595_v50  ;;  %3838 = vperm.xlu0 %5425, %v3327_v44   ;;  %v3849_v50 = vrot.slane %v7339_v10, %v8901_v25  ;;  %v3885_v10 = vrot.slane %v7379_v23, %v8901_v25  ;;  %v3909_v23 = vrot.slane %v7403_v61, %v8901_v25 }
 0x3bc   : > { %v3921_v61 = vrot.slane %v7421_v12, %v8901_v25 }
 0x3bd   : > { %v7597_v20 = vpop.permute.xlu1 %3655 }
 0x3be   : > { %v7599_v14 = vpop.permute.xlu0 %3652 }
 0x3c1   : > { %v7601_v33 = vpop.permute.xlu1 %3661 }
 0x3c2   : > { %v7603_v41 = vpop.permute.xlu0 %3658 }
 0x3c5   : > { %v7605_v49 = vpop.permute.xlu1 %3667 }
 0x3c6   : > { %8898 = vst [vmem:[#allocation46_spill] sm:$0xff] %v7605_v49  ;;  %v7607_v56 = vpop.permute.xlu0 %3664  ;;  %v3853_v49 = vrot.slane %v7347_v43, %v8901_v25 }
 0x3c9   : > { %v7609_v46 = vpop.permute.xlu1 %3673 }
 0x3ca   : > { %8899 = vst [vmem:[#allocation42_spill] sm:$0xff] %v7609_v46  ;;  %v7611_v59 = vpop.permute.xlu0 %3670  ;;  %v4355_v46 = vsel %vm4354_vm2, %v3849_v50, %v3845_v42  ;;  %v3889_v50 = vrot.slane %v7389_v35, %v8901_v25  ;;  %v3917_v35 = vrot.slane %v7411_v21, %v8901_v25  ;;  %v7665_v21 = vld [vmem:[%s5709_s16] sm:$0xff] }
 0x3cb   : > { %8900 = vst [vmem:[#allocation53_spill] sm:$0xff] %v7611_v59  ;;  %8903 = vst [vmem:[#allocation59_spill] sm:$0xff] %v7665_v21  ;;  %v4538_v16 = vsel %vm4489_vm7, %v7665_v21, 0.0 }
 0x3cd   : > { %v7615_v44 = vpop.permute.xlu1 %3679 }
 0x3ce   : > { %8902 = vst [vmem:[#allocation47_spill] sm:$0xff] %v7615_v44  ;;  %v7621_v31 = vpop.permute.xlu0 %3676  ;;  %v3877_v44 = vrot.slane %v7371_v62, %v8901_v25  ;;  %v4357_v62 = vsel %vm4356_vm3, %v3853_v49, %v4355_v46  ;;  %v4375_v49 = vsel %vm4354_vm2, %v3913_v24, %v3909_v23  ;;  %v7671_v24 = vld [vmem:[%s5709_s16 + $0x8] sm:$0xff] }
 0x3cf   : > { %v4359_v37 = vsel %vm4358_vm4, %v3857_v45, %v4357_v62  ;;  %8904 = vst [vmem:[#allocation54_spill] sm:$0xff] %v7671_v24  ;;  %v4541_v12 = vsel %vm4489_vm7, %v7671_v24, 0.0  ;;  %v4376_v23 = vsel %vm4356_vm3, %v3917_v35, %v4375_v49  ;;  %v3929_v24 = vrot.slane %v7429_v27, %v8901_v25  ;;  %v7697_v35 = vld [vmem:[%s5709_s16 + $0x20] sm:$0xff] }
 0x3d0   : > { %v4368_v43 = vsel %vm4354_vm2, %v3881_v3, %v3877_v44  ;;  %v3865_v3 = vrot.slane %v7365_v32, %v8901_v25  ;;  %v3897_v32 = vrot.slane %v7397_v40, %v8901_v25  ;;  %v4550_v27 = vsel %vm4489_vm7, %v7697_v35, 0.0 }
 0x3d1   : > { %v7634_v59 = vpop.permute.xlu1 %3685  ;;  %v4369_v44 = vsel %vm4356_vm3, %v3885_v10, %v4368_v43  ;;  %v4361_v10 = vsel %vm4360_vm5, %v3861_v63, %v4359_v37  ;;  %v3869_v43 = vrot.slane %v7363_v53, %v8901_v25  ;;  %v3901_v63 = vrot.slane %v7395_v30, %v8901_v25 }
 0x3d2   : > { %v7639_v42 = vpop.permute.xlu0 %3682  ;;  %v4370_v45 = vsel %vm4358_vm4, %v3889_v50, %v4369_v44  ;;  %v4363_v40 = vsel %vm4362_vm6, %v3865_v3, %v4361_v10  ;;  %v3925_v50 = vrot.slane %v7419_v57, %v8901_v25  ;;  %v4377_v44 = vsel %vm4358_vm4, %v3921_v61, %v4376_v23 }
 0x3d3   : > { %v4371_v37 = vsel %vm4360_vm5, %v3893_v52, %v4370_v45  ;;  %v3873_v53 = vrot.slane %v7373_v2, %v8901_v25  ;;  %v3905_v3 = vrot.slane %v7405_v19, %v8901_v25  ;;  %v7702_v52 = vld [vmem:[%s5709_s16 + $0x10] sm:$0xff]  ;;  %v3933_v2 = vrot.slane %v7427_v0, %v8901_v25 }
 0x3d4   : > { %v4372_v57 = vsel %vm4362_vm6, %v3897_v32, %v4371_v37  ;;  %v4544_v49 = vsel %vm4489_vm7, %v7702_v52, 0.0  ;;  %v4378_v19 = vsel %vm4360_vm5, %v3925_v50, %v4377_v44  ;;  %v3937_v45 = vrot.slane %v7437_v34, %v8901_v25  ;;  %v7721_v0 = vld [vmem:[%s5709_s16 + $0x30] sm:$0xff]  ;;  %v7728_v37 = vld [vmem:[%s5709_s16 + $0x18] sm:$0xff] }
 0x3d5   : > { %v7657_v46 = vpop.permute.xlu1 %3691  ;;  %v4379_v61 = vsel %vm4362_vm6, %v3929_v24, %v4378_v19  ;;  %v4373_v10 = vsel %vm4364_vm8, %v3901_v63, %v4372_v57  ;;  %8905 = vst [vmem:[#allocation60_spill] sm:$0xff] %v7721_v0  ;;  %v4556_v24 = vsel %vm4489_vm7, %v7721_v0, 0.0  ;;  %v3949_v63 = vrot.slane %v7443_v28, %v8901_v25  ;;  %v7757_v19 = vld [vmem:[%s5709_s16 + $0x28] sm:$0xff] }
 0x3d6   : > { %v7662_v62 = vpop.permute.xlu0 %3688  ;;  %v4374_v50 = vsel %vm4366_vm9, %v3905_v3, %v4373_v10  ;;  %v7769_v10 = vld [vmem:[%s5709_s16 + $0x38] sm:$0xff] }
 0x3d7   : > { %v7744_v3 = vsel %vm4489_vm7, %v4374_v50, 0.0  ;;  %8908 = vst [vmem:[#allocation6_spill] sm:$0xff] %v7769_v10  ;;  %v4009_v50 = vrot.slane %v7509_v6, %v8901_v25  ;;  %v3973_v6 = vrot.slane %v7467_v36, %v8901_v25 }
 0x3d9   : > { %v7687_v21 = vpop.permute.xlu1 %3697  ;;  %4539 = vadd.xlane.f32.xlu1 %v4538_v16  ;;  %v4365_v16 = vsel %vm4364_vm8, %v3869_v43, %v4363_v40  ;;  %v4547_v43 = vsel %vm4489_vm7, %v7728_v37, 0.0  ;;  %v4380_v40 = vsel %vm4364_vm8, %v3933_v2, %v4379_v61  ;;  %v4553_v61 = vsel %vm4489_vm7, %v7757_v19, 0.0 }
 0x3da   : > { %4542 = vadd.xlane.f32.xlu0 %v4541_v12  ;;  %v7694_v30 = vpop.permute.xlu0 %3694  ;;  %v3945_v12 = vrot.slane %v7445_v8, %v8901_v25  ;;  %v4367_v34 = vsel %vm4366_vm9, %v3873_v53, %v4365_v16  ;;  %v3941_v8 = vrot.slane %v7435_v9, %v8901_v25  ;;  %v4381_v57 = vsel %vm4366_vm9, %v3937_v45, %v4380_v40  ;;  %v7764_v16 = vld [vmem:[%s5709_s16 + $0x50] sm:$0xff] }
 0x3db   : > { %v7740_v53 = vsel %vm4489_vm7, %v4367_v34, 0.0  ;;  %v3977_v45 = vrot.slane %v7477_v51, %v8901_v25  ;;  %8907 = vst [vmem:[#allocation67_spill] sm:$0xff] %v7764_v16 }
 0x3dc   : > { %v4382_v9 = vsel %vm4354_vm2, %v3945_v12, %v3941_v8  ;;  %v4559_v12 = vsel %vm4489_vm7, %v7769_v10, 0.0  ;;  %v5541_v8 = vld [vmem:[%s5709_s16 + $0x70] sm:$0xff]  ;;  %v4041_v10 = vrot.slane %v7541_v13, %v8901_v25 }
 0x3dd   : > { %v7712_v32 = vpop.permute.xlu1 %3703  ;;  %4551 = vadd.xlane.f32.xlu1 %v4550_v27  ;;  %v3953_v27 = vrot.slane %v7453_v55, %v8901_v25  ;;  %v4568_v55 = vsel %vm4489_vm7, %v7764_v16, 0.0  ;;  %v7787_v40 = vsel %vm4489_vm7, %v5541_v8, 0.0  ;;  %v7790_v16 = vsel %vm4489_vm7, %v4381_v57, 0.0 }
 0x3de   : > { %4545 = vadd.xlane.f32.xlu0 %v4544_v49  ;;  %v7718_v23 = vpop.permute.xlu0 %3700  ;;  %v7752_v49 = vld [vmem:[%s5709_s16 + $0x40] sm:$0xff]  ;;  %v3961_v57 = vrot.slane %v7461_v26, %v8901_v25  ;;  %v4389_v13 = vsel %vm4354_vm2, %v3977_v45, %v3973_v6  ;;  %v4037_v26 = vrot.slane %v7531_v22, %v8901_v25 }
 0x3df   : > { %8906 = vst [vmem:[#allocation89_spill] sm:$0xff] %v7752_v49  ;;  %v4562_v2 = vsel %vm4489_vm7, %v7752_v49, 0.0  ;;  %v3957_v49 = vrot.slane %v7451_v38, %v8901_v25  ;;  %v3981_v38 = vrot.slane %v7475_v15, %v8901_v25  ;;  %v4017_v15 = vrot.slane %v7517_v29, %v8901_v25  ;;  %v8913_v29 = vld [vmem:[#allocation28_spill] sm:$0xff] }
 0x3e0   : > { %v4403_v22 = vsel %vm4354_vm2, %v4041_v10, %v4037_v26 }
 0x3e1   : > { %v7737_v44 = vpop.permute.xlu1 %3709  ;;  %4557 = vadd.xlane.f32.xlu1 %v4556_v24  ;;  %v7774_v24 = vld [vmem:[%s5709_s16 + $0x60] sm:$0xff] }
 0x3e2   : > { %4548 = vadd.xlane.f32.xlu0 %v4547_v43  ;;  %v7749_v28 = vpop.permute.xlu0 %3706  ;;  %8909 = vst [vmem:[#allocation65_spill] sm:$0xff] %v7774_v24  ;;  %v4574_v34 = vsel %vm4489_vm7, %v7774_v24, 0.0  ;;  %v7781_v43 = vld [vmem:[%s5709_s16 + $0x48] sm:$0xff]  ;;  %v4383_v24 = vsel %vm4356_vm3, %v3949_v63, %v4382_v9  ;;  %v4005_v63 = vrot.slane %v7499_v48, %v8901_v25  ;;  %v3985_v9 = vrot.slane %v7485_v17, %v8901_v25  ;;  %v8912_v17 = vld [vmem:[#allocation25_spill] sm:$0xff] }
 0x3e3   : > { %8910 = vst [vmem:[#allocation85_spill] sm:$0xff] %v7781_v43  ;;  %v4565_v51 = vsel %vm4489_vm7, %v7781_v43, 0.0  ;;  %v4384_v8 = vsel %vm4358_vm4, %v3953_v27, %v4383_v24  ;;  %v4013_v27 = vrot.slane %v7507_v11, %v8901_v25  ;;  %v4045_v48 = vrot.slane %v7539_v39, %v8901_v25 }
 0x3e4   : > { %v3965_v24 = vrot.slane %v8912_v17, %v8901_v25  ;;  %v4385_v11 = vsel %vm4360_vm5, %v3957_v49, %v4384_v8  ;;  %v4390_v17 = vsel %vm4356_vm3, %v3981_v38, %v4389_v13 }
 0x3e5   : > { %v7799_v43 = vpop.permute.xlu1 %3715  ;;  %4563 = vadd.xlane.f32.xlu1 %v4562_v2  ;;  %v4396_v2 = vsel %vm4354_vm2, %v4009_v50, %v4005_v63  ;;  %v4049_v50 = vrot.slane %v7549_v5, %v8901_v25  ;;  %v4386_v39 = vsel %vm4362_vm6, %v3961_v57, %v4385_v11  ;;  %v3969_v63 = vrot.slane %v8913_v29, %v8901_v25  ;;  %v8915_v5 = vld [vmem:[#allocation29_spill] sm:$0xff] }
 0x3e6   : > { %4554 = vadd.xlane.f32.xlu0 %v4553_v61  ;;  %v7808_v36 = vpop.permute.xlu0 %3712  ;;  %v7823_v61 = vld [vmem:[%s5709_s16 + $0x58] sm:$0xff]  ;;  %v4391_v10 = vsel %vm4358_vm4, %v3985_v9, %v4390_v17  ;;  %v3993_v8 = vrot.slane %v8915_v5, %v8901_v25  ;;  %v4397_v26 = vsel %vm4356_vm3, %v4013_v27, %v4396_v2  ;;  %v4404_v38 = vsel %vm4356_vm3, %v4045_v48, %v4403_v22  ;;  %v7861_v17 = vld [vmem:[%s5709_s16 + $0x68] sm:$0xff] }
 0x3e7   : > { %8911 = vst [vmem:[#allocation133_spill] sm:$0xff] %v7823_v61  ;;  %v4571_v45 = vsel %vm4489_vm7, %v7823_v61, 0.0  ;;  %v8914_v61 = vld [vmem:[#allocation27_spill] sm:$0xff]  ;;  %v4398_v11 = vsel %vm4358_vm4, %v4017_v15, %v4397_v26  ;;  %v4405_v13 = vsel %vm4358_vm4, %v4049_v50, %v4404_v38  ;;  %v4057_v9 = vrot.slane %v7557_v47, %v8901_v25  ;;  %v8917_v2 = vld [vmem:[#allocation30_spill] sm:$0xff]  ;;  %v8918_v50 = vld [vmem:[#allocation32_spill] sm:$0xff] }
 0x3e8   : > { %v3989_v0 = vrot.slane %v8914_v61, %v8901_v25  ;;  %v4025_v61 = vrot.slane %v7525_v4, %v8901_v25  ;;  %v4577_v27 = vsel %vm4489_vm7, %v7861_v17, 0.0  ;;  %v4387_v4 = vsel %vm4364_vm8, %v3965_v24, %v4386_v39  ;;  %v8919_v24 = vld [vmem:[#allocation34_spill] sm:$0xff]  ;;  %v8921_v26 = vld [vmem:[#allocation36_spill] sm:$0xff] }
 0x3e9   : > { %v7833_v6 = vpop.permute.xlu1 %3721  ;;  %4569 = vadd.xlane.f32.xlu1 %v4568_v55  ;;  %v8916_v55 = vld [vmem:[#allocation31_spill] sm:$0xff]  ;;  %v4105_v48 = vrot.slane %v7599_v14, %v8901_v25  ;;  %v4001_v5 = vrot.slane %v8918_v50, %v8901_v25  ;;  %v4029_v39 = vrot.slane %v8919_v24, %v8901_v25  ;;  %v4073_v14 = vrot.slane %v7573_v60, %v8901_v25 }
 0x3ea   : > { %4560 = vadd.xlane.f32.xlu0 %v4559_v12  ;;  %v7841_v49 = vpop.permute.xlu0 %3718  ;;  %v4021_v57 = vrot.slane %v8916_v55, %v8901_v25  ;;  %v4053_v12 = vrot.slane %v7547_v1, %v8901_v25  ;;  %v3997_v1 = vrot.slane %v8917_v2, %v8901_v25  ;;  %v4392_v15 = vsel %vm4360_vm5, %v3989_v0, %v4391_v10 }
 0x3eb   : > { %v4393_v22 = vsel %vm4362_vm6, %v3993_v8, %v4392_v15  ;;  %v4061_v38 = vrot.slane %v8921_v26, %v8901_v25  ;;  %v4069_v60 = vrot.slane %v7563_v18, %v8901_v25  ;;  %v7908_v15 = vld [vmem:[%s5709_s16 + $0x78] sm:$0xff]  ;;  %v8925_v26 = vld [vmem:[#allocation46_spill] sm:$0xff] }
 0x3ec   : > { %v4399_v55 = vsel %vm4360_vm5, %v4021_v57, %v4398_v11  ;;  %v4406_v10 = vsel %vm4360_vm5, %v4053_v12, %v4405_v13  ;;  %v4109_v57 = vrot.slane %v7597_v20, %v8901_v25  ;;  %v4113_v13 = vrot.slane %v7603_v41, %v8901_v25  ;;  %v8923_v20 = vld [vmem:[#allocation38_spill] sm:$0xff] }
 0x3ed   : > { %v7858_v29 = vpop.permute.xlu1 %3727  ;;  %4575 = vadd.xlane.f32.xlu1 %v4574_v34  ;;  %v4388_v34 = vsel %vm4366_vm9, %v3969_v63, %v4387_v4  ;;  %v4400_v0 = vsel %vm4362_vm6, %v4025_v61, %v4399_v55  ;;  %v8920_v63 = vld [vmem:[#allocation33_spill] sm:$0xff]  ;;  %v4407_v4 = vsel %vm4362_vm6, %v4057_v9, %v4406_v10  ;;  %v4077_v2 = vrot.slane %v8923_v20, %v8901_v25 }
 0x3ee   : > { %4566 = vadd.xlane.f32.xlu0 %v4565_v51  ;;  %v7871_v47 = vpop.permute.xlu0 %3724  ;;  %v4101_v51 = vrot.slane %v7593_v58, %v8901_v25  ;;  %v4033_v8 = vrot.slane %v8920_v63, %v8901_v25  ;;  %v8922_v58 = vld [vmem:[#allocation35_spill] sm:$0xff]  ;;  %v4394_v18 = vsel %vm4364_vm8, %v3997_v1, %v4393_v22  ;;  %v7914_v50 = vsel %vm4489_vm7, %v4388_v34, 0.0 }
 0x3ef   : > { %v4065_v61 = vrot.slane %v8922_v58, %v8901_v25  ;;  %v4081_v41 = vrot.slane %v7581_v7, %v8901_v25  ;;  %v4401_v24 = vsel %vm4364_vm8, %v4029_v39, %v4400_v0  ;;  %v4117_v55 = vrot.slane %v7601_v33, %v8901_v25 }
 0x3f0   : > { %v4417_v12 = vsel %vm4354_vm2, %v4105_v48, %v4101_v51  ;;  %v4410_v48 = vsel %vm4354_vm2, %v4073_v14, %v4069_v60  ;;  %v4169_v1 = vrot.slane %v7718_v23, %v8901_v25  ;;  %v4408_v34 = vsel %vm4364_vm8, %v4061_v38, %v4407_v4  ;;  %v8926_v4 = vld [vmem:[#allocation42_spill] sm:$0xff] }
 0x3f1   : > { %v7893_v11 = vpop.permute.xlu1 %3733  ;;  %4581 = vadd.xlane.f32.xlu1 %v7787_v40  ;;  %v4583_v40 = vsel %vm4489_vm7, %v7908_v15, 0.0  ;;  %v4418_v10 = vsel %vm4356_vm3, %v4109_v57, %v4417_v12  ;;  %v4409_v33 = vsel %vm4366_vm9, %v4065_v61, %v4408_v34  ;;  %v4402_v0 = vsel %vm4366_vm9, %v4033_v8, %v4401_v24  ;;  %v8927_v61 = vld [vmem:[#allocation53_spill] sm:$0xff] }
 0x3f2   : > { %4572 = vadd.xlane.f32.xlu0 %v4571_v45  ;;  %v7903_v9 = vpop.permute.xlu0 %3730  ;;  %v4395_v45 = vsel %vm4366_vm9, %v4001_v5, %v4394_v18  ;;  %v4419_v7 = vsel %vm4358_vm4, %v4113_v13, %v4418_v10  ;;  %v4121_v5 = vrot.slane %v7607_v56, %v8901_v25  ;;  %v4085_v23 = vrot.slane %v7579_v54, %v8901_v25 }
 0x3f3   : > { %v4411_v14 = vsel %vm4356_vm3, %v4077_v2, %v4410_v48  ;;  %v4165_v51 = vrot.slane %v7687_v21, %v8901_v25  ;;  %v4125_v38 = vrot.slane %v8925_v26, %v8901_v25  ;;  %v4173_v8 = vrot.slane %v7712_v32, %v8901_v25  ;;  %v8928_v32 = vld [vmem:[#allocation47_spill] sm:$0xff] }
 0x3f4   : > { %v4412_v56 = vsel %vm4358_vm4, %v4081_v41, %v4411_v14  ;;  %v4420_v54 = vsel %vm4360_vm5, %v4117_v55, %v4419_v7  ;;  %v4133_v57 = vrot.slane %v8926_v4, %v8901_v25  ;;  %v4177_v21 = vrot.slane %v7749_v28, %v8901_v25  ;;  %v8929_v41 = vld [vmem:[#allocation37_spill] sm:$0xff] }
 0x3f5   : > { %v7926_v22 = vpop.permute.xlu1 %3739  ;;  %4491 = vadd.xlane.f32.xlu1 %v7740_v53  ;;  %v4137_v53 = vrot.slane %v7621_v31, %v8901_v25  ;;  %v4431_v31 = vsel %vm4354_vm2, %v4169_v1, %v4165_v51  ;;  %v4421_v58 = vsel %vm4362_vm6, %v4121_v5, %v4420_v54  ;;  %v4129_v12 = vrot.slane %v8927_v61, %v8901_v25  ;;  %v8930_v5 = vld [vmem:[#allocation39_spill] sm:$0xff] }
 0x3f6   : > { %4578 = vadd.xlane.f32.xlu0 %v4577_v27  ;;  %v7933_v39 = vpop.permute.xlu0 %3736  ;;  %v8924_v27 = vld [vmem:[#allocation41_spill] sm:$0xff]  ;;  %v4141_v13 = vrot.slane %v8928_v32, %v8901_v25  ;;  %v4502_v2 = vsel %vm4489_vm7, %v4395_v45, 0.0  ;;  %v4145_v28 = vrot.slane %v7639_v42, %v8901_v25  ;;  %v4505_v48 = vsel %vm4489_vm7, %v4402_v0, 0.0 }
 0x3f7   : > { %v4089_v63 = vrot.slane %v8924_v27, %v8901_v25  ;;  %v4424_v18 = vsel %vm4354_vm2, %v4137_v53, %v4133_v57  ;;  %v4093_v24 = vrot.slane %v8929_v41, %v8901_v25  ;;  %v4413_v55 = vsel %vm4360_vm5, %v4085_v23, %v4412_v56 }
 0x3f8   : > { %v4432_v10 = vsel %vm4356_vm3, %v4173_v8, %v4431_v31  ;;  %v4185_v42 = vrot.slane %v7808_v36, %v8901_v25  ;;  %v4422_v7 = vsel %vm4364_vm8, %v4125_v38, %v4421_v58  ;;  %v4425_v0 = vsel %vm4356_vm3, %v4141_v13, %v4424_v18 }
 0x3f9   : > { %v3746_v60 = vpop.permute.xlu1 %3745  ;;  %4497 = vadd.xlane.f32.xlu1 %v7790_v16  ;;  %v4508_v16 = vsel %vm4489_vm7, %v4409_v33, 0.0  ;;  %v4414_v45 = vsel %vm4362_vm6, %v4089_v63, %v4413_v55  ;;  %v4433_v1 = vsel %vm4358_vm4, %v4177_v21, %v4432_v10  ;;  %v4097_v33 = vrot.slane %v8930_v5, %v8901_v25 }
 0x3fa   : > { %4584 = vadd.xlane.f32.xlu0 %v4583_v40  ;;  %v7963_v20 = vpop.permute.xlu0 %3742  ;;  %v4181_v40 = vrot.slane %v7737_v44, %v8901_v25  ;;  %v4201_v44 = vrot.slane %v7871_v47, %v8901_v25  ;;  %v4423_v14 = vsel %vm4366_vm9, %v4129_v12, %v4422_v7  ;;  %v4149_v36 = vrot.slane %v7634_v59, %v8901_v25 }
 0x3fb   : > { %v4426_v53 = vsel %vm4358_vm4, %v4145_v28, %v4425_v0  ;;  %v4229_v51 = vrot.slane %v3746_v60, %v8901_v25  ;;  %v4189_v27 = vrot.slane %v7799_v43, %v8901_v25  ;;  %v4193_v59 = vrot.slane %v7841_v49, %v8901_v25 }
 0x3fc   : > { %v4434_v63 = vsel %vm4360_vm5, %v4181_v40, %v4433_v1  ;;  %v4205_v38 = vrot.slane %v7858_v29, %v8901_v25  ;;  %v4153_v43 = vrot.slane %v7662_v62, %v8901_v25  ;;  %v4415_v49 = vsel %vm4364_vm8, %v4093_v24, %v4414_v45 }
 0x3fd   : > { %v3752_v34 = vpop.permute.xlu1 %3751  ;;  %4503 = vadd.xlane.f32.xlu1 %v4502_v2  ;;  %v4435_v26 = vsel %vm4362_vm6, %v4185_v42, %v4434_v63  ;;  %v4157_v29 = vrot.slane %v7657_v46, %v8901_v25  ;;  %v4514_v21 = vsel %vm4489_vm7, %v4423_v14, 0.0  ;;  %v4416_v60 = vsel %vm4366_vm9, %v4097_v33, %v4415_v49 }
 0x3fe   : > { %4494 = vadd.xlane.f32.xlu0 %v7744_v3  ;;  %v3749_v23 = vpop.permute.xlu0 %3748  ;;  %v4197_v3 = vrot.slane %v7833_v6, %v8901_v25  ;;  %v4237_v47 = vrot.slane %v3752_v34, %v8901_v25  ;;  %v4209_v6 = vrot.slane %v7903_v9, %v8901_v25  ;;  %v4427_v62 = vsel %vm4360_vm5, %v4149_v36, %v4426_v53 }
 0x3ff   : > { %v4233_v56 = vrot.slane %v3749_v23, %v8901_v25  ;;  %v4213_v61 = vrot.slane %v7893_v11, %v8901_v25  ;;  %v4428_v2 = vsel %vm4362_vm6, %v4153_v43, %v4427_v62  ;;  %v4161_v18 = vrot.slane %v7694_v30, %v8901_v25 }
 0x400   : > { %v4438_v4 = vsel %vm4354_vm2, %v4201_v44, %v4197_v3  ;;  %v4511_v40 = vsel %vm4489_vm7, %v4416_v60, 0.0  ;;  %v4221_v30 = vrot.slane %v7926_v22, %v8901_v25  ;;  %v4225_v34 = vrot.slane %v7963_v20, %v8901_v25 }
 0x401   : > { %v4445_v8 = vsel %vm4354_vm2, %v4233_v56, %v4229_v51  ;;  %v3758_v54 = vpop.permute.xlu1 %3757  ;;  %4509 = vadd.xlane.f32.xlu1 %v4508_v16  ;;  %v4439_v12 = vsel %vm4356_vm3, %v4205_v38, %v4438_v4  ;;  %v4217_v16 = vrot.slane %v7933_v39, %v8901_v25 }
 0x402   : > { %4500 = vadd.xlane.f32.xlu0 %v7914_v50  ;;  %v3755_v57 = vpop.permute.xlu0 %3754  ;;  %v4245_v58 = vrot.slane %v3758_v54, %v8901_v25  ;;  %v4446_v9 = vsel %vm4356_vm3, %v4237_v47, %v4445_v8  ;;  %v4436_v50 = vsel %vm4364_vm8, %v4189_v27, %v4435_v26  ;;  %v4440_v28 = vsel %vm4358_vm4, %v4209_v6, %v4439_v12 }
 0x403   : > { %v4241_v31 = vrot.slane %v3755_v57, %v8901_v25  ;;  %v4437_v13 = vsel %vm4366_vm9, %v4193_v59, %v4436_v50  ;;  %v4441_v45 = vsel %vm4360_vm5, %v4213_v61, %v4440_v28 }
 0x404   : > { %v4520_v10 = vsel %vm4489_vm7, %v4437_v13, 0.0  ;;  %v4442_v42 = vsel %vm4362_vm6, %v4217_v16, %v4441_v45 }
 0x405   : > { %v4447_v46 = vsel %vm4358_vm4, %v4241_v31, %v4446_v9  ;;  %v3764_v32 = vpop.permute.xlu1 %3763  ;;  %4515 = vadd.xlane.f32.xlu1 %v4514_v21  ;;  %v4443_v14 = vsel %vm4364_vm8, %v4221_v30, %v4442_v42 }
 0x406   : > { %4506 = vadd.xlane.f32.xlu0 %v4505_v48  ;;  %v3761_v11 = vpop.permute.xlu0 %3760  ;;  %v4253_v24 = vrot.slane %v3764_v32, %v8901_v25  ;;  %v4448_v55 = vsel %vm4360_vm5, %v4245_v58, %v4447_v46  ;;  %v4429_v48 = vsel %vm4364_vm8, %v4157_v29, %v4428_v2  ;;  %v4444_v20 = vsel %vm4366_vm9, %v4225_v34, %v4443_v14 }
 0x407   : > { %v4249_v41 = vrot.slane %v3761_v11, %v8901_v25  ;;  %v4430_v5 = vsel %vm4366_vm9, %v4161_v18, %v4429_v48  ;;  %v4523_v47 = vsel %vm4489_vm7, %v4444_v20, 0.0 }
 0x408   : > { %v4517_v44 = vsel %vm4489_vm7, %v4430_v5, 0.0 }
 0x409   : > { %v4449_v1 = vsel %vm4362_vm6, %v4249_v41, %v4448_v55  ;;  %v3770_v39 = vpop.permute.xlu1 %3769  ;;  %4521 = vadd.xlane.f32.xlu1 %v4520_v10 }
 0x40a   : > { %4512 = vadd.xlane.f32.xlu0 %v4511_v40  ;;  %v3767_v7 = vpop.permute.xlu0 %3766  ;;  %v4450_v22 = vsel %vm4364_vm8, %v4253_v24, %v4449_v1  ;;  %v4261_v51 = vrot.slane %v3770_v39, %v8901_v25 }
 0x40b   : > { %v4257_v33 = vrot.slane %v3767_v7, %v8901_v25 }
 0x40d   : > { %v3776_v0 = vpop.permute.xlu1 %3775  ;;  %v4451_v23 = vsel %vm4366_vm9, %v4257_v33, %v4450_v22 }
 0x40e   : > { %4518 = vadd.xlane.f32.xlu0 %v4517_v44  ;;  %v3773_v36 = vpop.permute.xlu0 %3772  ;;  %v4526_v53 = vsel %vm4489_vm7, %v4451_v23, 0.0  ;;  %v4269_v27 = vrot.slane %v3776_v0, %v8901_v25 }
 0x40f   : > { %v4265_v56 = vrot.slane %v3773_v36, %v8901_v25  ;;  %4527 = vadd.xlane.f32.xlu1 %v4526_v53 }
 0x411   : > { %v4452_v63 = vsel %vm4354_vm2, %v4265_v56, %v4261_v51  ;;  %v3782_v3 = vpop.permute.xlu1 %3781 }
 0x412   : > { %4524 = vadd.xlane.f32.xlu0 %v4523_v47  ;;  %v3779_v26 = vpop.permute.xlu0 %3778  ;;  %v4277_v38 = vrot.slane %v3782_v3, %v8901_v25  ;;  %v4453_v8 = vsel %vm4356_vm3, %v4269_v27, %v4452_v63 }
 0x413   : > { %v4273_v59 = vrot.slane %v3779_v26, %v8901_v25 }
 0x415   : > { %v4454_v54 = vsel %vm4358_vm4, %v4273_v59, %v4453_v8  ;;  %v3788_v43 = vpop.permute.xlu1 %3787 }
 0x416   : > { %v3785_v4 = vpop.permute.xlu0 %3784  ;;  %v4285_v57 = vrot.slane %v3788_v43, %v8901_v25  ;;  %v4455_v49 = vsel %vm4360_vm5, %v4277_v38, %v4454_v54 }
 0x417   : > { %v4281_v6 = vrot.slane %v3785_v4, %v8901_v25 }
 0x419   : > { %v4456_v29 = vsel %vm4362_vm6, %v4281_v6, %v4455_v49  ;;  %v3794_v31 = vpop.permute.xlu1 %3793 }
 0x41a   : > { %v3791_v21 = vpop.permute.xlu0 %3790  ;;  %v4457_v62 = vsel %vm4364_vm8, %v4285_v57, %v4456_v29  ;;  %v4293_v24 = vrot.slane %v3794_v31, %v8901_v25 }
 0x41b   : > { %v4289_v60 = vrot.slane %v3791_v21, %v8901_v25 }
 0x41d   : > { %v3818_v58 = vpop.permute.xlu1 %3817  ;;  %v4458_v9 = vsel %vm4366_vm9, %v4289_v60, %v4457_v62 }
 0x41e   : > { %v3797_v50 = vpop.permute.xlu0 %3796  ;;  %v4529_v61 = vsel %vm4489_vm7, %v4458_v9, 0.0  ;;  %v4325_v5 = vrot.slane %v3818_v58, %v8901_v25  ;;  %v8103_v58 = vstv %s5072_s26 }
 0x41f   : > { %4530 = vadd.xlane.f32.xlu0 %v4529_v61  ;;  %v4297_v16 = vrot.slane %v3797_v50, %v8901_v25  ;;  %5492 = vrcp.f32 %v8103_v58 }
 0x421   : > { %v3800_v12 = vpop.permute.xlu1 %3799  ;;  %v4459_v30 = vsel %vm4354_vm2, %v4297_v16, %v4293_v24  ;;  %v8931_v24 = vld [vmem:[#allocation59_spill] sm:$0xff] }
 0x422   : > { %v3821_v46 = vpop.permute.xlu0 %3820  ;;  %v4301_v41 = vrot.slane %v3800_v12, %v8901_v25 }
 0x423   : > { %v4329_v48 = vrot.slane %v3821_v46, %v8901_v25 }
 0x424   : > { %v4460_v39 = vsel %vm4356_vm3, %v4301_v41, %v4459_v30  ;;  %v8120_v30 = vstv %s292_s28 }
 0x425   : > { %v3803_v32 = vpop.permute.xlu1 %3802  ;;  %v4466_v53 = vsel %vm4354_vm2, %v4329_v48, %v4325_v5 }
 0x426   : > { %v3824_v13 = vpop.permute.xlu0 %3823  ;;  %v4305_v55 = vrot.slane %v3803_v32, %v8901_v25 }
 0x427   : > { %v4333_v7 = vrot.slane %v3824_v13, %v8901_v25 }
 0x428   : > { %v4461_v34 = vsel %vm4358_vm4, %v4305_v55, %v4460_v39 }
 0x429   : > { %v3806_v2 = vpop.permute.xlu1 %3805  ;;  %v4467_v56 = vsel %vm4356_vm3, %v4333_v7, %v4466_v53  ;;  %v8114_v16 = vpop.eup %5492 }
 0x42a   : > { %v3827_v18 = vpop.permute.xlu0 %3826  ;;  %v4309_v40 = vrot.slane %v3806_v2, %v8901_v25  ;;  %v8110_v2 = vstv %s5071_s27 }
 0x42b   : > { %v4337_v22 = vrot.slane %v3827_v18, %v8901_v25  ;;  %v4652_v55 = vsub.f32 %v8931_v24, %v8110_v2 }
 0x42c   : > { %v4462_v33 = vsel %vm4360_vm5, %v4309_v40, %v4461_v34 }
 0x42d   : > { %v3809_v28 = vpop.permute.xlu1 %3808  ;;  %v4468_v3 = vsel %vm4358_vm4, %v4337_v22, %v4467_v56  ;;  %v4670_v48 = vmul.f32 %v8114_v16, %v4652_v55 }
 0x42e   : > { %v3830_v11 = vpop.permute.xlu0 %3829  ;;  %v4313_v45 = vrot.slane %v3809_v28, %v8901_v25 }
 0x42f   : > { %v4341_v23 = vrot.slane %v3830_v11, %v8901_v25 }
 0x430   : > { %v4463_v44 = vsel %vm4362_vm6, %v4313_v45, %v4462_v33 }
 0x431   : > { %v3812_v10 = vpop.permute.xlu1 %3811  ;;  %v4469_v26 = vsel %vm4360_vm5, %v4341_v23, %v4468_v3 }
 0x432   : > { %v3833_v1 = vpop.permute.xlu0 %3832  ;;  %v4317_v42 = vrot.slane %v3812_v10, %v8901_v25 }
 0x433   : > { %v4345_v20 = vrot.slane %v3833_v1, %v8901_v25  ;;  %v4654_v1 = vsub.f32 %v7702_v52, %v8110_v2 }
 0x434   : > { %v4464_v51 = vsel %vm4364_vm8, %v4317_v42, %v4463_v44 }
 0x435   : > { %v3815_v0 = vpop.permute.xlu1 %3814  ;;  %v4470_v38 = vsel %vm4362_vm6, %v4345_v20, %v4469_v26  ;;  %v4672_v22 = vmul.f32 %v8114_v16, %v4654_v1  ;;  %v8932_v20 = vld [vmem:[#allocation54_spill] sm:$0xff]  ;;  %v4655_v26 = vsub.f32 %v7728_v37, %v8110_v2 }
 0x436   : > { %v4321_v14 = vrot.slane %v3815_v0, %v8901_v25  ;;  %v3836_v36 = vpop.permute.xlu0 %3835 }
 0x437   : > { %v4349_v27 = vrot.slane %v3836_v36, %v8901_v25 }
 0x438   : > { %v4465_v63 = vsel %vm4366_vm9, %v4321_v14, %v4464_v51  ;;  %v4653_v51 = vsub.f32 %v8932_v20, %v8110_v2 }
 0x439   : > { %v4532_v47 = vsel %vm4489_vm7, %v4465_v63, 0.0  ;;  %v4471_v54 = vsel %vm4364_vm8, %v4349_v27, %v4470_v38 }
 0x43a   : > { %v3839_v59 = vpop.permute.xlu0 %3838  ;;  %4533 = vadd.xlane.f32.xlu1 %v4532_v47  ;;  %v4671_v37 = vmul.f32 %v8114_v16, %v4653_v51 }
 0x43b   : > { %v4353_v8 = vrot.slane %v3839_v59, %v8901_v25 }
 0x43d   : > { %v4472_v43 = vsel %vm4366_vm9, %v4353_v8, %v4471_v54 }
 0x43e   : > { %v4535_v4 = vsel %vm4489_vm7, %v4472_v43, 0.0 }
 0x43f   : > { %4536 = vadd.xlane.f32.xlu0 %v4535_v4 }
 0x466   : > { %v4540_v6 = vpop.xlane.xlu1 %4539 }
 0x467   : > { %v4543_v57 = vpop.xlane.xlu0 %4542  ;;  %v4586_v60 = vmax.f32 %v4540_v6, 1.0 }
 0x468   : > { %v4587_v32 = vmax.f32 %v4543_v57, 1.0 }
 0x469   : > { %5494 = vrcp.f32 %v4586_v60 }
 0x46a   : > { %v4552_v49 = vpop.xlane.xlu1 %4551 }
 0x46b   : > { %v4546_v29 = vpop.xlane.xlu0 %4545  ;;  %v4590_v12 = vmax.f32 %v4552_v49, 1.0 }
 0x46c   : > { %v4588_v25 = vmax.f32 %v4546_v29, 1.0 }
 0x46e   : > { %v4558_v31 = vpop.xlane.xlu1 %4557  ;;  %5496 = vrcp.f32 %v4588_v25  ;;  %v4673_v25 = vmul.f32 %v8114_v16, %v4655_v26 }
 0x46f   : > { %v4549_v21 = vpop.xlane.xlu0 %4548  ;;  %5498 = vrcp.f32 %v4590_v12  ;;  %v4592_v18 = vmax.f32 %v4558_v31, 1.0  ;;  %v4656_v31 = vsub.f32 %v7697_v35, %v8110_v2 }
 0x470   : > { %5500 = vrcp.f32 %v4587_v32  ;;  %v4589_v11 = vmax.f32 %v4549_v21, 1.0 }
 0x471   : > { %5502 = vrcp.f32 %v4592_v18 }
 0x472   : > { %v4564_v62 = vpop.xlane.xlu1 %4563  ;;  %5504 = vrcp.f32 %v4589_v11 }
 0x473   : > { %v4555_v9 = vpop.xlane.xlu0 %4554  ;;  %v5495_v40 = vpop.eup %5494  ;;  %v4594_v10 = vmax.f32 %v4564_v62, 1.0 }
 0x474   : > { %v4591_v39 = vmax.f32 %v4555_v9, 1.0 }
 0x475   : > { %5506 = vrcp.f32 %v4594_v10  ;;  %v8933_v10 = vld [vmem:[#allocation60_spill] sm:$0xff] }
 0x476   : > { %v4570_v50 = vpop.xlane.xlu1 %4569  ;;  %5508 = vrcp.f32 %v4591_v39 }
 0x477   : > { %v4561_v61 = vpop.xlane.xlu0 %4560  ;;  %v4596_v5 = vmax.f32 %v4570_v50, 1.0  ;;  %v4657_v50 = vsub.f32 %v7757_v19, %v8110_v2 }
 0x478   : > { %v5497_v7 = vpop.eup %5496  ;;  %v4593_v52 = vmax.f32 %v4561_v61, 1.0 }
 0x479   : > { %v5499_v53 = vpop.eup %5498  ;;  %5510 = vrcp.f32 %v4596_v5 }
 0x47a   : > { %v8106_v46 = vpop.xlane.xlu1 %4575  ;;  %v5501_v56 = vpop.eup %5500  ;;  %5512 = vrcp.f32 %v4593_v52 }
 0x47b   : > { %v8108_v13 = vpop.xlane.xlu0 %4566  ;;  %v5503_v4 = vpop.eup %5502  ;;  %v4598_v6 = vmax.f32 %v8106_v46, 1.0 }
 0x47c   : > { %v4595_v59 = vmax.f32 %v8108_v13, 1.0  ;;  %v5505_v49 = vpop.eup %5504 }
 0x47e   : > { %v8112_v28 = vpop.xlane.xlu1 %4581  ;;  %5514 = vrcp.f32 %v4595_v59 }
 0x47f   : > { %v8116_v41 = vpop.xlane.xlu0 %4572  ;;  %v5507_v32 = vpop.eup %5506  ;;  %5516 = vrcp.f32 %v4598_v6 }
 0x480   : > { %v4597_v61 = vmax.f32 %v8116_v41, 1.0  ;;  %v5509_v11 = vpop.eup %5508  ;;  %v4674_v41 = vmul.f32 %v8114_v16, %v4656_v31 }
 0x482   : > { %v4492_v45 = vpop.xlane.xlu1 %4491  ;;  %5518 = vrcp.f32 %v4597_v61 }
 0x483   : > { %v4618_v42 = vmul.f32 %v5495_v40, %v4492_v45  ;;  %v8125_v34 = vpop.xlane.xlu0 %4578  ;;  %v4658_v45 = vsub.f32 %v8933_v10, %v8110_v2 }
 0x485   : > { %v4635_v33 = vadd.f32 %v8120_v30, %v4618_v42  ;;  %v5511_v42 = vpop.eup %5510 }
 0x486   : > { %v4498_v0 = vpop.xlane.xlu1 %4497 }
 0x487   : > { %v4686_v44 = vmul.f32 %v8103_v58, %v4635_v33  ;;  %4719 = vst.msk [vmem:[%s8132_s7] sm:$0xff] %vm4718_vm10, %v4635_v33  ;;  %v4752_v23 = vsub.f32 %v4635_v33, %v4670_v48  ;;  %v4620_v14 = vmul.f32 %v5497_v7, %v4498_v0  ;;  %v8139_v36 = vpop.xlane.xlu0 %4584  ;;  %v4675_v33 = vmul.f32 %v8114_v16, %v4657_v50 }
 0x489   : > { %v8144_v27 = vadd.f32 %v4686_v44, %v8110_v2  ;;  %v4637_v63 = vadd.f32 %v8120_v30, %v4620_v14  ;;  %v4768_v3 = vand.u32 2147483647, %v4752_v23  ;;  %v8934_v14 = vld [vmem:[#allocation6_spill] sm:$0xff] }
 0x48a   : > { %v4504_v47 = vpop.xlane.xlu1 %4503 }
 0x48b   : > { %v4688_v38 = vmul.f32 %v8103_v58, %v4637_v63  ;;  %4721 = vst.msk [vmem:[%s8132_s7 + $0x10] sm:$0xff] %vm4718_vm10, %v4637_v63  ;;  %v4754_v8 = vsub.f32 %v4637_v63, %v4672_v22  ;;  %v4622_v54 = vmul.f32 %v5499_v53, %v4504_v47  ;;  %v4495_v43 = vpop.xlane.xlu0 %4494  ;;  %4800 = vrot.lane.b32.xlu1 %v4768_v3, %s5590_s8  ;;  %v5513_v22 = vpop.eup %5512 }
 0x48c   : > { %4736 = vst.msk [vmem:[%s8132_s7] sm:$0xff] %vm4735_vm11, %v8144_v27  ;;  %v4619_v57 = vmul.f32 %v5501_v56, %v4495_v43  ;;  %v4659_v53 = vsub.f32 %v8934_v14, %v8110_v2  ;;  %v8935_v56 = vld [vmem:[#allocation89_spill] sm:$0xff]  ;;  %v4676_v47 = vmul.f32 %v8114_v16, %v4658_v45  ;;  %v8936_v43 = vld [vmem:[#allocation67_spill] sm:$0xff] }
 0x48d   : > { %v8160_v29 = vadd.f32 %v4688_v38, %v8110_v2  ;;  %v8165_v21 = vadd.f32 %v8120_v30, %v4622_v54  ;;  %v4770_v60 = vand.u32 2147483647, %v4754_v8  ;;  %v4660_v63 = vsub.f32 %v8935_v56, %v8110_v2  ;;  %v8938_v45 = vld [vmem:[#allocation133_spill] sm:$0xff] }
 0x48e   : > { %v4636_v62 = vadd.f32 %v8120_v30, %v4619_v57  ;;  %v4510_v9 = vpop.xlane.xlu1 %4509  ;;  %v8937_v57 = vld [vmem:[#allocation85_spill] sm:$0xff] }
 0x48f   : > { %v4690_v12 = vmul.f32 %v8103_v58, %v8165_v21  ;;  %4723 = vst.msk [vmem:[%s8132_s7 + $0x20] sm:$0xff] %vm4718_vm10, %v8165_v21  ;;  %v4624_v35 = vmul.f32 %v5503_v4, %v4510_v9  ;;  %v4501_v46 = vpop.xlane.xlu0 %4500  ;;  %4804 = vrot.lane.b32.xlu1 %v4770_v60, %s5590_s8  ;;  %v4756_v20 = vsub.f32 %v8165_v21, %v4674_v41  ;;  %v5515_v9 = vpop.eup %5514 }
 0x490   : > { %4738 = vst.msk [vmem:[%s8132_s7 + $0x10] sm:$0xff] %vm4735_vm11, %v8160_v29  ;;  %v4687_v19 = vmul.f32 %v8103_v58, %v4636_v62  ;;  %v4753_v13 = vsub.f32 %v4636_v62, %v4671_v37  ;;  %v4621_v18 = vmul.f32 %v5505_v49, %v4501_v46  ;;  %v4662_v4 = vsub.f32 %v8936_v43, %v8110_v2 }
 0x491   : > { %4720 = vst.msk [vmem:[%s8132_s7 + $0x8] sm:$0xff] %vm4718_vm10, %v4636_v62  ;;  %v8186_v24 = vadd.f32 %v4690_v12, %v8110_v2  ;;  %v8189_v55 = vadd.f32 %v8120_v30, %v4624_v35  ;;  %v4661_v49 = vsub.f32 %v8937_v57, %v8110_v2  ;;  %v4677_v60 = vmul.f32 %v8114_v16, %v4659_v53  ;;  %v5517_v35 = vpop.eup %5516 }
 0x492   : > { %v8192_v40 = vadd.f32 %v4687_v19, %v8110_v2  ;;  %v4638_v1 = vadd.f32 %v8120_v30, %v4621_v18  ;;  %v4516_v39 = vpop.xlane.xlu1 %4515  ;;  %v4769_v48 = vand.u32 2147483647, %v4753_v13  ;;  %v4772_v12 = vand.u32 2147483647, %v4756_v20 }
 0x493   : > { %v4692_v7 = vmul.f32 %v8103_v58, %v8189_v55  ;;  %4725 = vst.msk [vmem:[%s8132_s7 + $0x30] sm:$0xff] %vm4718_vm10, %v8189_v55  ;;  %v4626_v5 = vmul.f32 %v5507_v32, %v4516_v39  ;;  %v4507_v52 = vpop.xlane.xlu0 %4506  ;;  %v4758_v46 = vsub.f32 %v8189_v55, %v4676_v47  ;;  %v4680_v18 = vmul.f32 %v8114_v16, %v4662_v4 }
 0x494   : > { %4740 = vst.msk [vmem:[%s8132_s7 + $0x20] sm:$0xff] %vm4735_vm11, %v8186_v24  ;;  %v4689_v0 = vmul.f32 %v8103_v58, %v4638_v1  ;;  %v4755_v44 = vsub.f32 %v4638_v1, %v4673_v25  ;;  %v4623_v23 = vmul.f32 %v5509_v11, %v4507_v52  ;;  %4802 = vrot.lane.b32.xlu0 %v4769_v48, %s5590_s8  ;;  %4737 = vst.msk [vmem:[%s8132_s7 + $0x8] sm:$0xff] %vm4735_vm11, %v8192_v40  ;;  %v8939_v52 = vld [vmem:[#allocation65_spill] sm:$0xff] }
 0x495   : > { %4722 = vst.msk [vmem:[%s8132_s7 + $0x18] sm:$0xff] %vm4718_vm10, %v4638_v1  ;;  %v8217_v51 = vadd.f32 %v4692_v7, %v8110_v2  ;;  %v8222_v3 = vadd.f32 %v8120_v30, %v4626_v5  ;;  %v4678_v25 = vmul.f32 %v8114_v16, %v4660_v63  ;;  %v4679_v41 = vmul.f32 %v8114_v16, %v4661_v49  ;;  %v5519_v5 = vpop.eup %5518 }
 0x496   : > { %v8226_v26 = vadd.f32 %v4689_v0, %v8110_v2  ;;  %v4640_v59 = vadd.f32 %v8120_v30, %v4623_v23  ;;  %v4522_v38 = vpop.xlane.xlu1 %4521  ;;  %v4771_v8 = vand.u32 2147483647, %v4755_v44  ;;  %v4663_v1 = vsub.f32 %v8938_v45, %v8110_v2 }
 0x497   : > { %v4694_v54 = vmul.f32 %v8103_v58, %v8222_v3  ;;  %4727 = vst.msk [vmem:[%s8132_s7 + $0x40] sm:$0xff] %vm4718_vm10, %v8222_v3  ;;  %v4628_v6 = vmul.f32 %v5511_v42, %v4522_v38  ;;  %v4513_v37 = vpop.xlane.xlu0 %4512  ;;  %v4599_v55 = vmax.f32 %v8125_v34, 1.0  ;;  %v4774_v14 = vand.u32 2147483647, %v4758_v46 }
 0x498   : > { %4742 = vst.msk [vmem:[%s8132_s7 + $0x30] sm:$0xff] %vm4735_vm11, %v8217_v51  ;;  %v4691_v31 = vmul.f32 %v8103_v58, %v4640_v59  ;;  %v4757_v21 = vsub.f32 %v4640_v59, %v4675_v33  ;;  %v4625_v62 = vmul.f32 %v5513_v22, %v4513_v37  ;;  %4806 = vrot.lane.b32.xlu1 %v4771_v8, %s5590_s8  ;;  %4739 = vst.msk [vmem:[%s8132_s7 + $0x18] sm:$0xff] %vm4735_vm11, %v8226_v26 }
 0x499   : > { %4724 = vst.msk [vmem:[%s8132_s7 + $0x28] sm:$0xff] %vm4718_vm10, %v4640_v59  ;;  %v8251_v50 = vadd.f32 %v4694_v54, %v8110_v2  ;;  %v4645_v61 = vadd.f32 %v8120_v30, %v4628_v6  ;;  %v4760_v33 = vsub.f32 %v8222_v3, %v4678_v25  ;;  %v4664_v22 = vsub.f32 %v8939_v52, %v8110_v2 }
 0x49a   : > { %v8256_v32 = vadd.f32 %v4691_v31, %v8110_v2  ;;  %v4642_v19 = vadd.f32 %v8120_v30, %v4625_v62  ;;  %v4773_v13 = vand.u32 2147483647, %v4757_v21  ;;  %v4681_v56 = vmul.f32 %v8114_v16, %v4663_v1  ;;  %v8349_v1 = vld [vmem:[%s5709_s16 + $0x70] sm:$0xff] }
 0x49b   : > { %v4696_v11 = vmul.f32 %v8103_v58, %v4645_v61  ;;  %4729 = vst.msk [vmem:[%s8132_s7 + $0x50] sm:$0xff] %vm4718_vm10, %v4645_v61  ;;  %v4519_v10 = vpop.xlane.xlu0 %4518  ;;  %5520 = vrcp.f32 %v4599_v55  ;;  %v4682_v38 = vmul.f32 %v8114_v16, %v4664_v22  ;;  %v4776_v54 = vand.u32 2147483647, %v4760_v33 }
 0x49c   : > { %4744 = vst.msk [vmem:[%s8132_s7 + $0x40] sm:$0xff] %vm4735_vm11, %v8251_v50  ;;  %v4693_v39 = vmul.f32 %v8103_v58, %v4642_v19  ;;  %v4759_v48 = vsub.f32 %v4642_v19, %v4677_v60  ;;  %v4627_v42 = vmul.f32 %v5515_v9, %v4519_v10  ;;  %v4528_v7 = vpop.xlane.xlu1 %4527  ;;  %4808 = vrot.lane.b32.xlu1 %v4772_v12, %s5590_s8  ;;  %4741 = vst.msk [vmem:[%s8132_s7 + $0x28] sm:$0xff] %vm4735_vm11, %v8256_v32 }
 0x49d   : > { %4726 = vst.msk [vmem:[%s8132_s7 + $0x38] sm:$0xff] %vm4718_vm10, %v4642_v19  ;;  %4810 = vrot.lane.b32.xlu0 %v4773_v13, %s5590_s8  ;;  %v8280_v34 = vadd.f32 %v4696_v11, %v8110_v2  ;;  %v4630_v0 = vmul.f32 %v5517_v35, %v4528_v7  ;;  %v4762_v43 = vsub.f32 %v4645_v61, %v4680_v18  ;;  %v4600_v10 = vmax.f32 %v8112_v28, 1.0 }
 0x49e   : > { %v8285_v44 = vadd.f32 %v4693_v39, %v8110_v2  ;;  %v4644_v23 = vadd.f32 %v8120_v30, %v4627_v42  ;;  %v4775_v53 = vand.u32 2147483647, %v4759_v48  ;;  %v4665_v25 = vsub.f32 %v7861_v17, %v8110_v2 }
 0x49f   : > { %v4647_v20 = vadd.f32 %v8120_v30, %v4630_v0  ;;  %v4525_v63 = vpop.xlane.xlu0 %4524  ;;  %4746 = vst.msk [vmem:[%s8132_s7 + $0x50] sm:$0xff] %vm4735_vm11, %v8280_v34  ;;  %v4778_v62 = vand.u32 2147483647, %v4762_v43  ;;  %5522 = vrcp.f32 %v4600_v10  ;;  %v4601_v45 = vmax.f32 %v8139_v36, 1.0 }
 0x4a0   : > { %v4695_v3 = vmul.f32 %v8103_v58, %v4644_v23  ;;  %4728 = vst.msk [vmem:[%s8132_s7 + $0x48] sm:$0xff] %vm4718_vm10, %v4644_v23  ;;  %v4761_v47 = vsub.f32 %v4644_v23, %v4679_v41  ;;  %v4629_v59 = vmul.f32 %v5519_v5, %v4525_v63  ;;  %4812 = vrot.lane.b32.xlu1 %v4774_v14, %s5590_s8 }
 0x4a1   : > { %4814 = vrot.lane.b32.xlu0 %v4775_v53, %s5590_s8  ;;  %4743 = vst.msk [vmem:[%s8132_s7 + $0x38] sm:$0xff] %vm4735_vm11, %v8285_v44  ;;  %v4698_v8 = vmul.f32 %v8103_v58, %v4647_v20  ;;  %v4764_v21 = vsub.f32 %v4647_v20, %v4682_v38  ;;  %v4683_v46 = vmul.f32 %v8114_v16, %v4665_v25  ;;  %5524 = vrcp.f32 %v4601_v45  ;;  %v5548_v38 = vld [vmem:[%s5709_s16 + $0x8] sm:$0xff] }
 0x4a2   : > { %4731 = vst.msk [vmem:[%s8132_s7 + $0x60] sm:$0xff] %vm4718_vm10, %v4647_v20  ;;  %v8306_v4 = vadd.f32 %v4695_v3, %v8110_v2  ;;  %v4646_v6 = vadd.f32 %v8120_v30, %v4629_v59  ;;  %v4777_v37 = vand.u32 2147483647, %v4761_v47  ;;  %v4666_v55 = vsub.f32 %v8349_v1, %v8110_v2  ;;  %v5547_v47 = vld [vmem:[%s5709_s16 + $0x10] sm:$0xff] }
 0x4a3   : > { %v8310_v57 = vadd.f32 %v4698_v8, %v8110_v2  ;;  %v4780_v12 = vand.u32 2147483647, %v4764_v21  ;;  %v4667_v5 = vsub.f32 %v7908_v15, %v8110_v2  ;;  %v5546_v15 = vld [vmem:[%s5709_s16] sm:$0xff]  ;;  %v4867_v59 = vsub.f32 %v8160_v29, %v5547_v47  ;;  %v5552_v21 = vld [vmem:[%s5709_s16 + $0x28] sm:$0xff] }
 0x4a4   : > { %v4697_v49 = vmul.f32 %v8103_v58, %v4646_v6  ;;  %4730 = vst.msk [vmem:[%s8132_s7 + $0x58] sm:$0xff] %vm4718_vm10, %v4646_v6  ;;  %v4763_v31 = vsub.f32 %v4646_v6, %v4681_v56  ;;  %4816 = vrot.lane.b32.xlu1 %v4776_v54, %s5590_s8  ;;  %v4684_v42 = vmul.f32 %v8114_v16, %v4666_v55  ;;  %v5549_v54 = vld [vmem:[%s5709_s16 + $0x20] sm:$0xff]  ;;  %v5559_v55 = vld [vmem:[%s5709_s16 + $0x68] sm:$0xff] }
 0x4a5   : > { %4818 = vrot.lane.b32.xlu0 %v4777_v37, %s5590_s8  ;;  %4745 = vst.msk [vmem:[%s8132_s7 + $0x48] sm:$0xff] %vm4735_vm11, %v8306_v4  ;;  %4748 = vst.msk [vmem:[%s8132_s7 + $0x60] sm:$0xff] %vm4735_vm11, %v8310_v57  ;;  %v5521_v61 = vpop.eup %5520  ;;  %v4685_v0 = vmul.f32 %v8114_v16, %v4667_v5  ;;  %v4865_v20 = vsub.f32 %v8144_v27, %v5546_v15  ;;  %v4866_v8 = vsub.f32 %v8192_v40, %v5548_v38  ;;  %v5551_v37 = vld [vmem:[%s5709_s16 + $0x30] sm:$0xff] }
 0x4a6   : > { %v8324_v60 = vadd.f32 %v4697_v49, %v8110_v2  ;;  %v4779_v9 = vand.u32 2147483647, %v4763_v31  ;;  %v4869_v29 = vsub.f32 %v8186_v24, %v5549_v54  ;;  %v4871_v49 = vsub.f32 %v8217_v51, %v5551_v37 }
 0x4a7   : > { %v4881_v3 = vand.u32 2147483647, %v4865_v20  ;;  %v4882_v43 = vand.u32 2147483647, %v4866_v8 }
 0x4a8   : > { %4820 = vrot.lane.b32.xlu1 %v4778_v62, %s5590_s8  ;;  %4747 = vst.msk [vmem:[%s8132_s7 + $0x58] sm:$0xff] %vm4735_vm11, %v8324_v60  ;;  %v4885_v40 = vand.u32 2147483647, %v4869_v29  ;;  %v4870_v62 = vsub.f32 %v8256_v32, %v5552_v21  ;;  %v4887_v24 = vand.u32 2147483647, %v4871_v49  ;;  %v5555_v32 = vld [vmem:[%s5709_s16 + $0x50] sm:$0xff] }
 0x4a9   : > { %4822 = vrot.lane.b32.xlu0 %v4779_v9, %s5590_s8  ;;  %v5523_v39 = vpop.eup %5522 }
 0x4aa   : > { %v4886_v25 = vand.u32 2147483647, %v4870_v62 }
 0x4ab   : > { %v5525_v36 = vpop.eup %5524 }
 0x4ac   : > { %4824 = vrot.lane.b32.xlu1 %v4780_v12, %s5590_s8  ;;  %v4531_v35 = vpop.xlane.xlu0 %4530 }
 0x4ad   : > { %v4631_v19 = vmul.f32 %v5521_v61, %v4531_v35  ;;  %v5554_v61 = vld [vmem:[%s5709_s16 + $0x38] sm:$0xff]  ;;  %v4875_v35 = vsub.f32 %v8280_v34, %v5555_v32 }
 0x4ae   : > { %v4872_v12 = vsub.f32 %v8285_v44, %v5554_v61 }
 0x4af   : > { %v4648_v13 = vadd.f32 %v8120_v30, %v4631_v19  ;;  %v5556_v19 = vld [vmem:[%s5709_s16 + $0x48] sm:$0xff] }
 0x4b1   : > { %v4699_v18 = vmul.f32 %v8103_v58, %v4648_v13  ;;  %4732 = vst.msk [vmem:[%s8132_s7 + $0x68] sm:$0xff] %vm4718_vm10, %v4648_v13  ;;  %v4765_v11 = vsub.f32 %v4648_v13, %v4683_v46  ;;  %v4888_v46 = vand.u32 2147483647, %v4872_v12  ;;  %v4874_v13 = vsub.f32 %v8306_v4, %v5556_v19 }
 0x4b3   : > { %v8340_v41 = vadd.f32 %v4699_v18, %v8110_v2  ;;  %v4781_v17 = vand.u32 2147483647, %v4765_v11  ;;  %v5557_v18 = vld [vmem:[%s5709_s16 + $0x60] sm:$0xff]  ;;  %v4890_v11 = vand.u32 2147483647, %v4874_v13 }
 0x4b4   : > { %v4877_v44 = vsub.f32 %v8310_v57, %v5557_v18 }
 0x4b5   : > { %4826 = vrot.lane.b32.xlu0 %v4781_v17, %s5590_s8  ;;  %4749 = vst.msk [vmem:[%s8132_s7 + $0x68] sm:$0xff] %vm4735_vm11, %v8340_v41  ;;  %v5558_v17 = vld [vmem:[%s5709_s16 + $0x58] sm:$0xff] }
 0x4b6   : > { %v4876_v10 = vsub.f32 %v8324_v60, %v5558_v17  ;;  %v4893_v34 = vand.u32 2147483647, %v4877_v44 }
 0x4b8   : > { %v4892_v45 = vand.u32 2147483647, %v4876_v10 }
 0x4c7   : > { %v4534_v48 = vpop.xlane.xlu1 %4533 }
 0x4c8   : > { %v4632_v7 = vmul.f32 %v5523_v39, %v4534_v48  ;;  %v4878_v39 = vsub.f32 %v8340_v41, %v5559_v55  ;;  %v5560_v48 = vld [vmem:[%s5709_s16 + $0x78] sm:$0xff] }
 0x4ca   : > { %v4649_v28 = vadd.f32 %v8120_v30, %v4632_v7  ;;  %v4894_v60 = vand.u32 2147483647, %v4878_v39 }
 0x4cc   : > { %v4700_v33 = vmul.f32 %v8103_v58, %v4649_v28  ;;  %4733 = vst.msk [vmem:[%s8132_s7 + $0x70] sm:$0xff] %vm4718_vm10, %v4649_v28  ;;  %v4766_v52 = vsub.f32 %v4649_v28, %v4684_v42  ;;  %v4537_v22 = vpop.xlane.xlu0 %4536 }
 0x4cd   : > { %v4633_v23 = vmul.f32 %v5525_v36, %v4537_v22 }
 0x4ce   : > { %v8362_v14 = vadd.f32 %v4700_v33, %v8110_v2  ;;  %v4782_v53 = vand.u32 2147483647, %v4766_v52 }
 0x4cf   : > { %v4650_v56 = vadd.f32 %v8120_v30, %v4633_v23 }
 0x4d0   : > { %4828 = vrot.lane.b32.xlu1 %v4782_v53, %s5590_s8  ;;  %4750 = vst.msk [vmem:[%s8132_s7 + $0x70] sm:$0xff] %vm4735_vm11, %v8362_v14  ;;  %v4879_v4 = vsub.f32 %v8362_v14, %v8349_v1 }
 0x4d1   : > { %v4701_v16 = vmul.f32 %v8103_v58, %v4650_v56  ;;  %4734 = vst.msk [vmem:[%s8132_s7 + $0x78] sm:$0xff] %vm4718_vm10, %v4650_v56  ;;  %v4767_v63 = vsub.f32 %v4650_v56, %v4685_v0  ;;  %v4883_v58 = vand.u32 2147483647, %v4867_v59 }
 0x4d2   : > { %v4895_v57 = vand.u32 2147483647, %v4879_v4 }
 0x4d3   : > { %v4717_v27 = vadd.f32 %v4701_v16, %v8110_v2  ;;  %v4783_v30 = vand.u32 2147483647, %v4767_v63  ;;  %v5550_v2 = vld [vmem:[%s5709_s16 + $0x18] sm:$0xff] }
 0x4d4   : > { %4913 = vrot.lane.b32.xlu1 %v4881_v3, %s5591_s9  ;;  %v4868_v6 = vsub.f32 %v8226_v26, %v5550_v2  ;;  %v5553_v26 = vld [vmem:[%s5709_s16 + $0x40] sm:$0xff] }
 0x4d5   : > { %4830 = vrot.lane.b32.xlu0 %v4783_v30, %s5590_s8  ;;  %4751 = vst.msk [vmem:[%s8132_s7 + $0x78] sm:$0xff] %vm4735_vm11, %v4717_v27  ;;  %v4873_v9 = vsub.f32 %v8251_v50, %v5553_v26  ;;  %v4891_v50 = vand.u32 2147483647, %v4875_v35  ;;  %v4880_v42 = vsub.f32 %v4717_v27, %v5560_v48 }
 0x4d6   : > { %v4884_v31 = vand.u32 2147483647, %v4868_v6 }
 0x4d7   : > { %v4889_v51 = vand.u32 2147483647, %v4873_v9  ;;  %v4896_v1 = vand.u32 2147483647, %v4880_v42 }
 0x4d8   : > { %4917 = vrot.lane.b32.xlu1 %v4883_v58, %s5591_s9 }
 0x4d9   : > { %4915 = vrot.lane.b32.xlu0 %v4882_v43, %s5591_s9 }
 0x4dc   : > { %4921 = vrot.lane.b32.xlu1 %v4885_v40, %s5591_s9 }
 0x4dd   : > { %4919 = vrot.lane.b32.xlu0 %v4884_v31, %s5591_s9 }
 0x4e0   : > { %4925 = vrot.lane.b32.xlu1 %v4887_v24, %s5591_s9 }
 0x4e1   : > { %4923 = vrot.lane.b32.xlu0 %v4886_v25, %s5591_s9 }
 0x4e4   : > { %4929 = vrot.lane.b32.xlu1 %v4889_v51, %s5591_s9 }
 0x4e5   : > { %4927 = vrot.lane.b32.xlu0 %v4888_v46, %s5591_s9 }
 0x4e8   : > { %4933 = vrot.lane.b32.xlu1 %v4891_v50, %s5591_s9 }
 0x4e9   : > { %4931 = vrot.lane.b32.xlu0 %v4890_v11, %s5591_s9 }
 0x4ec   : > { %4937 = vrot.lane.b32.xlu1 %v4893_v34, %s5591_s9 }
 0x4ed   : > { %4935 = vrot.lane.b32.xlu0 %v4892_v45, %s5591_s9 }
 0x4f0   : > { %4941 = vrot.lane.b32.xlu1 %v4895_v57, %s5591_s9 }
 0x4f1   : > { %4939 = vrot.lane.b32.xlu0 %v4894_v60, %s5591_s9 }
 0x4f5   : > { %4943 = vrot.lane.b32.xlu0 %v4896_v1, %s5591_s9 }
 0x4fd   : > { %v4801_v41 = vpop.permute.xlu1 %4800 }
 0x4fe   : > { %4849 = vst.msk [vmem:[%s8132_s7] sm:$0xff] %vm4848_vm12, %v4801_v41 }
 0x501   : > { %v4805_v7 = vpop.permute.xlu1 %4804 }
 0x502   : > { %4851 = vst.msk [vmem:[%s8132_s7 + $0x10] sm:$0xff] %vm4848_vm12, %v4805_v7 }
 0x506   : > { %v4803_v5 = vpop.permute.xlu0 %4802 }
 0x507   : > { %4850 = vst.msk [vmem:[%s8132_s7 + $0x8] sm:$0xff] %vm4848_vm12, %v4803_v5 }
 0x50a   : > { %v4807_v28 = vpop.permute.xlu1 %4806 }
 0x50b   : > { %4852 = vst.msk [vmem:[%s8132_s7 + $0x18] sm:$0xff] %vm4848_vm12, %v4807_v28 }
 0x50e   : > { %v4809_v36 = vpop.permute.xlu1 %4808 }
 0x50f   : > { %v4811_v33 = vpop.permute.xlu0 %4810  ;;  %4853 = vst.msk [vmem:[%s8132_s7 + $0x20] sm:$0xff] %vm4848_vm12, %v4809_v36 }
 0x510   : > { %4854 = vst.msk [vmem:[%s8132_s7 + $0x28] sm:$0xff] %vm4848_vm12, %v4811_v33 }
 0x512   : > { %v4813_v52 = vpop.permute.xlu1 %4812 }
 0x513   : > { %v4815_v22 = vpop.permute.xlu0 %4814  ;;  %4855 = vst.msk [vmem:[%s8132_s7 + $0x30] sm:$0xff] %vm4848_vm12, %v4813_v52 }
 0x514   : > { %4856 = vst.msk [vmem:[%s8132_s7 + $0x38] sm:$0xff] %vm4848_vm12, %v4815_v22 }
 0x516   : > { %v4817_v0 = vpop.permute.xlu1 %4816 }
 0x517   : > { %v4819_v23 = vpop.permute.xlu0 %4818  ;;  %4857 = vst.msk [vmem:[%s8132_s7 + $0x40] sm:$0xff] %vm4848_vm12, %v4817_v0 }
 0x518   : > { %4858 = vst.msk [vmem:[%s8132_s7 + $0x48] sm:$0xff] %vm4848_vm12, %v4819_v23 }
 0x51a   : > { %v4821_v14 = vpop.permute.xlu1 %4820 }
 0x51b   : > { %v4823_v53 = vpop.permute.xlu0 %4822  ;;  %4859 = vst.msk [vmem:[%s8132_s7 + $0x50] sm:$0xff] %vm4848_vm12, %v4821_v14 }
 0x51c   : > { %4860 = vst.msk [vmem:[%s8132_s7 + $0x58] sm:$0xff] %vm4848_vm12, %v4823_v53 }
 0x51e   : > { %v4825_v15 = vpop.permute.xlu1 %4824 }
 0x51f   : > { %4861 = vst.msk [vmem:[%s8132_s7 + $0x60] sm:$0xff] %vm4848_vm12, %v4825_v15 }
 0x527   : > { %v4827_v20 = vpop.permute.xlu0 %4826 }
 0x528   : > { %4862 = vst.msk [vmem:[%s8132_s7 + $0x68] sm:$0xff] %vm4848_vm12, %v4827_v20 }
 0x542   : > { %v4829_v56 = vpop.permute.xlu1 %4828 }
 0x543   : > { %4863 = vst.msk [vmem:[%s8132_s7 + $0x70] sm:$0xff] %vm4848_vm12, %v4829_v56 }
 0x546   : > { %v4914_v16 = vpop.permute.xlu1 %4913 }
 0x547   : > { %4962 = vst.msk [vmem:[%s8132_s7] sm:$0xff] %vm4961_vm13, %v4914_v16  ;;  %v4831_v63 = vpop.permute.xlu0 %4830 }
 0x548   : > { %4864 = vst.msk [vmem:[%s8132_s7 + $0x78] sm:$0xff] %vm4848_vm12, %v4831_v63 }
 0x54a   : > { %v4918_v3 = vpop.permute.xlu1 %4917 }
 0x54b   : > { %4964 = vst.msk [vmem:[%s8132_s7 + $0x10] sm:$0xff] %vm4961_vm13, %v4918_v3  ;;  %v4916_v47 = vpop.permute.xlu0 %4915 }
 0x54c   : > { %4963 = vst.msk [vmem:[%s8132_s7 + $0x8] sm:$0xff] %vm4961_vm13, %v4916_v47 }
 0x54e   : > { %v4922_v59 = vpop.permute.xlu1 %4921 }
 0x54f   : > { %4966 = vst.msk [vmem:[%s8132_s7 + $0x20] sm:$0xff] %vm4961_vm13, %v4922_v59  ;;  %v4920_v27 = vpop.permute.xlu0 %4919 }
 0x550   : > { %4965 = vst.msk [vmem:[%s8132_s7 + $0x18] sm:$0xff] %vm4961_vm13, %v4920_v27 }
 0x552   : > { %v4926_v30 = vpop.permute.xlu1 %4925 }
 0x553   : > { %4968 = vst.msk [vmem:[%s8132_s7 + $0x30] sm:$0xff] %vm4961_vm13, %v4926_v30  ;;  %v4924_v38 = vpop.permute.xlu0 %4923 }
 0x554   : > { %4967 = vst.msk [vmem:[%s8132_s7 + $0x28] sm:$0xff] %vm4961_vm13, %v4924_v38 }
 0x556   : > { %v4930_v8 = vpop.permute.xlu1 %4929 }
 0x557   : > { %4970 = vst.msk [vmem:[%s8132_s7 + $0x40] sm:$0xff] %vm4961_vm13, %v4930_v8  ;;  %v4928_v58 = vpop.permute.xlu0 %4927 }
 0x558   : > { %4969 = vst.msk [vmem:[%s8132_s7 + $0x38] sm:$0xff] %vm4961_vm13, %v4928_v58 }
 0x55a   : > { %v4934_v54 = vpop.permute.xlu1 %4933 }
 0x55b   : > { %4972 = vst.msk [vmem:[%s8132_s7 + $0x50] sm:$0xff] %vm4961_vm13, %v4934_v54  ;;  %v4932_v29 = vpop.permute.xlu0 %4931 }
 0x55c   : > { %4971 = vst.msk [vmem:[%s8132_s7 + $0x48] sm:$0xff] %vm4961_vm13, %v4932_v29 }
 0x55e   : > { %v4938_v43 = vpop.permute.xlu1 %4937 }
 0x55f   : > { %4974 = vst.msk [vmem:[%s8132_s7 + $0x60] sm:$0xff] %vm4961_vm13, %v4938_v43  ;;  %v4936_v2 = vpop.permute.xlu0 %4935 }
 0x560   : > { %4973 = vst.msk [vmem:[%s8132_s7 + $0x58] sm:$0xff] %vm4961_vm13, %v4936_v2 }
 0x562   : > { %v4942_v6 = vpop.permute.xlu1 %4941 }
 0x563   : > { %4976 = vst.msk [vmem:[%s8132_s7 + $0x70] sm:$0xff] %vm4961_vm13, %v4942_v6  ;;  %v4940_v40 = vpop.permute.xlu0 %4939 }
 0x564   : > { %4975 = vst.msk [vmem:[%s8132_s7 + $0x68] sm:$0xff] %vm4961_vm13, %v4940_v40 }
 0x567   : > { %v4944_v37 = vpop.permute.xlu0 %4943 }
 0x568   : > { %4977 = vst.msk [vmem:[%s8132_s7 + $0x78] sm:$0xff] %vm4961_vm13, %v4944_v37 }
 0x569 PF: > { %s17_s21 = sadd.s32 1, %s5586_s21  }
 0x56a   : > { %p14_p2 = scmp.ge.s32.totalorder %s17_s21, 4  }
 0x56c   :  { %16 = sbr.rel (!%p14_p2) target bundleno = 1 (0x1), region = 82 }
 0x573   :  { %5000 = vsyncpa [#allocation3], 1 }
 0x574   :  { %5002 = vsyncpa [#allocation3 + $0x1], 1 }

</bundles_post_ra>
